<compile_context>
chip_gen: v5e
topology: v5e:2x2
jax: 0.10.0
libtpu: 0.0.40
codegen_flags: <defaults>
</compile_context>

<pallas_src>
import jax
import jax.numpy as jnp
from jax.experimental import pallas as pl
from jax.experimental.pallas import tpu as pltpu


# ----------------------------------------------------------------------------
# Configuration
# ----------------------------------------------------------------------------
IMG = 16
IN_C = 3
PATCH = 4
N_PATCH = (IMG // PATCH) ** 2        # 16 patches
SEQ = N_PATCH + 1                    # 17 tokens (cls + patches)
SEQ_PAD = 32                         # padded to a multiple of 16 (bf16 packing)
EMBED_DIM = 32
NUM_HEADS = 4
HEAD_DIM = EMBED_DIM // NUM_HEADS    # 8
MLP_HIDDEN = EMBED_DIM * 2           # 64
PATCH_DIM = PATCH * PATCH * IN_C     # 48
CNN_C1 = 16
CNN_C2 = 32
HEAD_HIDDEN = 64                     # stand-in for 512 in the reference head
NUM_CLASSES = 3
OUT_PAD = 128                        # lane-dense logits store
LN_EPS = 1e-6                        # timm ViT LayerNorm eps
ATTN_SCALE = 1.0 / float(HEAD_DIM) ** 0.5

# CNN "stride-PAD_HW flattened" layout constants
PAD_HW = IMG + 2                     # 18 : zero-padded spatial extent
N_OUT_ROWS = IMG * PAD_HW            # 288: conv rows per image (incl. 2 pad cols / row)
CONV1_BIAS_COL = 27                  # validity-indicator column (weight row = conv1 bias)
CONV1_K = 32                         # 27 taps*chan + indicator, K padded to 32
CONV2_K = 9 * CNN_C1                 # 144
FLAT_ROWS = 328                      # padded act1 rows per image (>= 38 + 288, mult of 8)
ACT1_OFF = PAD_HW + 1                # 19 : where conv1 output (h=0,w=0) lands in act1
TAP_SHIFTS = tuple(dh * PAD_HW + dw for dh in range(3) for dw in range(3))
ZHEAD_ROWS = 24                      # zeroed top border rows 0..23 (covers 0..18)
ZTAIL_START = 304                    # zeroed bottom border rows 304..327 (covers 307..325)


# ----------------------------------------------------------------------------
# Packed broadcast-slab layouts
# ----------------------------------------------------------------------------
def _wslab_layout():
    layout = {}
    r = 0

    def add(name, nrows, ncols):
        nonlocal r
        layout[name] = (r, nrows, ncols)
        r += nrows

    add("patch_w", PATCH_DIM, EMBED_DIM)             # rows   0.. 48
    add("qkv_w", EMBED_DIM, 3 * EMBED_DIM)           # rows  48.. 80
    add("proj_w", EMBED_DIM, EMBED_DIM)              # rows  80..112
    add("mlp_w1", EMBED_DIM, MLP_HIDDEN)             # rows 112..144
    add("mlp_w2", MLP_HIDDEN, EMBED_DIM)             # rows 144..208
    add("fc1_w", EMBED_DIM + CNN_C2, HEAD_HIDDEN)    # rows 208..272
    add("fc2_w", HEAD_HIDDEN, OUT_PAD)               # rows 272..336 (cols 0..2 used)
    add("conv1_w", CONV1_K, CNN_C1)                  # rows 336..368 (row 27 = bias)
    add("conv2_w", CONV2_K, CNN_C2)                  # rows 368..512
    rows = -(-r // 8) * 8
    return layout, rows


_W_LAYOUT, WSLAB_ROWS = _wslab_layout()

_MISC_BIAS_NAMES = ("ln1_g", "ln1_b", "qkv_b", "proj_b", "ln2_g", "ln2_b",
                    "mlp_b1", "mlp_b2", "lnf_g", "lnf_b", "conv2_b",
                    "fc1_b", "fc2_b")


def _mslab_layout(nb):
    t = nb * SEQ_PAD
    off = {"addterm": 0, "mask": t}
    r = 2 * t
    for name in _MISC_BIAS_NAMES:
        off[name] = r
        r += 1
    rows = -(-r // 8) * 8
    return off, rows


# ----------------------------------------------------------------------------
# In-kernel helpers (f32 vector math, bf16 MXU operands, f32 accumulation)
# ----------------------------------------------------------------------------
def _mm(a, w):
    """a @ w on the MXU: bf16 operands, f32 accumulate."""
    return jax.lax.dot_general(
        a.astype(jnp.bfloat16), w.astype(jnp.bfloat16),
        dimension_numbers=(((1,), (0,)), ((), ())),
        preferred_element_type=jnp.float32)


def _mm_nt(a, b):
    """a @ b.T on the MXU (contract last dims): bf16 operands, f32 accumulate."""
    return jax.lax.dot_general(
        a.astype(jnp.bfloat16), b.astype(jnp.bfloat16),
        dimension_numbers=(((1,), (1,)), ((), ())),
        preferred_element_type=jnp.float32)


def _layernorm(x, g, b):
    mu = jnp.mean(x, axis=-1, keepdims=True)
    xc = x - mu
    var = jnp.mean(xc * xc, axis=-1, keepdims=True)
    return xc * jax.lax.rsqrt(var + LN_EPS) * g + b


def _gelu(x):
    # TODO(synk): torch nn.GELU defaults to exact erf; tanh approximation used here.
    return 0.5 * x * (1.0 + jnp.tanh(0.7978845608028654 *
                                     (x + 0.044715 * x * x * x)))


# ----------------------------------------------------------------------------
# Fused kernel factory: one grid step == `nb` images (ViT + CNN + head)
# ----------------------------------------------------------------------------
def _make_kernel(nb, moff):
    t_tok = nb * SEQ_PAD
    f32 = jnp.float32

    def wsl(ref, name):
        r0, nr, nc = _W_LAYOUT[name]
        return ref[r0:r0 + nr, 0:nc]

    def kernel(patches_ref, im2col1_ref, wslab_ref, mslab_ref, out_ref, act1_ref):
        def row(name, width=EMBED_DIM):
            r = moff[name]
            return mslab_ref[r:r + 1, 0:width]

        # ================================ ViT branch ================================
        addterm = mslab_ref[moff["addterm"]:moff["addterm"] + t_tok, 0:EMBED_DIM]
        mask_bias = mslab_ref[moff["mask"]:moff["mask"] + t_tok, 0:t_tok]

        # patch embedding over the padded token buffer (row 0 of each image = cls)
        x0 = _mm(patches_ref[...], wsl(wslab_ref, "patch_w")) + addterm

        # ---- multi-head self attention (pre-norm) ----
        y = _layernorm(x0, row("ln1_g"), row("ln1_b"))
        qkv = _mm(y, wsl(wslab_ref, "qkv_w")) + row("qkv_b", 3 * EMBED_DIM)
        heads = []
        for h in range(NUM_HEADS):
            lo = h * HEAD_DIM
            q = qkv[:, lo:lo + HEAD_DIM]
            k = qkv[:, EMBED_DIM + lo:EMBED_DIM + lo + HEAD_DIM]
            v = qkv[:, 2 * EMBED_DIM + lo:2 * EMBED_DIM + lo + HEAD_DIM]
            s = _mm_nt(q, k) * ATTN_SCALE + mask_bias              # (T, T)
            m = jnp.max(s, axis=-1, keepdims=True)
            p = jnp.exp(s - m)
            denom = jnp.sum(p, axis=-1, keepdims=True)
            heads.append(_mm(p, v) * pl.reciprocal(denom, approx=True))
        o_all = jnp.concatenate(heads, axis=-1)                    # (T, EMBED_DIM)
        x1 = x0 + _mm(o_all, wsl(wslab_ref, "proj_w")) + row("proj_b")

        # ---- MLP (pre-norm) ----
        y2 = _layernorm(x1, row("ln2_g"), row("ln2_b"))
        hmid = _gelu(_mm(y2, wsl(wslab_ref, "mlp_w1")) + row("mlp_b1", MLP_HIDDEN))
        x2 = x1 + _mm(hmid, wsl(wslab_ref, "mlp_w2")) + row("mlp_b2")

        # final LayerNorm on the cls rows only
        cls_rows = [x2[b * SEQ_PAD:b * SEQ_PAD + 1, :] for b in range(nb)]
        cls = cls_rows[0] if nb == 1 else jnp.concatenate(cls_rows, axis=0)
        vit_feat = _layernorm(cls, row("lnf_g"), row("lnf_b"))     # (nb, EMBED_DIM)

        # ================================ CNN branch ================================
        # conv1 + ReLU as ONE K-packed matmul.  im2col column 27 is a validity
        # indicator whose weight-slab row is the conv1 bias, so pad rows stay 0.
        c1 = jnp.maximum(_mm(im2col1_ref[...], wsl(wslab_ref, "conv1_w")), 0.0)

        # scatter conv1 output into the zero-padded stride-18 activation buffer
        # (border rows zeroed unconditionally every step)
        zpad = jnp.zeros((ZHEAD_ROWS, CNN_C1), f32)
        for b in range(nb):
            base = b * FLAT_ROWS
            act1_ref[base:base + ZHEAD_ROWS, :] = zpad
            act1_ref[base + ZTAIL_START:base + FLAT_ROWS, :] = zpad
            act1_ref[base + ACT1_OFF:base + ACT1_OFF + N_OUT_ROWS, :] = (
                c1[b * N_OUT_ROWS:(b + 1) * N_OUT_ROWS, :])

        # conv2 + ReLU: read the 9 shifted tap windows exactly once, lane-concat
        # them into a (rows, 144) im2col, and do ONE K-packed matmul.
        blocks = []
        for b in range(nb):
            base = b * FLAT_ROWS
            taps = [act1_ref[base + sh:base + sh + N_OUT_ROWS, :] for sh in TAP_SHIFTS]
            blocks.append(jnp.concatenate(taps, axis=-1))
        im2col2 = blocks[0] if nb == 1 else jnp.concatenate(blocks, axis=0)
        c2 = jnp.maximum(_mm(im2col2, wsl(wslab_ref, "conv2_w")) +
                         row("conv2_b", CNN_C2), 0.0)

        # masked global average pool over the IMG*IMG valid output positions
        gmask = im2col1_ref[:, CONV1_BIAS_COL:CONV1_BIAS_COL + 1]  # (nb*288, 1)
        c2m = c2 * gmask
        feats = [jnp.sum(c2m[b * N_OUT_ROWS:(b + 1) * N_OUT_ROWS, :],
                         axis=0, keepdims=True) for b in range(nb)]
        cnn_feat = (feats[0] if nb == 1 else
                    jnp.concatenate(feats, axis=0)) * (1.0 / (IMG * IMG))  # (nb, 32)

        # ============================ classification head ===========================
        # concat(vit_feat, cnn_feat) @ fc1_w  ==  vit@fc1_w[:D] + cnn@fc1_w[D:]
        r0 = _W_LAYOUT["fc1_w"][0]
        hfc = (_mm(vit_feat, wslab_ref[r0:r0 + EMBED_DIM, 0:HEAD_HIDDEN]) +
               _mm(cnn_feat, wslab_ref[r0 + EMBED_DIM:r0 + EMBED_DIM + CNN_C2,
                                       0:HEAD_HIDDEN]) +
               row("fc1_b", HEAD_HIDDEN))
        hfc = jnp.maximum(hfc, 0.0)
        # Dropout(0.5) is identity at inference (model.eval()).
        logits = _mm(hfc, wsl(wslab_ref, "fc2_w")) + row("fc2_b", OUT_PAD)  # (nb, 128)
        out_ref[0] = logits.astype(out_ref.dtype)

    return kernel


# ----------------------------------------------------------------------------
# Plain-JAX glue (input preparation only; fused into the input pipeline by XLA)
# ----------------------------------------------------------------------------
def extract_patches(x_nhwc, patch):
    """(B,H,W,C) -> (B, nP, patch*patch*C)."""
    B, H, W, C = x_nhwc.shape
    gh, gw = H // patch, W // patch
    x = x_nhwc.reshape(B, gh, patch, gw, patch, C)
    x = x.transpose(0, 1, 3, 2, 4, 5)
    return x.reshape(B, gh * gw, patch * patch * C)


def _default_images_per_step(batch):
    """Fold the batch into one grid step on single-TensorCore chips (v5e/v6e);
    keep one image per parallel grid step on multi-core chips (v7x)."""
    try:
        kind = jax.devices()[0].device_kind.lower()
    except Exception:
        return 1
    if any(tag in kind for tag in ("v5 lite", "v5e", "v6 lite", "v6e")):
        return batch
    return 1


def hybrid_vit_cnn_forward(params, x_nchw, images_per_step=None):
    f32 = jnp.float32
    x = jnp.transpose(x_nchw, (0, 2, 3, 1)).astype(f32)            # NHWC
    B = x.shape[0]
    nb = images_per_step if images_per_step is not None else _default_images_per_step(B)
    if nb < 1 or (B % nb) != 0:
        nb = 1
    nsteps = B // nb
    t_tok = nb * SEQ_PAD

    # ---- ViT input prep: zero-padded token buffer + additive cls/pos/bias term ----
    patches = extract_patches(x, PATCH)                            # (B, 16, 48)
    patches_pad = jnp.zeros((B, SEQ_PAD, PATCH_DIM), f32)
    patches_pad = patches_pad.at[:, 1:SEQ, :].set(patches)
    patches_flat = patches_pad.reshape(B * SEQ_PAD, PATCH_DIM)

    addterm = jnp.zeros((SEQ_PAD, EMBED_DIM), f32)
    addterm = addterm.at[0].set(params["cls_token"][0, 0] + params["pos_embed"][0, 0])
    addterm = addterm.at[1:SEQ].set(params["pos_embed"][0, 1:] +
                                    params["patch_b"][None, :])
    addterm_tiled = jnp.tile(addterm, (nb, 1))                     # (T, EMBED_DIM)

    # attention mask: key must be a real token of the SAME image (block diagonal)
    tok = jnp.arange(t_tok)
    img_id = tok // SEQ_PAD
    valid_key = (tok % SEQ_PAD) < SEQ
    mask = jnp.where((img_id[:, None] == img_id[None, :]) & valid_key[None, :],
                     0.0, -1e30).astype(f32)                       # (T, T)

    # ---- CNN input prep: conv1 im2col in stride-18 layout, K packed to 32 ----
    xp = jnp.pad(x, ((0, 0), (1, 1), (1, 1), (0, 0)))              # (B, 18, 18, 3)
    cols = [xp[:, dh:dh + IMG, dw:dw + IMG, :] for dh in range(3) for dw in range(3)]
    im2col_valid = jnp.concatenate(
        cols + [jnp.ones((B, IMG, IMG, 1), f32),                   # validity indicator
                jnp.zeros((B, IMG, IMG, CONV1_K - CONV1_BIAS_COL - 1), f32)],
        axis=-1)                                                   # (B, 16, 16, 32)
    im2col1 = jnp.zeros((B, IMG, PAD_HW, CONV1_K), f32)            # pad cols stay all-zero
    im2col1 = im2col1.at[:, :, :IMG, :].set(im2col_valid)
    im2col1_flat = im2col1.reshape(B * N_OUT_ROWS, CONV1_K)

    # ---- broadcast slabs: one bf16 weight slab + one f32 misc slab ----
    def put(slab, name, arr):
        r0, _, _ = _W_LAYOUT[name]
        return slab.at[r0:r0 + arr.shape[0], 0:arr.shape[1]].set(arr)

    wslab = jnp.zeros((WSLAB_ROWS, 128), f32)
    wslab = put(wslab, "patch_w", params["patch_w"])
    wslab = put(wslab, "qkv_w", params["qkv_w"])
    wslab = put(wslab, "proj_w", params["proj_w"])
    wslab = put(wslab, "mlp_w1", params["mlp_w1"])
    wslab = put(wslab, "mlp_w2", params["mlp_w2"])
    wslab = put(wslab, "fc1_w", params["fc1_w"])
    wslab = put(wslab, "fc2_w", params["fc2_w"])                   # cols 0..2, rest 0
    conv1_slab = jnp.concatenate([params["conv1_w"],
                                  params["conv1_b"][None, :]], axis=0)   # (28, 16)
    wslab = put(wslab, "conv1_w", conv1_slab)
    wslab = put(wslab, "conv2_w", params["conv2_w"])
    wslab = wslab.astype(jnp.bfloat16)

    moff, mrows = _mslab_layout(nb)
    mslab = jnp.zeros((mrows, 128), f32)
    mslab = mslab.at[moff["addterm"]:moff["addterm"] + t_tok, 0:EMBED_DIM].set(addterm_tiled)
    mslab = mslab.at[moff["mask"]:moff["mask"] + t_tok, 0:t_tok].set(mask)
    for name in _MISC_BIAS_NAMES:
        vec = params[name]
        mslab = mslab.at[moff[name], 0:vec.shape[0]].set(vec)

    kernel = _make_kernel(nb, moff)
    out = pl.pallas_call(
        kernel,
        out_shape=jax.ShapeDtypeStruct((nsteps, nb, OUT_PAD), f32),
        grid=(nsteps,),
        in_specs=[
            pl.BlockSpec((nb * SEQ_PAD, PATCH_DIM), lambda i: (i, 0)),
            pl.BlockSpec((nb * N_OUT_ROWS, CONV1_K), lambda i: (i, 0)),
            pl.BlockSpec((WSLAB_ROWS, 128), lambda i: (0, 0)),
            pl.BlockSpec((mrows, 128), lambda i: (0, 0)),
        ],
        out_specs=pl.BlockSpec((1, nb, OUT_PAD), lambda i: (i, 0, 0)),
        scratch_shapes=[pltpu.VMEM((nb * FLAT_ROWS, CNN_C1), f32)],
        compiler_params=pltpu.CompilerParams(
            dimension_semantics=("parallel",)),
    )(patches_flat, im2col1_flat, wslab, mslab)
    return out.reshape(B, OUT_PAD)[:, :NUM_CLASSES]


# ----------------------------------------------------------------------------
# Deterministic parameter init (same structure / layout as before)
# ----------------------------------------------------------------------------
def init_params():
    key = jax.random.PRNGKey(0)
    ks = iter(jax.random.split(key, 32))
    s = 0.02

    def w(shape):
        return (s * jax.random.normal(next(ks), shape)).astype(jnp.float32)

    def z(shape):
        return jnp.zeros(shape, jnp.float32)

    return {
        # ViT branch
        "patch_w": w((PATCH_DIM, EMBED_DIM)), "patch_b": z((EMBED_DIM,)),
        "cls_token": w((1, 1, EMBED_DIM)),
        "pos_embed": w((1, SEQ, EMBED_DIM)),
        "ln1_g": jnp.ones((EMBED_DIM,), jnp.float32), "ln1_b": z((EMBED_DIM,)),
        "qkv_w": w((EMBED_DIM, 3 * EMBED_DIM)), "qkv_b": z((3 * EMBED_DIM,)),
        "proj_w": w((EMBED_DIM, EMBED_DIM)), "proj_b": z((EMBED_DIM,)),
        "ln2_g": jnp.ones((EMBED_DIM,), jnp.float32), "ln2_b": z((EMBED_DIM,)),
        "mlp_w1": w((EMBED_DIM, MLP_HIDDEN)), "mlp_b1": z((MLP_HIDDEN,)),
        "mlp_w2": w((MLP_HIDDEN, EMBED_DIM)), "mlp_b2": z((EMBED_DIM,)),
        "lnf_g": jnp.ones((EMBED_DIM,), jnp.float32), "lnf_b": z((EMBED_DIM,)),
        # CNN branch (weight rows ordered (dh, dw, cin), columns = cout)
        "conv1_w": w((9 * IN_C, CNN_C1)), "conv1_b": z((CNN_C1,)),
        "conv2_w": w((9 * CNN_C1, CNN_C2)), "conv2_b": z((CNN_C2,)),
        # Head: Linear -> ReLU -> Dropout(0.5) -> Linear
        "fc1_w": w((EMBED_DIM + CNN_C2, HEAD_HIDDEN)), "fc1_b": z((HEAD_HIDDEN,)),
        "fc2_w": w((HEAD_HIDDEN, NUM_CLASSES)), "fc2_b": z((NUM_CLASSES,)),
    }


# ----------------------------------------------------------------------------
if __name__ == "__main__":
    params = init_params()
    key = jax.random.PRNGKey(0)
    x = jax.random.normal(key, (2, IN_C, IMG, IMG), dtype=jnp.float32)   # NCHW
    out = jax.jit(hybrid_vit_cnn_forward)(params, x)
    out = jax.block_until_ready(out)
    assert out.shape == (2, NUM_CLASSES), out.shape
    assert bool(jnp.all(jnp.isfinite(out)))
    print("KERNEL_OK")
</pallas_src>

<mosaic_0001>
module attributes {stable_mosaic.version = 11 : i64} {
  func.func @kernel(%arg0: i32, %arg1: memref<32x48xf32, #tpu.memory_space<vmem>>, %arg2: memref<288x32xf32, #tpu.memory_space<vmem>>, %arg3: memref<512x128xbf16, #tpu.memory_space<vmem>>, %arg4: memref<80x128xf32, #tpu.memory_space<vmem>>, %arg5: memref<1x1x128xf32, #tpu.memory_space<vmem>>, %arg6: memref<328x16xf32, #tpu.memory_space<vmem>>) attributes {dimension_semantics = [#tpu.dimension_semantics<parallel>], iteration_bounds = array<i64: 2>, scalar_prefetch = 0 : i64, scratch_operands = 1 : i64, tpu.core_type = #tpu.core_type<tc>, window_params = [{transform_indices = @transform_0, window_bounds = array<i64: 32, 48>}, {transform_indices = @transform_1, window_bounds = array<i64: 288, 32>}, {pipeline_mode = #tpu.pipeline_mode<synchronous>, transform_indices = @transform_2, window_bounds = array<i64: 512, 128>}, {pipeline_mode = #tpu.pipeline_mode<synchronous>, transform_indices = @transform_3, window_bounds = array<i64: 80, 128>}, {transform_indices = @transform_4, window_bounds = array<i64: 1, 1, 128>}]} {
    %c0 = arith.constant 0 : index
    %c0_0 = arith.constant 0 : index
    %0 = vector.load %arg4[%c0, %c0_0] : memref<80x128xf32, #tpu.memory_space<vmem>>, vector<32x32xf32>
    %c32 = arith.constant 32 : index
    %c0_1 = arith.constant 0 : index
    %1 = vector.load %arg4[%c32, %c0_1] : memref<80x128xf32, #tpu.memory_space<vmem>>, vector<32x32xf32>
    %c0_2 = arith.constant 0 : index
    %c0_3 = arith.constant 0 : index
    %2 = vector.load %arg1[%c0_2, %c0_3] : memref<32x48xf32, #tpu.memory_space<vmem>>, vector<32x48xf32>
    %c0_4 = arith.constant 0 : index
    %c0_5 = arith.constant 0 : index
    %3 = vector.load %arg3[%c0_4, %c0_5] : memref<512x128xbf16, #tpu.memory_space<vmem>>, vector<48x32xbf16>
    %4 = arith.truncf %2 : vector<32x48xf32> to vector<32x48xbf16>
    %cst = arith.constant dense<0.000000e+00> : vector<32x32xf32>
    %5 = tpu.matmul %4, %3, %cst {dimension_numbers = #tpu.dot_dimension_numbers<[1], [0], [0], [1], [0, 0, 1, 1], [], []>} : vector<32x48xbf16>, vector<48x32xbf16>, vector<32x32xf32> -> vector<32x32xf32>
    %6 = arith.addf %5, %0 : vector<32x32xf32>
    %c64 = arith.constant 64 : index
    %c0_6 = arith.constant 0 : index
    %7 = vector.load %arg4[%c64, %c0_6] : memref<80x128xf32, #tpu.memory_space<vmem>>, vector<1x32xf32>
    %c65 = arith.constant 65 : index
    %c0_7 = arith.constant 0 : index
    %8 = vector.load %arg4[%c65, %c0_7] : memref<80x128xf32, #tpu.memory_space<vmem>>, vector<1x32xf32>
    %cst_8 = arith.constant dense<0.000000e+00> : vector<32xf32>
    %9 = vector.multi_reduction <add>, %6, %cst_8 [1] : vector<32x32xf32> to vector<32xf32>
    %10 = vector.shape_cast %9 : vector<32xf32> to vector<32x1xf32>
    %cst_9 = arith.constant 3.200000e+01 : f32
    %11 = vector.broadcast %cst_9 : f32 to vector<32x1xf32>
    %12 = arith.divf %10, %11 : vector<32x1xf32>
    %13 = vector.broadcast %12 : vector<32x1xf32> to vector<32x32xf32>
    %14 = arith.subf %6, %13 : vector<32x32xf32>
    %15 = arith.mulf %14, %14 : vector<32x32xf32>
    %cst_10 = arith.constant dense<0.000000e+00> : vector<32xf32>
    %16 = vector.multi_reduction <add>, %15, %cst_10 [1] : vector<32x32xf32> to vector<32xf32>
    %17 = vector.shape_cast %16 : vector<32xf32> to vector<32x1xf32>
    %cst_11 = arith.constant 3.200000e+01 : f32
    %18 = vector.broadcast %cst_11 : f32 to vector<32x1xf32>
    %19 = arith.divf %17, %18 : vector<32x1xf32>
    %cst_12 = arith.constant 9.99999997E-7 : f32
    %20 = vector.broadcast %cst_12 : f32 to vector<32x1xf32>
    %21 = arith.addf %19, %20 : vector<32x1xf32>
    %22 = math.rsqrt %21 : vector<32x1xf32>
    %23 = vector.broadcast %22 : vector<32x1xf32> to vector<32x32xf32>
    %24 = arith.mulf %14, %23 : vector<32x32xf32>
    %25 = vector.broadcast %7 : vector<1x32xf32> to vector<32x32xf32>
    %26 = arith.mulf %24, %25 : vector<32x32xf32>
    %27 = vector.broadcast %8 : vector<1x32xf32> to vector<32x32xf32>
    %28 = arith.addf %26, %27 : vector<32x32xf32>
    %c48 = arith.constant 48 : index
    %c0_13 = arith.constant 0 : index
    %29 = vector.load %arg3[%c48, %c0_13] : memref<512x128xbf16, #tpu.memory_space<vmem>>, vector<32x96xbf16>
    %30 = arith.truncf %28 : vector<32x32xf32> to vector<32x32xbf16>
    %cst_14 = arith.constant dense<0.000000e+00> : vector<32x96xf32>
    %31 = tpu.matmul %30, %29, %cst_14 {dimension_numbers = #tpu.dot_dimension_numbers<[1], [0], [0], [1], [0, 0, 1, 1], [], []>} : vector<32x32xbf16>, vector<32x96xbf16>, vector<32x96xf32> -> vector<32x96xf32>
    %c66 = arith.constant 66 : index
    %c0_15 = arith.constant 0 : index
    %32 = vector.load %arg4[%c66, %c0_15] : memref<80x128xf32, #tpu.memory_space<vmem>>, vector<1x96xf32>
    %33 = vector.broadcast %32 : vector<1x96xf32> to vector<32x96xf32>
    %34 = arith.addf %31, %33 : vector<32x96xf32>
    %35 = vector.extract_strided_slice %34 {offsets = [0, 0], sizes = [32, 8], strides = [1, 1]} : vector<32x96xf32> to vector<32x8xf32>
    %36 = vector.extract_strided_slice %34 {offsets = [0, 32], sizes = [32, 8], strides = [1, 1]} : vector<32x96xf32> to vector<32x8xf32>
    %37 = vector.extract_strided_slice %34 {offsets = [0, 64], sizes = [32, 8], strides = [1, 1]} : vector<32x96xf32> to vector<32x8xf32>
    %38 = arith.truncf %35 : vector<32x8xf32> to vector<32x8xbf16>
    %39 = arith.truncf %36 : vector<32x8xf32> to vector<32x8xbf16>
    %cst_16 = arith.constant dense<0.000000e+00> : vector<32x32xf32>
    %40 = tpu.matmul %38, %39, %cst_16 {dimension_numbers = #tpu.dot_dimension_numbers<[1], [1], [0], [0], [0, 0, 1, 0], [], []>} : vector<32x8xbf16>, vector<32x8xbf16>, vector<32x32xf32> -> vector<32x32xf32>
    %cst_17 = arith.constant 0.353553385 : f32
    %41 = vector.broadcast %cst_17 : f32 to vector<32x32xf32>
    %42 = arith.mulf %40, %41 : vector<32x32xf32>
    %43 = arith.addf %42, %1 : vector<32x32xf32>
    %cst_18 = arith.constant dense<0xFF800000> : vector<32xf32>
    %44 = vector.multi_reduction <maximumf>, %43, %cst_18 [1] : vector<32x32xf32> to vector<32xf32>
    %45 = vector.shape_cast %44 : vector<32xf32> to vector<32x1xf32>
    %46 = vector.broadcast %45 : vector<32x1xf32> to vector<32x32xf32>
    %47 = arith.subf %43, %46 : vector<32x32xf32>
    %48 = math.exp %47 : vector<32x32xf32>
    %cst_19 = arith.constant dense<0.000000e+00> : vector<32xf32>
    %49 = vector.multi_reduction <add>, %48, %cst_19 [1] : vector<32x32xf32> to vector<32xf32>
    %50 = vector.shape_cast %49 : vector<32xf32> to vector<32x1xf32>
    %51 = arith.truncf %48 : vector<32x32xf32> to vector<32x32xbf16>
    %52 = arith.truncf %37 : vector<32x8xf32> to vector<32x8xbf16>
    %cst_20 = arith.constant dense<0.000000e+00> : vector<32x8xf32>
    %53 = tpu.matmul %51, %52, %cst_20 {dimension_numbers = #tpu.dot_dimension_numbers<[1], [0], [0], [1], [0, 0, 1, 1], [], []>} : vector<32x32xbf16>, vector<32x8xbf16>, vector<32x8xf32> -> vector<32x8xf32>
    %54 = tpu.reciprocal %50 {approx = true} : vector<32x1xf32> -> vector<32x1xf32>
    %55 = vector.broadcast %54 : vector<32x1xf32> to vector<32x8xf32>
    %56 = arith.mulf %53, %55 : vector<32x8xf32>
    %57 = vector.extract_strided_slice %34 {offsets = [0, 8], sizes = [32, 8], strides = [1, 1]} : vector<32x96xf32> to vector<32x8xf32>
    %58 = vector.extract_strided_slice %34 {offsets = [0, 40], sizes = [32, 8], strides = [1, 1]} : vector<32x96xf32> to vector<32x8xf32>
    %59 = vector.extract_strided_slice %34 {offsets = [0, 72], sizes = [32, 8], strides = [1, 1]} : vector<32x96xf32> to vector<32x8xf32>
    %60 = arith.truncf %57 : vector<32x8xf32> to vector<32x8xbf16>
    %61 = arith.truncf %58 : vector<32x8xf32> to vector<32x8xbf16>
    %cst_21 = arith.constant dense<0.000000e+00> : vector<32x32xf32>
    %62 = tpu.matmul %60, %61, %cst_21 {dimension_numbers = #tpu.dot_dimension_numbers<[1], [1], [0], [0], [0, 0, 1, 0], [], []>} : vector<32x8xbf16>, vector<32x8xbf16>, vector<32x32xf32> -> vector<32x32xf32>
    %cst_22 = arith.constant 0.353553385 : f32
    %63 = vector.broadcast %cst_22 : f32 to vector<32x32xf32>
    %64 = arith.mulf %62, %63 : vector<32x32xf32>
    %65 = arith.addf %64, %1 : vector<32x32xf32>
    %cst_23 = arith.constant dense<0xFF800000> : vector<32xf32>
    %66 = vector.multi_reduction <maximumf>, %65, %cst_23 [1] : vector<32x32xf32> to vector<32xf32>
    %67 = vector.shape_cast %66 : vector<32xf32> to vector<32x1xf32>
    %68 = vector.broadcast %67 : vector<32x1xf32> to vector<32x32xf32>
    %69 = arith.subf %65, %68 : vector<32x32xf32>
    %70 = math.exp %69 : vector<32x32xf32>
    %cst_24 = arith.constant dense<0.000000e+00> : vector<32xf32>
    %71 = vector.multi_reduction <add>, %70, %cst_24 [1] : vector<32x32xf32> to vector<32xf32>
    %72 = vector.shape_cast %71 : vector<32xf32> to vector<32x1xf32>
    %73 = arith.truncf %70 : vector<32x32xf32> to vector<32x32xbf16>
    %74 = arith.truncf %59 : vector<32x8xf32> to vector<32x8xbf16>
    %cst_25 = arith.constant dense<0.000000e+00> : vector<32x8xf32>
    %75 = tpu.matmul %73, %74, %cst_25 {dimension_numbers = #tpu.dot_dimension_numbers<[1], [0], [0], [1], [0, 0, 1, 1], [], []>} : vector<32x32xbf16>, vector<32x8xbf16>, vector<32x8xf32> -> vector<32x8xf32>
    %76 = tpu.reciprocal %72 {approx = true} : vector<32x1xf32> -> vector<32x1xf32>
    %77 = vector.broadcast %76 : vector<32x1xf32> to vector<32x8xf32>
    %78 = arith.mulf %75, %77 : vector<32x8xf32>
    %79 = vector.extract_strided_slice %34 {offsets = [0, 16], sizes = [32, 8], strides = [1, 1]} : vector<32x96xf32> to vector<32x8xf32>
    %80 = vector.extract_strided_slice %34 {offsets = [0, 48], sizes = [32, 8], strides = [1, 1]} : vector<32x96xf32> to vector<32x8xf32>
    %81 = vector.extract_strided_slice %34 {offsets = [0, 80], sizes = [32, 8], strides = [1, 1]} : vector<32x96xf32> to vector<32x8xf32>
    %82 = arith.truncf %79 : vector<32x8xf32> to vector<32x8xbf16>
    %83 = arith.truncf %80 : vector<32x8xf32> to vector<32x8xbf16>
    %cst_26 = arith.constant dense<0.000000e+00> : vector<32x32xf32>
    %84 = tpu.matmul %82, %83, %cst_26 {dimension_numbers = #tpu.dot_dimension_numbers<[1], [1], [0], [0], [0, 0, 1, 0], [], []>} : vector<32x8xbf16>, vector<32x8xbf16>, vector<32x32xf32> -> vector<32x32xf32>
    %cst_27 = arith.constant 0.353553385 : f32
    %85 = vector.broadcast %cst_27 : f32 to vector<32x32xf32>
    %86 = arith.mulf %84, %85 : vector<32x32xf32>
    %87 = arith.addf %86, %1 : vector<32x32xf32>
    %cst_28 = arith.constant dense<0xFF800000> : vector<32xf32>
    %88 = vector.multi_reduction <maximumf>, %87, %cst_28 [1] : vector<32x32xf32> to vector<32xf32>
    %89 = vector.shape_cast %88 : vector<32xf32> to vector<32x1xf32>
    %90 = vector.broadcast %89 : vector<32x1xf32> to vector<32x32xf32>
    %91 = arith.subf %87, %90 : vector<32x32xf32>
    %92 = math.exp %91 : vector<32x32xf32>
    %cst_29 = arith.constant dense<0.000000e+00> : vector<32xf32>
    %93 = vector.multi_reduction <add>, %92, %cst_29 [1] : vector<32x32xf32> to vector<32xf32>
    %94 = vector.shape_cast %93 : vector<32xf32> to vector<32x1xf32>
    %95 = arith.truncf %92 : vector<32x32xf32> to vector<32x32xbf16>
    %96 = arith.truncf %81 : vector<32x8xf32> to vector<32x8xbf16>
    %cst_30 = arith.constant dense<0.000000e+00> : vector<32x8xf32>
    %97 = tpu.matmul %95, %96, %cst_30 {dimension_numbers = #tpu.dot_dimension_numbers<[1], [0], [0], [1], [0, 0, 1, 1], [], []>} : vector<32x32xbf16>, vector<32x8xbf16>, vector<32x8xf32> -> vector<32x8xf32>
    %98 = tpu.reciprocal %94 {approx = true} : vector<32x1xf32> -> vector<32x1xf32>
    %99 = vector.broadcast %98 : vector<32x1xf32> to vector<32x8xf32>
    %100 = arith.mulf %97, %99 : vector<32x8xf32>
    %101 = vector.extract_strided_slice %34 {offsets = [0, 24], sizes = [32, 8], strides = [1, 1]} : vector<32x96xf32> to vector<32x8xf32>
    %102 = vector.extract_strided_slice %34 {offsets = [0, 56], sizes = [32, 8], strides = [1, 1]} : vector<32x96xf32> to vector<32x8xf32>
    %103 = vector.extract_strided_slice %34 {offsets = [0, 88], sizes = [32, 8], strides = [1, 1]} : vector<32x96xf32> to vector<32x8xf32>
    %104 = arith.truncf %101 : vector<32x8xf32> to vector<32x8xbf16>
    %105 = arith.truncf %102 : vector<32x8xf32> to vector<32x8xbf16>
    %cst_31 = arith.constant dense<0.000000e+00> : vector<32x32xf32>
    %106 = tpu.matmul %104, %105, %cst_31 {dimension_numbers = #tpu.dot_dimension_numbers<[1], [1], [0], [0], [0, 0, 1, 0], [], []>} : vector<32x8xbf16>, vector<32x8xbf16>, vector<32x32xf32> -> vector<32x32xf32>
    %cst_32 = arith.constant 0.353553385 : f32
    %107 = vector.broadcast %cst_32 : f32 to vector<32x32xf32>
    %108 = arith.mulf %106, %107 : vector<32x32xf32>
    %109 = arith.addf %108, %1 : vector<32x32xf32>
    %cst_33 = arith.constant dense<0xFF800000> : vector<32xf32>
    %110 = vector.multi_reduction <maximumf>, %109, %cst_33 [1] : vector<32x32xf32> to vector<32xf32>
    %111 = vector.shape_cast %110 : vector<32xf32> to vector<32x1xf32>
    %112 = vector.broadcast %111 : vector<32x1xf32> to vector<32x32xf32>
    %113 = arith.subf %109, %112 : vector<32x32xf32>
    %114 = math.exp %113 : vector<32x32xf32>
    %cst_34 = arith.constant dense<0.000000e+00> : vector<32xf32>
    %115 = vector.multi_reduction <add>, %114, %cst_34 [1] : vector<32x32xf32> to vector<32xf32>
    %116 = vector.shape_cast %115 : vector<32xf32> to vector<32x1xf32>
    %117 = arith.truncf %114 : vector<32x32xf32> to vector<32x32xbf16>
    %118 = arith.truncf %103 : vector<32x8xf32> to vector<32x8xbf16>
    %cst_35 = arith.constant dense<0.000000e+00> : vector<32x8xf32>
    %119 = tpu.matmul %117, %118, %cst_35 {dimension_numbers = #tpu.dot_dimension_numbers<[1], [0], [0], [1], [0, 0, 1, 1], [], []>} : vector<32x32xbf16>, vector<32x8xbf16>, vector<32x8xf32> -> vector<32x8xf32>
    %120 = tpu.reciprocal %116 {approx = true} : vector<32x1xf32> -> vector<32x1xf32>
    %121 = vector.broadcast %120 : vector<32x1xf32> to vector<32x8xf32>
    %122 = arith.mulf %119, %121 : vector<32x8xf32>
    %123 = tpu.concatenate %56, %78, %100, %122 in 1 : vector<32x8xf32>, vector<32x8xf32>, vector<32x8xf32>, vector<32x8xf32> -> vector<32x32xf32>
    %c80 = arith.constant 80 : index
    %c0_36 = arith.constant 0 : index
    %124 = vector.load %arg3[%c80, %c0_36] : memref<512x128xbf16, #tpu.memory_space<vmem>>, vector<32x32xbf16>
    %125 = arith.truncf %123 : vector<32x32xf32> to vector<32x32xbf16>
    %cst_37 = arith.constant dense<0.000000e+00> : vector<32x32xf32>
    %126 = tpu.matmul %125, %124, %cst_37 {dimension_numbers = #tpu.dot_dimension_numbers<[1], [0], [0], [1], [0, 0, 1, 1], [], []>} : vector<32x32xbf16>, vector<32x32xbf16>, vector<32x32xf32> -> vector<32x32xf32>
    %127 = arith.addf %6, %126 : vector<32x32xf32>
    %c67 = arith.constant 67 : index
    %c0_38 = arith.constant 0 : index
    %128 = vector.load %arg4[%c67, %c0_38] : memref<80x128xf32, #tpu.memory_space<vmem>>, vector<1x32xf32>
    %129 = vector.broadcast %128 : vector<1x32xf32> to vector<32x32xf32>
    %130 = arith.addf %127, %129 : vector<32x32xf32>
    %c68 = arith.constant 68 : index
    %c0_39 = arith.constant 0 : index
    %131 = vector.load %arg4[%c68, %c0_39] : memref<80x128xf32, #tpu.memory_space<vmem>>, vector<1x32xf32>
    %c69 = arith.constant 69 : index
    %c0_40 = arith.constant 0 : index
    %132 = vector.load %arg4[%c69, %c0_40] : memref<80x128xf32, #tpu.memory_space<vmem>>, vector<1x32xf32>
    %cst_41 = arith.constant dense<0.000000e+00> : vector<32xf32>
    %133 = vector.multi_reduction <add>, %130, %cst_41 [1] : vector<32x32xf32> to vector<32xf32>
    %134 = vector.shape_cast %133 : vector<32xf32> to vector<32x1xf32>
    %cst_42 = arith.constant 3.200000e+01 : f32
    %135 = vector.broadcast %cst_42 : f32 to vector<32x1xf32>
    %136 = arith.divf %134, %135 : vector<32x1xf32>
    %137 = vector.broadcast %136 : vector<32x1xf32> to vector<32x32xf32>
    %138 = arith.subf %130, %137 : vector<32x32xf32>
    %139 = arith.mulf %138, %138 : vector<32x32xf32>
    %cst_43 = arith.constant dense<0.000000e+00> : vector<32xf32>
    %140 = vector.multi_reduction <add>, %139, %cst_43 [1] : vector<32x32xf32> to vector<32xf32>
    %141 = vector.shape_cast %140 : vector<32xf32> to vector<32x1xf32>
    %cst_44 = arith.constant 3.200000e+01 : f32
    %142 = vector.broadcast %cst_44 : f32 to vector<32x1xf32>
    %143 = arith.divf %141, %142 : vector<32x1xf32>
    %cst_45 = arith.constant 9.99999997E-7 : f32
    %144 = vector.broadcast %cst_45 : f32 to vector<32x1xf32>
    %145 = arith.addf %143, %144 : vector<32x1xf32>
    %146 = math.rsqrt %145 : vector<32x1xf32>
    %147 = vector.broadcast %146 : vector<32x1xf32> to vector<32x32xf32>
    %148 = arith.mulf %138, %147 : vector<32x32xf32>
    %149 = vector.broadcast %131 : vector<1x32xf32> to vector<32x32xf32>
    %150 = arith.mulf %148, %149 : vector<32x32xf32>
    %151 = vector.broadcast %132 : vector<1x32xf32> to vector<32x32xf32>
    %152 = arith.addf %150, %151 : vector<32x32xf32>
    %c112 = arith.constant 112 : index
    %c0_46 = arith.constant 0 : index
    %153 = vector.load %arg3[%c112, %c0_46] : memref<512x128xbf16, #tpu.memory_space<vmem>>, vector<32x64xbf16>
    %154 = arith.truncf %152 : vector<32x32xf32> to vector<32x32xbf16>
    %cst_47 = arith.constant dense<0.000000e+00> : vector<32x64xf32>
    %155 = tpu.matmul %154, %153, %cst_47 {dimension_numbers = #tpu.dot_dimension_numbers<[1], [0], [0], [1], [0, 0, 1, 1], [], []>} : vector<32x32xbf16>, vector<32x64xbf16>, vector<32x64xf32> -> vector<32x64xf32>
    %c70 = arith.constant 70 : index
    %c0_48 = arith.constant 0 : index
    %156 = vector.load %arg4[%c70, %c0_48] : memref<80x128xf32, #tpu.memory_space<vmem>>, vector<1x64xf32>
    %157 = vector.broadcast %156 : vector<1x64xf32> to vector<32x64xf32>
    %158 = arith.addf %155, %157 : vector<32x64xf32>
    %cst_49 = arith.constant 5.000000e-01 : f32
    %159 = vector.broadcast %cst_49 : f32 to vector<32x64xf32>
    %160 = arith.mulf %159, %158 : vector<32x64xf32>
    %cst_50 = arith.constant 4.471500e-02 : f32
    %161 = vector.broadcast %cst_50 : f32 to vector<32x64xf32>
    %162 = arith.mulf %161, %158 : vector<32x64xf32>
    %163 = arith.mulf %162, %158 : vector<32x64xf32>
    %164 = arith.mulf %163, %158 : vector<32x64xf32>
    %165 = arith.addf %158, %164 : vector<32x64xf32>
    %cst_51 = arith.constant 0.797884583 : f32
    %166 = vector.broadcast %cst_51 : f32 to vector<32x64xf32>
    %167 = arith.mulf %166, %165 : vector<32x64xf32>
    %168 = math.tanh %167 : vector<32x64xf32>
    %cst_52 = arith.constant 1.000000e+00 : f32
    %169 = vector.broadcast %cst_52 : f32 to vector<32x64xf32>
    %170 = arith.addf %169, %168 : vector<32x64xf32>
    %171 = arith.mulf %160, %170 : vector<32x64xf32>
    %c144 = arith.constant 144 : index
    %c0_53 = arith.constant 0 : index
    %172 = vector.load %arg3[%c144, %c0_53] : memref<512x128xbf16, #tpu.memory_space<vmem>>, vector<64x32xbf16>
    %173 = arith.truncf %171 : vector<32x64xf32> to vector<32x64xbf16>
    %cst_54 = arith.constant dense<0.000000e+00> : vector<32x32xf32>
    %174 = tpu.matmul %173, %172, %cst_54 {dimension_numbers = #tpu.dot_dimension_numbers<[1], [0], [0], [1], [0, 0, 1, 1], [], []>} : vector<32x64xbf16>, vector<64x32xbf16>, vector<32x32xf32> -> vector<32x32xf32>
    %175 = arith.addf %130, %174 : vector<32x32xf32>
    %c71 = arith.constant 71 : index
    %c0_55 = arith.constant 0 : index
    %176 = vector.load %arg4[%c71, %c0_55] : memref<80x128xf32, #tpu.memory_space<vmem>>, vector<1x32xf32>
    %177 = vector.broadcast %176 : vector<1x32xf32> to vector<32x32xf32>
    %178 = arith.addf %175, %177 : vector<32x32xf32>
    %179 = vector.extract_strided_slice %178 {offsets = [0, 0], sizes = [1, 32], strides = [1, 1]} : vector<32x32xf32> to vector<1x32xf32>
    %c72 = arith.constant 72 : index
    %c0_56 = arith.constant 0 : index
    %180 = vector.load %arg4[%c72, %c0_56] : memref<80x128xf32, #tpu.memory_space<vmem>>, vector<1x32xf32>
    %c73 = arith.constant 73 : index
    %c0_57 = arith.constant 0 : index
    %181 = vector.load %arg4[%c73, %c0_57] : memref<80x128xf32, #tpu.memory_space<vmem>>, vector<1x32xf32>
    %cst_58 = arith.constant dense<0.000000e+00> : vector<1xf32>
    %182 = vector.multi_reduction <add>, %179, %cst_58 [1] : vector<1x32xf32> to vector<1xf32>
    %183 = vector.shape_cast %182 : vector<1xf32> to vector<1x1xf32>
    %cst_59 = arith.constant 3.200000e+01 : f32
    %184 = vector.broadcast %cst_59 : f32 to vector<1x1xf32>
    %185 = arith.divf %183, %184 : vector<1x1xf32>
    %186 = vector.broadcast %185 : vector<1x1xf32> to vector<1x32xf32>
    %187 = arith.subf %179, %186 : vector<1x32xf32>
    %188 = arith.mulf %187, %187 : vector<1x32xf32>
    %cst_60 = arith.constant dense<0.000000e+00> : vector<1xf32>
    %189 = vector.multi_reduction <add>, %188, %cst_60 [1] : vector<1x32xf32> to vector<1xf32>
    %190 = vector.shape_cast %189 : vector<1xf32> to vector<1x1xf32>
    %cst_61 = arith.constant 3.200000e+01 : f32
    %191 = vector.broadcast %cst_61 : f32 to vector<1x1xf32>
    %192 = arith.divf %190, %191 : vector<1x1xf32>
    %cst_62 = arith.constant 9.99999997E-7 : f32
    %193 = vector.broadcast %cst_62 : f32 to vector<1x1xf32>
    %194 = arith.addf %192, %193 : vector<1x1xf32>
    %195 = math.rsqrt %194 : vector<1x1xf32>
    %196 = vector.broadcast %195 : vector<1x1xf32> to vector<1x32xf32>
    %197 = arith.mulf %187, %196 : vector<1x32xf32>
    %198 = arith.mulf %197, %180 : vector<1x32xf32>
    %199 = arith.addf %198, %181 : vector<1x32xf32>
    %c0_63 = arith.constant 0 : index
    %c0_64 = arith.constant 0 : index
    %200 = vector.load %arg2[%c0_63, %c0_64] : memref<288x32xf32, #tpu.memory_space<vmem>>, vector<288x32xf32>
    %c336 = arith.constant 336 : index
    %c0_65 = arith.constant 0 : index
    %201 = vector.load %arg3[%c336, %c0_65] : memref<512x128xbf16, #tpu.memory_space<vmem>>, vector<32x16xbf16>
    %202 = arith.truncf %200 : vector<288x32xf32> to vector<288x32xbf16>
    %cst_66 = arith.constant dense<0.000000e+00> : vector<288x16xf32>
    %203 = tpu.matmul %202, %201, %cst_66 {dimension_numbers = #tpu.dot_dimension_numbers<[1], [0], [0], [1], [0, 0, 1, 1], [], []>} : vector<288x32xbf16>, vector<32x16xbf16>, vector<288x16xf32> -> vector<288x16xf32>
    %cst_67 = arith.constant 0.000000e+00 : f32
    %204 = vector.broadcast %cst_67 : f32 to vector<288x16xf32>
    %205 = arith.maximumf %203, %204 : vector<288x16xf32>
    %cst_68 = arith.constant 0.000000e+00 : f32
    %206 = vector.broadcast %cst_68 : f32 to vector<24x16xf32>
    %c0_69 = arith.constant 0 : index
    %c0_70 = arith.constant 0 : index
    %207 = vector.load %arg6[%c0_69, %c0_70] : memref<328x16xf32, #tpu.memory_space<vmem>>, vector<24x16xf32>
    tpu.vector_store %arg6[%c0_69, %c0_70], %206 {strides = array<i32>} : memref<328x16xf32, #tpu.memory_space<vmem>>, vector<24x16xf32>,
    %c304 = arith.constant 304 : index
    %c0_71 = arith.constant 0 : index
    %208 = vector.load %arg6[%c304, %c0_71] : memref<328x16xf32, #tpu.memory_space<vmem>>, vector<24x16xf32>
    tpu.vector_store %arg6[%c304, %c0_71], %206 {strides = array<i32>} : memref<328x16xf32, #tpu.memory_space<vmem>>, vector<24x16xf32>,
    %c19 = arith.constant 19 : index
    %c0_72 = arith.constant 0 : index
    %209 = vector.load %arg6[%c19, %c0_72] : memref<328x16xf32, #tpu.memory_space<vmem>>, vector<288x16xf32>
    tpu.vector_store %arg6[%c19, %c0_72], %205 {strides = array<i32>} : memref<328x16xf32, #tpu.memory_space<vmem>>, vector<288x16xf32>,
    %c0_73 = arith.constant 0 : index
    %c0_74 = arith.constant 0 : index
    %210 = vector.load %arg6[%c0_73, %c0_74] : memref<328x16xf32, #tpu.memory_space<vmem>>, vector<288x16xf32>
    %c1 = arith.constant 1 : index
    %c0_75 = arith.constant 0 : index
    %211 = vector.load %arg6[%c1, %c0_75] : memref<328x16xf32, #tpu.memory_space<vmem>>, vector<288x16xf32>
    %c2 = arith.constant 2 : index
    %c0_76 = arith.constant 0 : index
    %212 = vector.load %arg6[%c2, %c0_76] : memref<328x16xf32, #tpu.memory_space<vmem>>, vector<288x16xf32>
    %c18 = arith.constant 18 : index
    %c0_77 = arith.constant 0 : index
    %213 = vector.load %arg6[%c18, %c0_77] : memref<328x16xf32, #tpu.memory_space<vmem>>, vector<288x16xf32>
    %c19_78 = arith.constant 19 : index
    %c0_79 = arith.constant 0 : index
    %214 = vector.load %arg6[%c19_78, %c0_79] : memref<328x16xf32, #tpu.memory_space<vmem>>, vector<288x16xf32>
    %c20 = arith.constant 20 : index
    %c0_80 = arith.constant 0 : index
    %215 = vector.load %arg6[%c20, %c0_80] : memref<328x16xf32, #tpu.memory_space<vmem>>, vector<288x16xf32>
    %c36 = arith.constant 36 : index
    %c0_81 = arith.constant 0 : index
    %216 = vector.load %arg6[%c36, %c0_81] : memref<328x16xf32, #tpu.memory_space<vmem>>, vector<288x16xf32>
    %c37 = arith.constant 37 : index
    %c0_82 = arith.constant 0 : index
    %217 = vector.load %arg6[%c37, %c0_82] : memref<328x16xf32, #tpu.memory_space<vmem>>, vector<288x16xf32>
    %c38 = arith.constant 38 : index
    %c0_83 = arith.constant 0 : index
    %218 = vector.load %arg6[%c38, %c0_83] : memref<328x16xf32, #tpu.memory_space<vmem>>, vector<288x16xf32>
    %219 = tpu.concatenate %210, %211, %212, %213, %214, %215, %216, %217, %218 in 1 : vector<288x16xf32>, vector<288x16xf32>, vector<288x16xf32>, vector<288x16xf32>, vector<288x16xf32>, vector<288x16xf32>, vector<288x16xf32>, vector<288x16xf32>, vector<288x16xf32> -> vector<288x144xf32>
    %c368 = arith.constant 368 : index
    %c0_84 = arith.constant 0 : index
    %220 = vector.load %arg3[%c368, %c0_84] : memref<512x128xbf16, #tpu.memory_space<vmem>>, vector<144x32xbf16>
    %221 = arith.truncf %219 : vector<288x144xf32> to vector<288x144xbf16>
    %cst_85 = arith.constant dense<0.000000e+00> : vector<288x32xf32>
    %222 = tpu.matmul %221, %220, %cst_85 {dimension_numbers = #tpu.dot_dimension_numbers<[1], [0], [0], [1], [0, 0, 1, 1], [], []>} : vector<288x144xbf16>, vector<144x32xbf16>, vector<288x32xf32> -> vector<288x32xf32>
    %c74 = arith.constant 74 : index
    %c0_86 = arith.constant 0 : index
    %223 = vector.load %arg4[%c74, %c0_86] : memref<80x128xf32, #tpu.memory_space<vmem>>, vector<1x32xf32>
    %224 = vector.broadcast %223 : vector<1x32xf32> to vector<288x32xf32>
    %225 = arith.addf %222, %224 : vector<288x32xf32>
    %cst_87 = arith.constant 0.000000e+00 : f32
    %226 = vector.broadcast %cst_87 : f32 to vector<288x32xf32>
    %227 = arith.maximumf %225, %226 : vector<288x32xf32>
    %c0_88 = arith.constant 0 : index
    %c27 = arith.constant 27 : index
    %228 = vector.load %arg2[%c0_88, %c27] : memref<288x32xf32, #tpu.memory_space<vmem>>, vector<288x1xf32>
    %229 = vector.broadcast %228 : vector<288x1xf32> to vector<288x32xf32>
    %230 = arith.mulf %227, %229 : vector<288x32xf32>
    %cst_89 = arith.constant dense<0.000000e+00> : vector<32xf32>
    %231 = vector.multi_reduction <add>, %230, %cst_89 [0] : vector<288x32xf32> to vector<32xf32>
    %232 = vector.shape_cast %231 : vector<32xf32> to vector<1x32xf32>
    %cst_90 = arith.constant 3.906250e-03 : f32
    %233 = vector.broadcast %cst_90 : f32 to vector<1x32xf32>
    %234 = arith.mulf %232, %233 : vector<1x32xf32>
    %c208 = arith.constant 208 : index
    %c0_91 = arith.constant 0 : index
    %235 = vector.load %arg3[%c208, %c0_91] : memref<512x128xbf16, #tpu.memory_space<vmem>>, vector<32x64xbf16>
    %236 = arith.truncf %199 : vector<1x32xf32> to vector<1x32xbf16>
    %cst_92 = arith.constant dense<0.000000e+00> : vector<1x64xf32>
    %237 = tpu.matmul %236, %235, %cst_92 {dimension_numbers = #tpu.dot_dimension_numbers<[1], [0], [0], [1], [0, 0, 1, 1], [], []>} : vector<1x32xbf16>, vector<32x64xbf16>, vector<1x64xf32> -> vector<1x64xf32>
    %c240 = arith.constant 240 : index
    %c0_93 = arith.constant 0 : index
    %238 = vector.load %arg3[%c240, %c0_93] : memref<512x128xbf16, #tpu.memory_space<vmem>>, vector<32x64xbf16>
    %239 = arith.truncf %234 : vector<1x32xf32> to vector<1x32xbf16>
    %cst_94 = arith.constant dense<0.000000e+00> : vector<1x64xf32>
    %240 = tpu.matmul %239, %238, %cst_94 {dimension_numbers = #tpu.dot_dimension_numbers<[1], [0], [0], [1], [0, 0, 1, 1], [], []>} : vector<1x32xbf16>, vector<32x64xbf16>, vector<1x64xf32> -> vector<1x64xf32>
    %241 = arith.addf %237, %240 : vector<1x64xf32>
    %c75 = arith.constant 75 : index
    %c0_95 = arith.constant 0 : index
    %242 = vector.load %arg4[%c75, %c0_95] : memref<80x128xf32, #tpu.memory_space<vmem>>, vector<1x64xf32>
    %243 = arith.addf %241, %242 : vector<1x64xf32>
    %cst_96 = arith.constant 0.000000e+00 : f32
    %244 = vector.broadcast %cst_96 : f32 to vector<1x64xf32>
    %245 = arith.maximumf %243, %244 : vector<1x64xf32>
    %c272 = arith.constant 272 : index
    %c0_97 = arith.constant 0 : index
    %246 = vector.load %arg3[%c272, %c0_97] : memref<512x128xbf16, #tpu.memory_space<vmem>>, vector<64x128xbf16>
    %247 = arith.truncf %245 : vector<1x64xf32> to vector<1x64xbf16>
    %cst_98 = arith.constant dense<0.000000e+00> : vector<1x128xf32>
    %248 = tpu.matmul %247, %246, %cst_98 {dimension_numbers = #tpu.dot_dimension_numbers<[1], [0], [0], [1], [0, 0, 1, 1], [], []>} : vector<1x64xbf16>, vector<64x128xbf16>, vector<1x128xf32> -> vector<1x128xf32>
    %c76 = arith.constant 76 : index
    %c0_99 = arith.constant 0 : index
    %249 = vector.load %arg4[%c76, %c0_99] : memref<80x128xf32, #tpu.memory_space<vmem>>, vector<1x128xf32>
    %250 = arith.addf %248, %249 : vector<1x128xf32>
    %c0_100 = arith.constant 0 : index
    %c0_101 = arith.constant 0 : index
    %c0_102 = arith.constant 0 : index
    %251 = vector.load %arg5[%c0_100, %c0_101, %c0_102] : memref<1x1x128xf32, #tpu.memory_space<vmem>>, vector<1x1x128xf32>
    %252 = vector.shape_cast %251 : vector<1x1x128xf32> to vector<1x128xf32>
    %253 = vector.shape_cast %250 : vector<1x128xf32> to vector<1x1x128xf32>
    tpu.vector_store %arg5[%c0_100, %c0_101, %c0_102], %253 {strides = array<i32>} : memref<1x1x128xf32, #tpu.memory_space<vmem>>, vector<1x1x128xf32>,
    return
  }
  func.func @transform_0(%arg0: i32) -> (i32, i32) {
    %c0_i32 = arith.constant 0 : i32
    %c0_i32_0 = arith.constant 0 : i32
    return %arg0, %c0_i32 : i32, i32
  }
  func.func @transform_1(%arg0: i32) -> (i32, i32) {
    %c0_i32 = arith.constant 0 : i32
    %c0_i32_0 = arith.constant 0 : i32
    return %arg0, %c0_i32 : i32, i32
  }
  func.func @transform_2(%arg0: i32) -> (i32, i32) {
    %c0_i32 = arith.constant 0 : i32
    %c0_i32_0 = arith.constant 0 : i32
    %c0_i32_1 = arith.constant 0 : i32
    return %c0_i32, %c0_i32_0 : i32, i32
  }
  func.func @transform_3(%arg0: i32) -> (i32, i32) {
    %c0_i32 = arith.constant 0 : i32
    %c0_i32_0 = arith.constant 0 : i32
    %c0_i32_1 = arith.constant 0 : i32
    return %c0_i32, %c0_i32_0 : i32, i32
  }
  func.func @transform_4(%arg0: i32) -> (i32, i32, i32) {
    %c0_i32 = arith.constant 0 : i32
    %c0_i32_0 = arith.constant 0 : i32
    %c0_i32_1 = arith.constant 0 : i32
    return %arg0, %c0_i32, %c0_i32_0 : i32, i32, i32
  }
}

</mosaic_0001>

<bundles_post_ra>
// kernel: hybrid_vit_cnn_forward.1
= control target key start
LH: loop header
LB: loop body
LE: loop exit
PB: predicated region body
PF: predicated region fallthrough
CT: control target
= control target key end

     0   :  { %9 = vsyncpa [#allocation4], 0  ;;  %s6994_s0 = inlined_call_operand.vmem [shape: f32[64,48], index: 0, kind: input, shape index: {}]   ;;  %s6995_s1 = inlined_call_operand.vmem [shape: f32[576,32], index: 1, kind: input, shape index: {}]   ;;  %s6996_s2 = inlined_call_operand.vmem [shape: bf16[512,128], index: 2, kind: input, shape index: {}]   ;;  %s6997_s3 = inlined_call_operand.vmem [shape: f32[80,128], index: 3, kind: input, shape index: {}]   ;;  %s6998_s4 = inlined_call_operand.hbm [shape: f32[2,1,128], index: 4, kind: output, shape index: {}]  }
   0x1   :  { %11 = vsyncpa [#allocation4 + $0x1], 0  ;;  %s5175_s15 = smov 0   ;;  %s5177_s16 = smov 0  }
   0x2   :  { %s5179_s17 = smov 0   ;;  %s5181_s18 = smov 0  }
   0x3 LB: > { %s5196_s19 = sadd.s32 4294967295, %s5130_s18   ;;  %s3998_s20 = sadd.s32 4294967294, %s5130_s18   ;;  %s5130_s18 = sphi %s5181_s18, %s7078_s18   ;;  %s5126_s17 = sphi %s5179_s17, %s7077_s17   ;;  %s5122_s16 = sphi %s5177_s16, %s7076_s16   ;;  %s5118_s15 = sphi %s5175_s15, %s7075_s15  }
   0x4   : > { %s5200_s21 = sadd.s32 1, %s5130_s18   ;;  %s118_s22 = sadd.s32 1, %s5126_s17 }
   0x5   : > { %s115_s23 = ssub.s32 %s5130_s18, %s5200_s21  ;;  %p128_p0 = scmp.ne.s32.totalorder %s5126_s17, %s5122_s16 }
   0x6   : > { %p116_p1 = scmp.eq.s32.totalorder %s115_s23, 0  ;;  %p129_p2 = scmp.eq.s32.totalorder %s5196_s19, 1 }
   0x7   : > { %p134_p3 = scmp.ne.s32.totalorder %s5122_s16, %s5118_s15  ;;  %p135_p4 = scmp.eq.s32.totalorder %s3998_s20, 1 }
   0x8   : > { %s5211_s24 = scalar_select %p116_p1, %s5126_s17, %s118_s22  }
   0x9   : > { %p5213_p5 = por %p129_p2, %p128_p0  ;;  %p5217_p6 = por %p135_p4, %p134_p3 }
   0xa   : > { %p4001_p7 = scmp.ge.s32.totalorder %s5130_s18, 1  ;;  %p177_p8 = scmp.lt.s32.totalorder %s5130_s18, 3 }
   0xc   : > { %p178_p9 = pnand %p4001_p7, %p177_p8 }
   0xe   : > { %181 = sbr.rel (%p178_p9) target bundleno = 3022 (0xbce), region = 36 }
  0x13   : > { %v4202_v0 = vld [vmem:[%s6996_s2 + $0x10] sm:$0xff]  ;;  %s4002_s29 = sshll.u32 %s5196_s19, 2  ;;  %v4201_v1 = vld [vmem:[%s6996_s2 + $0x8] sm:$0xff]  ;;  %v4200_v2 = vld [vmem:[%s6996_s2] sm:$0xff]  ;;  %vm258_vm0 = vcmask 392192   ;;  %vm286_vm1 = vcmask 261120  }
  0x14   : > { %p208_p10 = scmp.lt.s32.totalorder %s4002_s29, 7  ;;  %270 = vmatpush.bf16.msra.mxu0 %v4202_v0  ;;  %v220_v9 = vld [vmem:[%s6997_s3] sm:$0xff]  ;;  %v221_v13 = vld [vmem:[%s6997_s3 + $0x8] sm:$0xff]  ;;  %v222_v17 = vld [vmem:[%s6997_s3 + $0x10] sm:$0xff]  ;;  %v5132_v25 = vmov 32.0   ;;  %s5133_s13 = smov 96  }
  0x15   : > { %v223_v21 = vld [vmem:[%s6997_s3 + $0x18] sm:$0xff]  ;;  %4974 = vrcp.f32 %v5132_v25  ;;  %v4204_v52 = vld [vmem:[%s6996_s2 + $0x20] sm:$0xff]  ;;  %s5134_s14 = smov 120   ;;  %s5135_s20 = smov 72   ;;  %vm445_vm15 = vcmask 64512  }
  0x16   : > { %s7080_s29 = smov (!%p208_p10, %s4002_s29), 7  ;;  %424 = vmatpush.bf16.msra.mxu1 %v4204_v52  ;;  %v4203_v55 = vld [vmem:[%s6996_s2 + $0x18] sm:$0xff]  ;;  %s5136_s22 = smov 88  }
  0x17   : > { %s4003_s6 = sshll.u32 %s7080_s29, 3  ;;  %s5137_s23 = smov 112  }
  0x18   : > { %271 = vmatpush.bf16.msra.mxu0 %v4201_v1  ;;  %s211_s11 = scalar_lea.vmem %s6994_s0, %s4003_s6  ;;  %s5138_s27 = smov 64  }
  0x19   : > { %v228_v3 = vld [vmem:[%s211_s11] sm:$0xff]  ;;  %v229_v4 = vld [vmem:[%s211_s11 + $0x8] sm:$0xff]  ;;  %v230_v6 = vld [vmem:[%s211_s11 + $0x10] sm:$0xff]  ;;  %s5139_s28 = smov 80   ;;  %s5140_s29 = smov 104  }
  0x1a   : > { %v238_v5 = vpack.c.bf16 %v229_v4, %v228_v3  ;;  %v231_v7 = vld [vmem:[%s211_s11 + $0x18] sm:$0xff]  ;;  %425 = vmatpush.bf16.msra.mxu1 %v4203_v55  ;;  %s5141_s12 = smov 56   ;;  %s5146_s30 = smov 24  }
  0x1b   : > { %v239_v8 = vpack.c.bf16 %v231_v7, %v230_v6  ;;  %v4975_v26 = vpop.eup %4974  ;;  %s213_s7 = smul.u32 36, %s5196_s19  ;;  %s3927_s11 = scalar_lea.hbm %s6998_s4, %s5196_s19 }
  0x1c   : > { %272 = vmatpush.bf16.msra.mxu0 %v4200_v2  ;;  %v300_v27 = vmul.f32 32.0, %v4975_v26  ;;  %vm304_vm2 = vweird.f32 %v4975_v26  ;;  %s3931_s5 = sshll.u32 %s3927_s11, 4  ;;  %s3932_s5 = int_to_ptr.hbm [resolvable:$true] %s3931_s5 }
  0x1d   : > { %p214_p11 = scmp.lt.s32.totalorder %s213_s7, 71 }
  0x1e   : > { %v301_v28 = vsub.f32 1.0, %v300_v27  ;;  %v4966_v27 = vld [vmem:[%s6997_s3 + $0x41] ss:$0 sm:$0xff] }
  0x1f   : > { %4017 = vmatmul.msk.bf16.vlgmr.msra.gmra.mxu0 %vm258_vm0, %v238_v5  ;;  %s7082_s7 = smov (!%p214_p11, %s213_s7), 71 }
  0x20   : > { %v302_v29 = vmul.f32 %v4975_v26, %v301_v28  ;;  %s4004_s8 = sshll.u32 %s7082_s7, 3 }
  0x22   : > { %v303_v30 = vadd.f32 %v4975_v26, %v302_v29 }
  0x24   : > { %v5266_v31 = vsel %vm304_vm2, %v4975_v26, %v303_v30  ;;  %vm986_vm2 = vcmask 130048  }
  0x25   : > { %7016 = vst [vmem:[#allocation6_spill] sm:$0xff] %v5266_v31 }
  0x2f   : > { %4018 = vmatmul.msk.bf16.gmra.mxu0 %vm258_vm0, %v239_v8 }
  0x9c   : > { %v274_v10 = vpop.f32.mrf.mxu0 }
  0x9d   : > { %v5241_v11 = vadd.f32 %v274_v10, %v220_v9 }
  0x9f   : > { %v287_v12 = vsel %vm286_vm1, %v5241_v11, 0.0 }
  0xa0   : > { %288 = vadd.xlane.f32.xlu0 %v287_v12 }
  0xa4   : > { %v276_v14 = vpop.f32.mrf.mxu0 }
  0xa5   : > { %v5248_v15 = vadd.f32 %v276_v14, %v221_v13 }
  0xa7   : > { %v290_v16 = vsel %vm286_vm1, %v5248_v15, 0.0 }
  0xa8   : > { %291 = vadd.xlane.f32.xlu0 %v290_v16 }
  0xac   : > { %v279_v18 = vpop.f32.mrf.mxu0 }
  0xad   : > { %v5255_v19 = vadd.f32 %v279_v18, %v222_v17  ;;  %v4965_v18 = vld [vmem:[%s6997_s3 + $0x40] ss:$0 sm:$0xff] }
  0xaf   : > { %v293_v20 = vsel %vm286_vm1, %v5255_v19, 0.0 }
  0xb0   : > { %294 = vadd.xlane.f32.xlu1 %v293_v20 }
  0xb4   : > { %v281_v22 = vpop.f32.mrf.mxu0 }
  0xb5   : > { %v5262_v23 = vadd.f32 %v281_v22, %v223_v21 }
  0xb7   : > { %v296_v24 = vsel %vm286_vm1, %v5262_v23, 0.0 }
  0xb8   : > { %297 = vadd.xlane.f32.xlu1 %v296_v24 }
 0x113   : > { %v289_v32 = vpop.xlane.xlu0 %288 }
 0x114   : > { %v306_v33 = vmul.f32 %v5266_v31, %v289_v32 }
 0x116   : > { %v310_v34 = vsub.f32 %v5241_v11, %v306_v33 }
 0x118   : > { %v314_v35 = vmul.f32 %v310_v34, %v310_v34 }
 0x11a   : > { %v318_v36 = vsel %vm286_vm1, %v314_v35, 0.0 }
 0x11b   : > { %319 = vadd.xlane.f32.xlu2 %v318_v36  ;;  %v292_v37 = vpop.xlane.xlu0 %291 }
 0x11c   : > { %v307_v38 = vmul.f32 %v5266_v31, %v292_v37 }
 0x11e   : > { %v311_v39 = vsub.f32 %v5248_v15, %v307_v38 }
 0x120   : > { %v315_v40 = vmul.f32 %v311_v39, %v311_v39 }
 0x122   : > { %v321_v41 = vsel %vm286_vm1, %v315_v40, 0.0 }
 0x123   : > { %v295_v42 = vpop.xlane.xlu1 %294  ;;  %322 = vadd.xlane.f32.xlu2 %v321_v41 }
 0x124   : > { %v308_v43 = vmul.f32 %v5266_v31, %v295_v42 }
 0x126   : > { %v5276_v44 = vsub.f32 %v5255_v19, %v308_v43 }
 0x128   : > { %v316_v45 = vmul.f32 %v5276_v44, %v5276_v44 }
 0x12a   : > { %v324_v46 = vsel %vm286_vm1, %v316_v45, 0.0 }
 0x12b   : > { %v298_v47 = vpop.xlane.xlu1 %297  ;;  %325 = vadd.xlane.f32.xlu0 %v324_v46 }
 0x12c   : > { %v309_v48 = vmul.f32 %v5266_v31, %v298_v47 }
 0x12e   : > { %v5283_v49 = vsub.f32 %v5262_v23, %v309_v48 }
 0x130   : > { %v317_v50 = vmul.f32 %v5283_v49, %v5283_v49 }
 0x132   : > { %v327_v51 = vsel %vm286_vm1, %v317_v50, 0.0 }
 0x133   : > { %328 = vadd.xlane.f32.xlu1 %v327_v51 }
 0x18e   : > { %v320_v53 = vpop.xlane.xlu2 %319 }
 0x18f   : > { %v330_v54 = vmul.f32 %v320_v53, %v5266_v31 }
 0x191   : > { %v334_v56 = vadd.f32 1e-06, %v330_v54  ;;  %v4967_v54 = vld [vmem:[%s6997_s3 + $0x42] ss:$0 sm:$0xff] }
 0x193   : > { %4976 = vrsqrt.f32 %v334_v56  ;;  %vm344_vm4 = vweird.f32 %v334_v56 }
 0x196   : > { %v323_v57 = vpop.xlane.xlu2 %322 }
 0x197   : > { %v331_v58 = vmul.f32 %v323_v57, %v5266_v31 }
 0x199   : > { %v4977_v59 = vpop.eup %4976  ;;  %v335_v60 = vadd.f32 1e-06, %v331_v58 }
 0x19a   : > { %v339_v61 = vmul.f32 %v4977_v59, %v334_v56  ;;  %vm345_vm3 = vweird.f32 %v4977_v59 }
 0x19b   : > { %4978 = vrsqrt.f32 %v335_v60  ;;  %vm346_vm5 = vmor %vm344_vm4, %vm345_vm3  ;;  %vm354_vm7 = vweird.f32 %v335_v60  ;;  %vm991_vm3 = vcmask 195584  }
 0x19c   : > { %v340_v62 = vmul.f32 %v4977_v59, %v339_v61 }
 0x19e   : > { %v341_v63 = vmul.f32 0.5, %v340_v62  ;;  %v326_v0 = vpop.xlane.xlu0 %325 }
 0x19f   : > { %v332_v1 = vmul.f32 %v326_v0, %v5266_v31 }
 0x1a0   : > { %v342_v2 = vsub.f32 1.5, %v341_v63 }
 0x1a1   : > { %v4979_v3 = vpop.eup %4978  ;;  %v336_v4 = vadd.f32 1e-06, %v332_v1 }
 0x1a2   : > { %v343_v5 = vmul.f32 %v4977_v59, %v342_v2  ;;  %v349_v6 = vmul.f32 %v4979_v3, %v335_v60  ;;  %vm355_vm6 = vweird.f32 %v4979_v3 }
 0x1a3   : > { %4980 = vrsqrt.f32 %v336_v4  ;;  %vm356_vm8 = vmor %vm354_vm7, %vm355_vm6  ;;  %vm364_vm10 = vweird.f32 %v336_v4 }
 0x1a4   : > { %v350_v7 = vmul.f32 %v4979_v3, %v349_v6  ;;  %v347_v8 = vsel %vm346_vm5, %v4977_v59, %v343_v5 }
 0x1a5   : > { %v378_v17 = vmul.f32 %v347_v8, %v310_v34 }
 0x1a6   : > { %v351_v9 = vmul.f32 0.5, %v350_v7  ;;  %v329_v10 = vpop.xlane.xlu1 %328 }
 0x1a7   : > { %v333_v12 = vmul.f32 %v329_v10, %v5266_v31  ;;  %v383_v26 = vmul.f32 %v4965_v18, %v378_v17 }
 0x1a8   : > { %v352_v13 = vsub.f32 1.5, %v351_v9 }
 0x1a9   : > { %v4981_v14 = vpop.eup %4980  ;;  %v337_v16 = vadd.f32 1e-06, %v333_v12  ;;  %v388_v33 = vadd.f32 %v4966_v27, %v383_v26 }
 0x1aa   : > { %v353_v20 = vmul.f32 %v4979_v3, %v352_v13  ;;  %v359_v21 = vmul.f32 %v4981_v14, %v336_v4  ;;  %vm365_vm9 = vweird.f32 %v4981_v14 }
 0x1ab   : > { %4982 = vrsqrt.f32 %v337_v16  ;;  %vm366_vm11 = vmor %vm364_vm10, %vm365_vm9  ;;  %vm374_vm13 = vweird.f32 %v337_v16 }
 0x1ac   : > { %v357_v22 = vsel %vm356_vm8, %v4979_v3, %v353_v20  ;;  %v360_v24 = vmul.f32 %v4981_v14, %v359_v21 }
 0x1ad   : > { %v379_v25 = vmul.f32 %v357_v22, %v311_v39 }
 0x1ae   : > { %v361_v28 = vmul.f32 0.5, %v360_v24 }
 0x1af   : > { %v384_v29 = vmul.f32 %v4965_v18, %v379_v25 }
 0x1b0   : > { %v362_v30 = vsub.f32 1.5, %v361_v28 }
 0x1b1   : > { %v4983_v32 = vpop.eup %4982  ;;  %v389_v34 = vadd.f32 %v4966_v27, %v384_v29 }
 0x1b2   : > { %v363_v35 = vmul.f32 %v4981_v14, %v362_v30  ;;  %v369_v36 = vmul.f32 %v4983_v32, %v337_v16  ;;  %vm375_vm12 = vweird.f32 %v4983_v32 }
 0x1b3   : > { %v396_v37 = vpack.c.bf16 %v389_v34, %v388_v33  ;;  %vm376_vm14 = vmor %vm374_vm13, %vm375_vm12  ;;  %v5367_v33 = vld [vmem:[%s6997_s3 + $0x30] sm:$0xff] }
 0x1b4   : > { %v370_v38 = vmul.f32 %v4983_v32, %v369_v36  ;;  %v367_v39 = vsel %vm366_vm11, %v4981_v14, %v363_v35  ;;  %v5372_v36 = vld [vmem:[%s6997_s3 + $0x28] sm:$0xff] }
 0x1b5   : > { %4027 = vmatmul.msk.bf16.vlgmr.msra.gmra.mxu1 %vm286_vm1, %v396_v37  ;;  %v380_v42 = vmul.f32 %v367_v39, %v5276_v44 }
 0x1b6   : > { %v371_v40 = vmul.f32 0.5, %v370_v38 }
 0x1b7   : > { %v385_v47 = vmul.f32 %v4965_v18, %v380_v42 }
 0x1b8   : > { %v372_v41 = vsub.f32 1.5, %v371_v40 }
 0x1b9   : > { %v390_v50 = vadd.f32 %v4966_v27, %v385_v47 }
 0x1ba   : > { %v373_v43 = vmul.f32 %v4983_v32, %v372_v41 }
 0x1bc   : > { %v377_v45 = vsel %vm376_vm14, %v4983_v32, %v373_v43  ;;  %v5387_v43 = vld [vmem:[%s6997_s3 + $0x38] sm:$0xff] }
 0x1bd   : > { %v381_v46 = vmul.f32 %v377_v45, %v5283_v49 }
 0x1bf   : > { %v386_v48 = vmul.f32 %v4965_v18, %v381_v46 }
 0x1c1   : > { %v391_v51 = vadd.f32 %v4966_v27, %v386_v48  ;;  %v224_v27 = vld [vmem:[%s6997_s3 + $0x20] sm:$0xff] }
 0x1c3   : > { %v397_v52 = vpack.c.bf16 %v391_v51, %v390_v50 }
 0x1c5   : > { %4028 = vmatmul.msk.bf16.gmra.mxu1 %vm286_vm1, %v397_v52 }
 0x232   : > { %v427_v53 = vpop.f32.mrf.mxu1 }
 0x233   : > { %v428_v44 = vadd.f32 %v4967_v54, %v427_v53 }
 0x23a   : > { %v429_v55 = vpop.f32.mrf.mxu1 }
 0x23b   : > { %v430_v56 = vadd.f32 %v4967_v54, %v429_v55 }
 0x23d   : > { %v5311_v57 = vpack.c.bf16 %v430_v56, %v428_v44 }
 0x23f   : > { %441 = vrot.lane.b32.xlu0 %v5311_v57, %s5133_s13 }
 0x242   : > { %v432_v49 = vpop.f32.mrf.mxu1 }
 0x243   : > { %v433_v59 = vadd.f32 %v4967_v54, %v432_v49 }
 0x247   : > { %562 = vrot.lane.b32.xlu0 %v5311_v57, %s5134_s14 }
 0x24a   : > { %v434_v58 = vpop.f32.mrf.mxu1 }
 0x24b   : > { %v435_v60 = vadd.f32 %v4967_v54, %v434_v58 }
 0x24d   : > { %v5316_v61 = vpack.c.bf16 %v435_v60, %v433_v59 }
 0x24f   : > { %816 = vrot.lane.b32.xlu0 %v5316_v61, %s5135_s20  ;;  %568 = vrot.lane.b32.xlu1 %v5316_v61, %s5136_s22 }
 0x250   : > { %443 = vrot.lane.b32.xlu2 %v5316_v61, %s5133_s13 }
 0x257   : > { %686 = vrot.lane.b32.xlu0 %v5311_v57, %s5137_s23  ;;  %564 = vrot.lane.b32.xlu1 %v5316_v61, %s5134_s14  ;;  %s5142_s14 = smov 48  }
 0x258   : > { %566 = vrot.lane.b32.xlu2 %v5311_v57, %s5136_s22  ;;  %s5144_s22 = smov 8  }
 0x25f   : > { %523 = vrot.lane.b32.xlu0 %v5311_v57, %s5138_s27  ;;  %814 = vrot.lane.b32.xlu1 %v5311_v57, %s5135_s20  ;;  %s5143_s20 = smov 40  }
 0x260   : > { %692 = vrot.lane.b32.xlu2 %v5316_v61, %s5139_s28 }
 0x267   : > { %812 = vrot.lane.b32.xlu0 %v5316_v61, %s5140_s29  ;;  %688 = vrot.lane.b32.xlu1 %v5316_v61, %s5137_s23 }
 0x268   : > { %690 = vrot.lane.b32.xlu2 %v5311_v57, %s5139_s28 }
 0x26f   : > { %525 = vrot.lane.b32.xlu0 %v5316_v61, %s5138_s27 }
 0x270   : > { %810 = vrot.lane.b32.xlu2 %v5311_v57, %s5140_s29  ;;  %s5145_s29 = smov 16  }
 0x2aa   : > { %v444_v62 = vpop.permute.xlu2 %443 }
 0x2ab   : > { %v456_v63 = vsel %vm445_vm15, %v444_v62, 0 }
 0x2ac   : > { %464 = vmatpush.bf16.xpose.msrb.mxu1 %v456_v63  ;;  %4232 = vmatpush.bf16.xpose.msra.mxu2 %v456_v63 }
 0x2b1   : > { %v442_v0 = vpop.permute.xlu0 %441 }
 0x2b2   : > { %v567_v1 = vpop.permute.xlu2 %566  ;;  %v453_v2 = vsel %vm445_vm15, %v442_v0, 0 }
 0x2b3   : > { %v577_v14 = vsel %vm445_vm15, %v567_v1, 0 }
 0x2b4   : > { %465 = vmatpush.bf16.xpose.msrb.mxu1 %v453_v2  ;;  %4233 = vmatpush.bf16.xpose.msra.mxu2 %v453_v2 }
 0x2b9   : > { %v563_v3 = vpop.permute.xlu0 %562 }
 0x2ba   : > { %v693_v4 = vpop.permute.xlu2 %692 }
 0x2bb   : > { %4029 = vmatmul.msk.bf16.vlgmr.msrb.gmra.mxu1 %vm445_vm15, %v5311_v57  ;;  %4030 = vmatmul.msk.bf16.vlgmr.msra.gmra.mxu2 %vm445_vm15, %v5316_v61  ;;  %v704_v5 = vsel %vm445_vm15, %v693_v4, 0 }
 0x2bc   : > { %712 = vmatpush.bf16.xpose.msrb.mxu0 %v704_v5 }
 0x2c1   : > { %v569_v6 = vpop.permute.xlu1 %568  ;;  %v817_v7 = vpop.permute.xlu0 %816 }
 0x2c2   : > { %v580_v8 = vsel %vm445_vm15, %v569_v6, 0  ;;  %v691_v9 = vpop.permute.xlu2 %690  ;;  %v828_v16 = vsel %vm445_vm15, %v817_v7, 0 }
 0x2c3   : > { %588 = vmatpush.bf16.xpose.msra.mxu1 %v580_v8  ;;  %v701_v10 = vsel %vm445_vm15, %v691_v9, 0 }
 0x2c4   : > { %713 = vmatpush.bf16.xpose.msrb.mxu0 %v701_v10 }
 0x2c9   : > { %v565_v12 = vpop.permute.xlu1 %564  ;;  %v687_v13 = vpop.permute.xlu0 %686 }
 0x2ca   : > { %v811_v25 = vpop.permute.xlu2 %810 }
 0x2cb   : > { %4037 = vmatmul.msk.bf16.vlgmr.msrb.gmra.mxu0 %vm445_vm15, %v687_v13  ;;  %589 = vmatpush.bf16.xpose.msra.mxu1 %v577_v14 }
 0x2d1   : > { %v815_v17 = vpop.permute.xlu1 %814  ;;  %v524_v18 = vpop.permute.xlu0 %523 }
 0x2d2   : > { %4033 = vmatmul.msk.bf16.vlgmr.msra.gmra.mxu1 %vm445_vm15, %v563_v3  ;;  %v825_v20 = vsel %vm445_vm15, %v815_v17, 0 }
 0x2d3   : > { %836 = vmatpush.bf16.xpose.msrb.mxu1 %v828_v16 }
 0x2d9   : > { %v689_v21 = vpop.permute.xlu1 %688  ;;  %v813_v22 = vpop.permute.xlu0 %812 }
 0x2db   : > { %837 = vmatpush.bf16.xpose.msrb.mxu1 %v825_v20  ;;  %4038 = vmatmul.msk.bf16.gmra.mxu0 %vm445_vm15, %v689_v21 }
 0x2e1   : > { %v526_v24 = vpop.permute.xlu0 %525 }
 0x2e2   : > { %541 = vmatpush.bf16.msra.mxu3 %v526_v24  ;;  %4034 = vmatmul.msk.bf16.gmra.mxu1 %vm445_vm15, %v565_v12 }
 0x2e6   : > { %542 = vmatpush.bf16.msra.mxu3 %v524_v18 }
 0x2f2   : > { %4041 = vmatmul.msk.bf16.vlgmr.msrb.gmra.mxu1 %vm445_vm15, %v811_v25 }
 0x302   : > { %4042 = vmatmul.msk.bf16.gmra.mxu1 %vm445_vm15, %v813_v22 }
 0x338   : > { %v467_v26 = vpop.f32.mrf.mxu1 }
 0x339   : > { %v477_v28 = vmul.f32 0.35355338, %v467_v26 }
 0x33b   : > { %v5360_v29 = vadd.f32 %v477_v28, %v224_v27 }
 0x33d   : > { %v485_v30 = vsel %vm286_vm1, %v5360_v29, -inf }
 0x33e   : > { %v472_v32 = vpop.f32.mrf.mxu2  ;;  %486 = vmax.xlane.f32.xlu2 %v485_v30 }
 0x33f   : > { %v479_v34 = vmul.f32 0.35355338, %v472_v32 }
 0x340   : > { %v469_v35 = vpop.f32.mrf.mxu1 }
 0x341   : > { %v478_v37 = vmul.f32 0.35355338, %v469_v35  ;;  %v5375_v38 = vadd.f32 %v479_v34, %v5367_v33 }
 0x343   : > { %v491_v39 = vsel %vm286_vm1, %v5375_v38, -inf  ;;  %v5380_v40 = vadd.f32 %v478_v37, %v5372_v36 }
 0x344   : > { %492 = vmax.xlane.f32.xlu0 %v491_v39 }
 0x345   : > { %v488_v41 = vsel %vm286_vm1, %v5380_v40, -inf }
 0x346   : > { %v474_v42 = vpop.f32.mrf.mxu2  ;;  %489 = vmax.xlane.f32.xlu1 %v488_v41 }
 0x347   : > { %v480_v45 = vmul.f32 0.35355338, %v474_v42 }
 0x348   : > { %v715_v46 = vpop.f32.mrf.mxu0 }
 0x349   : > { %v725_v47 = vmul.f32 0.35355338, %v715_v46  ;;  %v5390_v48 = vadd.f32 %v480_v45, %v5387_v43 }
 0x34b   : > { %v494_v50 = vsel %vm286_vm1, %v5390_v48, -inf  ;;  %v5394_v51 = vadd.f32 %v725_v47, %v224_v27 }
 0x34c   : > { %495 = vmax.xlane.f32.xlu2 %v494_v50 }
 0x34d   : > { %v733_v3 = vsel %vm286_vm1, %v5394_v51, -inf }
 0x34f   : > { %v591_v52 = vpop.f32.mrf.mxu1 }
 0x350   : > { %v717_v53 = vpop.f32.mrf.mxu0  ;;  %v601_v62 = vmul.f32 0.35355338, %v591_v52 }
 0x351   : > { %v726_v54 = vmul.f32 0.35355338, %v717_v53 }
 0x352   : > { %v5412_v0 = vadd.f32 %v601_v62, %v224_v27 }
 0x353   : > { %v5397_v55 = vadd.f32 %v726_v54, %v5372_v36 }
 0x354   : > { %v609_v1 = vsel %vm286_vm1, %v5412_v0, -inf }
 0x355   : > { %v736_v44 = vsel %vm286_vm1, %v5397_v55, -inf }
 0x356   : > { %737 = vmax.xlane.f32.xlu0 %v736_v44 }
 0x357   : > { %v593_v56 = vpop.f32.mrf.mxu1 }
 0x358   : > { %v602_v49 = vmul.f32 0.35355338, %v593_v56  ;;  %v720_v8 = vpop.f32.mrf.mxu0 }
 0x359   : > { %v727_v12 = vmul.f32 0.35355338, %v720_v8 }
 0x35a   : > { %v5402_v58 = vadd.f32 %v602_v49, %v5372_v36 }
 0x35b   : > { %v5431_v17 = vadd.f32 %v727_v12, %v5367_v33 }
 0x35c   : > { %v612_v59 = vsel %vm286_vm1, %v5402_v58, -inf }
 0x35d   : > { %613 = vmax.xlane.f32.xlu2 %v612_v59  ;;  %v739_v22 = vsel %vm286_vm1, %v5431_v17, -inf }
 0x35f   : > { %649 = vrot.lane.b32.xlu1 %v5316_v61, %s5141_s12  ;;  %v596_v60 = vpop.f32.mrf.mxu1 }
 0x360   : > { %v603_v4 = vmul.f32 0.35355338, %v596_v60  ;;  %v722_v60 = vpop.f32.mrf.mxu0 }
 0x361   : > { %v728_v62 = vmul.f32 0.35355338, %v722_v60 }
 0x367   : > { %v598_v63 = vpop.f32.mrf.mxu1 }
 0x368   : > { %v604_v9 = vmul.f32 0.35355338, %v598_v63 }
 0x36a   : > { %773 = vrot.lane.b32.xlu0 %v5316_v61, %s5142_s14  ;;  %v5428_v14 = vadd.f32 %v604_v9, %v5387_v43 }
 0x36c   : > { %v618_v20 = vsel %vm286_vm1, %v5428_v14, -inf }
 0x36f   : > { %v839_v2 = vpop.f32.mrf.mxu1 }
 0x370   : > { %v849_v5 = vmul.f32 0.35355338, %v839_v2 }
 0x372   : > { %897 = vrot.lane.b32.xlu0 %v5316_v61, %s5143_s20  ;;  %v5419_v61 = vadd.f32 %v603_v4, %v5367_v33  ;;  %v5421_v7 = vadd.f32 %v849_v5, %v224_v27 }
 0x374   : > { %v615_v10 = vsel %vm286_vm1, %v5419_v61, -inf  ;;  %v857_v13 = vsel %vm286_vm1, %v5421_v7, -inf }
 0x375   : > { %647 = vrot.lane.b32.xlu2 %v5311_v57, %s5141_s12 }
 0x377   : > { %v841_v6 = vpop.f32.mrf.mxu1 }
 0x378   : > { %v850_v18 = vmul.f32 0.35355338, %v841_v6 }
 0x37a   : > { %v5438_v24 = vadd.f32 %v850_v18, %v5372_v36 }
 0x37c   : > { %v860_v27 = vsel %vm286_vm1, %v5438_v24, -inf }
 0x37f   : > { %v844_v16 = vpop.f32.mrf.mxu1 }
 0x380   : > { %v851_v21 = vmul.f32 0.35355338, %v844_v16 }
 0x382   : > { %v5441_v25 = vadd.f32 %v851_v21, %v5367_v33 }
 0x384   : > { %v863_v30 = vsel %vm286_vm1, %v5441_v25, -inf }
 0x387   : > { %v846_v26 = vpop.f32.mrf.mxu1 }
 0x388   : > { %v852_v28 = vmul.f32 0.35355338, %v846_v26 }
 0x389   : > { %610 = vmax.xlane.f32.xlu1 %v609_v1  ;;  %v5469_v1 = vadd.f32 %v728_v62, %v5387_v43 }
 0x38a   : > { %v5450_v32 = vadd.f32 %v852_v28, %v5387_v43 }
 0x38b   : > { %v742_v2 = vsel %vm286_vm1, %v5469_v1, -inf }
 0x38c   : > { %v866_v35 = vsel %vm286_vm1, %v5450_v32, -inf }
 0x391   : > { %734 = vmax.xlane.f32.xlu1 %v733_v3 }
 0x39c   : > { %616 = vmax.xlane.f32.xlu0 %v615_v10 }
 0x39e   : > { %858 = vmax.xlane.f32.xlu2 %v857_v13 }
 0x3a4   : > { %619 = vmax.xlane.f32.xlu0 %v618_v20 }
 0x3a6   : > { %740 = vmax.xlane.f32.xlu2 %v739_v22 }
 0x3aa   : > { %771 = vrot.lane.b32.xlu1 %v5311_v57, %s5142_s14 }
 0x3ac   : > { %861 = vmax.xlane.f32.xlu0 %v860_v27 }
 0x3ae   : > { %864 = vmax.xlane.f32.xlu2 %v863_v30 }
 0x3b1   : > { %v487_v34 = vpop.xlane.xlu2 %486 }
 0x3b2   : > { %v497_v33 = vsub.f32 %v5360_v29, %v487_v34 }
 0x3b4   : > { %v501_v36 = vmul.f32 1.442695, %v497_v33 }
 0x3b6   : > { %867 = vmax.xlane.f32.xlu2 %v866_v35  ;;  %4984 = vpow2.f32 %v501_v36 }
 0x3b7   : > { %v493_v46 = vpop.xlane.xlu0 %492 }
 0x3b8   : > { %v499_v52 = vsub.f32 %v5375_v38, %v493_v46 }
 0x3b9   : > { %v490_v37 = vpop.xlane.xlu1 %489 }
 0x3ba   : > { %v498_v39 = vsub.f32 %v5380_v40, %v490_v37  ;;  %v505_v54 = vmul.f32 1.442695, %v499_v52 }
 0x3bc   : > { %v503_v41 = vmul.f32 1.442695, %v498_v39  ;;  %v4985_v45 = vpop.eup %4984 }
 0x3bd   : > { %v509_v33 = vsel %vm286_vm1, %v4985_v45, 0.0 }
 0x3be   : > { %4986 = vpow2.f32 %v503_v41 }
 0x3bf   : > { %v496_v42 = vpop.xlane.xlu2 %495 }
 0x3c0   : > { %895 = vrot.lane.b32.xlu0 %v5311_v57, %s5143_s20  ;;  %v500_v29 = vsub.f32 %v5390_v48, %v496_v42  ;;  %s5148_s20 = smov 32  }
 0x3c2   : > { %v507_v53 = vmul.f32 1.442695, %v500_v29 }
 0x3c4   : > { %v4987_v47 = vpop.eup %4986  ;;  %4988 = vpow2.f32 %v507_v53 }
 0x3c5   : > { %v521_v50 = vpack.c.bf16 %v4987_v47, %v4985_v45  ;;  %4990 = vpow2.f32 %v505_v54  ;;  %v512_v3 = vsel %vm286_vm1, %v4987_v47, 0.0 }
 0x3c7   : > { %4031 = vmatmul.msk.bf16.vlgmr.msra.gmra.mxu3 %vm286_vm1, %v521_v50 }
 0x3c9   : > { %v738_v49 = vpop.xlane.xlu0 %737 }
 0x3ca   : > { %v5461_v56 = vpop.eup %4988  ;;  %v746_v21 = vsub.f32 %v5397_v55, %v738_v49 }
 0x3cb   : > { %v5463_v57 = vpop.eup %4990 }
 0x3cc   : > { %v522_v48 = vpack.c.bf16 %v5461_v56, %v5463_v57  ;;  %v751_v27 = vmul.f32 1.442695, %v746_v21 }
 0x3d0   : > { %v614_v40 = vpop.xlane.xlu2 %613 }
 0x3d1   : > { %v650_v44 = vpop.permute.xlu1 %649  ;;  %v622_v4 = vsub.f32 %v5402_v58, %v614_v40 }
 0x3d2   : > { %665 = vmatpush.bf16.msrb.mxu3 %v650_v44 }
 0x3d3   : > { %v627_v5 = vmul.f32 1.442695, %v622_v4 }
 0x3d5   : > { %4992 = vpow2.f32 %v627_v5 }
 0x3d7   : > { %4032 = vmatmul.msk.bf16.gmra.mxu3 %vm286_vm1, %v522_v48 }
 0x3d8   : > { %v648_v38 = vpop.permute.xlu2 %647 }
 0x3d9   : > { %666 = vmatpush.bf16.msrb.mxu3 %v648_v38 }
 0x3db   : > { %v4993_v12 = vpop.eup %4992 }
 0x3dc   : > { %v774_v59 = vpop.permute.xlu0 %773  ;;  %v636_v49 = vsel %vm286_vm1, %v4993_v12, 0.0 }
 0x3dd   : > { %789 = vmatpush.bf16.msrb.mxu2 %v774_v59 }
 0x3e4   : > { %v898_v63 = vpop.permute.xlu0 %897 }
 0x3e5   : > { %913 = vmatpush.bf16.msra.mxu3 %v898_v63 }
 0x3ea   : > { %743 = vmax.xlane.f32.xlu0 %v742_v2 }
 0x3f2   : > { %513 = vadd.xlane.f32.xlu0 %v512_v3 }
 0x3fc   : > { %v611_v6 = vpop.xlane.xlu1 %610 }
 0x3fd   : > { %v621_v8 = vsub.f32 %v5412_v0, %v611_v6 }
 0x3ff   : > { %v625_v9 = vmul.f32 1.442695, %v621_v8 }
 0x401   : > { %4994 = vpow2.f32 %v625_v9 }
 0x404   : > { %v735_v10 = vpop.xlane.xlu1 %734 }
 0x405   : > { %v745_v43 = vsub.f32 %v5394_v51, %v735_v10 }
 0x407   : > { %v4995_v13 = vpop.eup %4994  ;;  %v749_v16 = vmul.f32 1.442695, %v745_v43 }
 0x408   : > { %v633_v18 = vsel %vm286_vm1, %v4995_v13, 0.0  ;;  %v645_v20 = vpack.c.bf16 %v4993_v12, %v4995_v13 }
 0x409   : > { %4996 = vpow2.f32 %v749_v16  ;;  %634 = vadd.xlane.f32.xlu1 %v633_v18 }
 0x40a   : > { %4035 = vmatmul.msk.bf16.vlgmr.msrb.gmra.mxu3 %vm286_vm1, %v645_v20  ;;  %4998 = vpow2.f32 %v751_v27 }
 0x40f   : > { %v4997_v58 = vpop.eup %4996  ;;  %v617_v0 = vpop.xlane.xlu0 %616 }
 0x410   : > { %v757_v22 = vsel %vm286_vm1, %v4997_v58, 0.0  ;;  %v623_v51 = vsub.f32 %v5419_v61, %v617_v0  ;;  %v4999_v41 = vpop.eup %4998 }
 0x411   : > { %758 = vadd.xlane.f32.xlu2 %v757_v22  ;;  %v859_v26 = vpop.xlane.xlu2 %858  ;;  %v769_v61 = vpack.c.bf16 %v4999_v41, %v4997_v58 }
 0x412   : > { %v629_v28 = vmul.f32 1.442695, %v623_v51  ;;  %v869_v40 = vsub.f32 %v5421_v7, %v859_v26 }
 0x414   : > { %5000 = vpow2.f32 %v629_v28  ;;  %v873_v48 = vmul.f32 1.442695, %v869_v40 }
 0x417   : > { %v620_v30 = vpop.xlane.xlu0 %619 }
 0x418   : > { %v624_v34 = vsub.f32 %v5428_v14, %v620_v30  ;;  %v760_v14 = vsel %vm286_vm1, %v4999_v41, 0.0 }
 0x419   : > { %510 = vadd.xlane.f32.xlu2 %v509_v33  ;;  %v741_v35 = vpop.xlane.xlu2 %740 }
 0x41a   : > { %v631_v36 = vmul.f32 1.442695, %v624_v34  ;;  %v747_v55 = vsub.f32 %v5431_v17, %v741_v35  ;;  %v5001_v45 = vpop.eup %5000 }
 0x41b   : > { %v639_v16 = vsel %vm286_vm1, %v5001_v45, 0.0 }
 0x41c   : > { %5002 = vpow2.f32 %v631_v36  ;;  %v753_v37 = vmul.f32 1.442695, %v747_v55  ;;  %v772_v39 = vpop.permute.xlu1 %771 }
 0x41d   : > { %790 = vmatpush.bf16.msrb.mxu2 %v772_v39 }
 0x41e   : > { %5004 = vpow2.f32 %v753_v37 }
 0x41f   : > { %v862_v42 = vpop.xlane.xlu0 %861 }
 0x420   : > { %v870_v46 = vsub.f32 %v5438_v24, %v862_v42  ;;  %4039 = vmatmul.msk.bf16.vlgmr.msrb.gmra.mxu2 %vm286_vm1, %v769_v61 }
 0x421   : > { %761 = vadd.xlane.f32.xlu2 %v760_v14  ;;  %v865_v47 = vpop.xlane.xlu2 %864 }
 0x422   : > { %v5003_v29 = vpop.eup %5002  ;;  %v875_v17 = vmul.f32 1.442695, %v870_v46  ;;  %v871_v50 = vsub.f32 %v5441_v25, %v865_v47  ;;  %v518_v47 = vsel %vm286_vm1, %v5461_v56, 0.0 }
 0x423   : > { %v642_v52 = vsel %vm286_vm1, %v5003_v29, 0.0  ;;  %v646_v53 = vpack.c.bf16 %v5003_v29, %v5001_v45 }
 0x424   : > { %v5005_v54 = vpop.eup %5004  ;;  %5006 = vpow2.f32 %v875_v17  ;;  %643 = vadd.xlane.f32.xlu0 %v642_v52  ;;  %v877_v44 = vmul.f32 1.442695, %v871_v50 }
 0x425   : > { %4036 = vmatmul.msk.bf16.gmra.mxu3 %vm286_vm1, %v646_v53  ;;  %v763_v24 = vsel %vm286_vm1, %v5005_v54, 0.0 }
 0x426   : > { %764 = vadd.xlane.f32.xlu1 %v763_v24  ;;  %5008 = vpow2.f32 %v877_v44 }
 0x427   : > { %5010 = vpow2.f32 %v873_v48 }
 0x429   : > { %637 = vadd.xlane.f32.xlu2 %v636_v49  ;;  %v868_v38 = vpop.xlane.xlu2 %867 }
 0x42a   : > { %v5007_v25 = vpop.eup %5006  ;;  %v872_v59 = vsub.f32 %v5450_v32, %v868_v38 }
 0x42b   : > { %v884_v60 = vsel %vm286_vm1, %v5007_v25, 0.0 }
 0x42c   : > { %v879_v62 = vmul.f32 1.442695, %v872_v59  ;;  %885 = vadd.xlane.f32.xlu0 %v884_v60  ;;  %v5009_v7 = vpop.eup %5008 }
 0x42d   : > { %v5011_v2 = vpop.eup %5010  ;;  %v887_v3 = vsel %vm286_vm1, %v5009_v7, 0.0 }
 0x42e   : > { %5012 = vpow2.f32 %v879_v62  ;;  %v893_v5 = vpack.c.bf16 %v5007_v25, %v5011_v2  ;;  %v881_v20 = vsel %vm286_vm1, %v5011_v2, 0.0 }
 0x432   : > { %v896_v63 = vpop.permute.xlu0 %895 }
 0x433   : > { %914 = vmatpush.bf16.msra.mxu3 %v896_v63 }
 0x434   : > { %v5013_v4 = vpop.eup %5012  ;;  %888 = vadd.xlane.f32.xlu0 %v887_v3 }
 0x435   : > { %v890_v6 = vsel %vm286_vm1, %v5013_v4, 0.0  ;;  %v894_v32 = vpack.c.bf16 %v5013_v4, %v5009_v7 }
 0x436   : > { %4043 = vmatmul.msk.bf16.vlgmr.msra.gmra.mxu3 %vm286_vm1, %v893_v5  ;;  %891 = vadd.xlane.f32.xlu1 %v890_v6 }
 0x446   : > { %4044 = vmatmul.msk.bf16.gmra.mxu3 %vm286_vm1, %v894_v32 }
 0x44a   : > { %v5504_v18 = vpop.f32.mrf.mxu3 }
 0x452   : > { %v5507_v58 = vpop.f32.mrf.mxu3 }
 0x45a   : > { %v5509_v21 = vpop.f32.mrf.mxu3 }
 0x45d   : > { %v744_v8 = vpop.xlane.xlu0 %743 }
 0x45e   : > { %v748_v9 = vsub.f32 %v5469_v1, %v744_v8 }
 0x460   : > { %v755_v10 = vmul.f32 1.442695, %v748_v9 }
 0x462   : > { %5014 = vpow2.f32 %v755_v10  ;;  %v5513_v22 = vpop.f32.mrf.mxu3 }
 0x465   : > { %v5519_v17 = vpop.xlane.xlu0 %513 }
 0x468   : > { %v5015_v43 = vpop.eup %5014 }
 0x469   : > { %v766_v12 = vsel %vm286_vm1, %v5015_v43, 0.0  ;;  %v770_v13 = vpack.c.bf16 %v5015_v43, %v5005_v54 }
 0x46a   : > { %767 = vadd.xlane.f32.xlu2 %v766_v12 }
 0x46b   : > { %4040 = vmatmul.msk.bf16.gmra.mxu2 %vm286_vm1, %v770_v13 }
 0x472   : > { %640 = vadd.xlane.f32.xlu2 %v639_v16 }
 0x47a   : > { %882 = vadd.xlane.f32.xlu2 %v881_v20 }
 0x47c   : > { %v635_v27 = vpop.xlane.xlu1 %634 }
 0x47d   : > { %5016 = vrcp.f32 %v635_v27 }
 0x483   : > { %v5017_v30 = vpop.eup %5016 }
 0x484   : > { %v759_v1 = vpop.xlane.xlu2 %758 }
 0x48c   : > { %v5511_v0 = vpop.xlane.xlu2 %510 }
 0x48d   : > { %v668_v51 = vpop.f32.mrf.mxu3 }
 0x48e   : > { %v682_v36 = vmul.f32 %v5017_v30, %v668_v51  ;;  %v515_v51 = vsel %vm286_vm1, %v5463_v57, 0.0  ;;  %v4205_v30 = vld [vmem:[%s6996_s2 + $0x28] sm:$0xff] }
 0x48f   : > { %v5546_v57 = vld [vmem:[%s6996_s2 + $0xa8] sm:$0xff] }
 0x494   : > { %v762_v26 = vpop.xlane.xlu2 %761 }
 0x495   : > { %v670_v33 = vpop.f32.mrf.mxu3 }
 0x497   : > { %v644_v53 = vpop.xlane.xlu0 %643 }
 0x499   : > { %v765_v49 = vpop.xlane.xlu1 %764 }
 0x49c   : > { %v638_v28 = vpop.xlane.xlu2 %637 }
 0x49d   : > { %5018 = vrcp.f32 %v638_v28  ;;  %v4206_v28 = vld [vmem:[%s6996_s2 + $0x30] sm:$0xff] }
 0x49e   : > { %5020 = vrcp.f32 %v759_v1  ;;  %1026 = vmatpush.bf16.msra.mxu0 %v4206_v28 }
 0x49f   : > { %5022 = vrcp.f32 %v762_v26  ;;  %v886_v24 = vpop.xlane.xlu0 %885 }
 0x4a0   : > { %5024 = vrcp.f32 %v644_v53 }
 0x4a2   : > { %1027 = vmatpush.bf16.msra.mxu0 %v4205_v30 }
 0x4a3   : > { %v5019_v34 = vpop.eup %5018  ;;  %v792_v35 = vpop.f32.mrf.mxu2 }
 0x4a4   : > { %v683_v55 = vmul.f32 %v5019_v34, %v670_v33  ;;  %v5021_v39 = vpop.eup %5020  ;;  %v5535_v34 = vld [vmem:[%s6996_s2 + $0xb0] sm:$0xff] }
 0x4a5   : > { %v5023_v41 = vpop.eup %5022  ;;  %v806_v42 = vmul.f32 %v5021_v39, %v792_v35  ;;  %4234 = vmatpush.bf16.msrb.mxu3 %v5535_v34 }
 0x4a6   : > { %v4307_v37 = vpack.i.bf16 %v683_v55, %v682_v36  ;;  %v5025_v44 = vpop.eup %5024 }
 0x4a7   : > { %v889_v4 = vpop.xlane.xlu0 %888 }
 0x4a8   : > { %4308 = vrot.lane.b32.xlu1 %v4307_v37, %s5144_s22  ;;  %v673_v45 = vpop.f32.mrf.mxu3 }
 0x4a9   : > { %v892_v63 = vpop.xlane.xlu1 %891  ;;  %4235 = vmatpush.bf16.msrb.mxu3 %v5546_v57 }
 0x4ab   : > { %v794_v61 = vpop.f32.mrf.mxu2 }
 0x4ac   : > { %v807_v46 = vmul.f32 %v5023_v41, %v794_v61 }
 0x4ae   : > { %v4302_v14 = vpack.i.bf16 %v807_v46, %v806_v42 }
 0x4b0   : > { %4303 = vrot.lane.b32.xlu2 %v4302_v14, %s5145_s29  ;;  %v675_v29 = vpop.f32.mrf.mxu3 }
 0x4b1   : > { %v685_v38 = vmul.f32 %v5025_v44, %v675_v29 }
 0x4b9   : > { %v916_v50 = vpop.f32.mrf.mxu3 }
 0x4c1   : > { %v918_v40 = vpop.f32.mrf.mxu3 }
 0x4c9   : > { %v921_v62 = vpop.f32.mrf.mxu3 }
 0x4d1   : > { %v923_v13 = vpop.f32.mrf.mxu3 }
 0x4d2   : > { %519 = vadd.xlane.f32.xlu1 %v518_v47 }
 0x4dd   : > { %v768_v52 = vpop.xlane.xlu2 %767 }
 0x4e5   : > { %v641_v54 = vpop.xlane.xlu2 %640 }
 0x4e6   : > { %5026 = vrcp.f32 %v641_v54 }
 0x4e7   : > { %5028 = vrcp.f32 %v886_v24 }
 0x4ec   : > { %v5027_v48 = vpop.eup %5026 }
 0x4ed   : > { %v883_v25 = vpop.xlane.xlu2 %882  ;;  %v684_v59 = vmul.f32 %v5027_v48, %v673_v45  ;;  %v5029_v7 = vpop.eup %5028 }
 0x4ee   : > { %5030 = vrcp.f32 %v883_v25  ;;  %v797_v56 = vpop.f32.mrf.mxu2  ;;  %v931_v5 = vmul.f32 %v5029_v7, %v918_v40 }
 0x4ef   : > { %5032 = vrcp.f32 %v765_v49  ;;  %v4317_v60 = vpack.i.bf16 %v685_v38, %v684_v59 }
 0x4f0   : > { %5034 = vrcp.f32 %v768_v52 }
 0x4f1   : > { %4318 = vrot.lane.b32.xlu2 %v4317_v60, %s5144_s22  ;;  %5036 = vrcp.f32 %v892_v63 }
 0x4f2   : > { %5038 = vrcp.f32 %v889_v4 }
 0x4f3   : > { %5040 = vrcp.f32 %v5519_v17 }
 0x4f4   : > { %v5031_v2 = vpop.eup %5030  ;;  %5042 = vrcp.f32 %v5511_v0 }
 0x4f5   : > { %v5033_v3 = vpop.eup %5032  ;;  %v930_v6 = vmul.f32 %v5031_v2, %v916_v50 }
 0x4f6   : > { %v5035_v32 = vpop.eup %5034  ;;  %v799_v8 = vpop.f32.mrf.mxu2  ;;  %v808_v9 = vmul.f32 %v5033_v3, %v797_v56 }
 0x4f7   : > { %v809_v10 = vmul.f32 %v5035_v32, %v799_v8  ;;  %v4312_v43 = vpack.i.bf16 %v931_v5, %v930_v6  ;;  %v5037_v16 = vpop.eup %5036 }
 0x4f8   : > { %v933_v20 = vmul.f32 %v5037_v16, %v923_v13  ;;  %v5039_v1 = vpop.eup %5038 }
 0x4f9   : > { %v4322_v12 = vpack.i.bf16 %v809_v10, %v808_v9  ;;  %4313 = vrot.lane.b32.xlu0 %v4312_v43, %s5146_s30  ;;  %v932_v26 = vmul.f32 %v5039_v1, %v921_v62  ;;  %v5041_v61 = vpop.eup %5040 }
 0x4fa   : > { %v5043_v42 = vpop.eup %5042  ;;  %v559_v45 = vmul.f32 %v5041_v61, %v5507_v58 }
 0x4fb   : > { %4323 = vrot.lane.b32.xlu2 %v4322_v12, %s5145_s29  ;;  %v4327_v27 = vpack.i.bf16 %v933_v20, %v932_v26  ;;  %v558_v47 = vmul.f32 %v5043_v42, %v5504_v18 }
 0x503   : > { %4328 = vrot.lane.b32.xlu2 %v4327_v27, %s5146_s30  ;;  %s5541_s30 = scalar_lea.vmem %s6995_s1, %s4004_s8  ;;  %s205_s8 = sand.u32 1, %s5122_s16  }
 0x504   : > { %v1324_v33 = vld [vmem:[%s5541_s30 + $0x30] sm:$0xff]  ;;  %v1325_v35 = vld [vmem:[%s5541_s30 + $0x38] sm:$0xff]  ;;  %v1326_v55 = vld [vmem:[%s5541_s30 + $0x40] sm:$0xff]  ;;  %s3919_s6 = scalar_lea.sflag [#allocation4], %s205_s8 }
 0x505   : > { %v1361_v36 = vpack.c.bf16 %v1325_v35, %v1324_v33  ;;  %v1327_v37 = vld [vmem:[%s5541_s30 + $0x48] sm:$0xff]  ;;  %v1328_v48 = vld [vmem:[%s5541_s30 + $0x50] sm:$0xff]  ;;  %v1329_v38 = vld [vmem:[%s5541_s30 + $0x58] sm:$0xff] }
 0x506   : > { %v1362_v39 = vpack.c.bf16 %v1327_v37, %v1326_v55  ;;  %v1363_v25 = vpack.c.bf16 %v1329_v38, %v1328_v48  ;;  %v1330_v59 = vld [vmem:[%s5541_s30 + $0x60] sm:$0xff]  ;;  %v1331_v56 = vld [vmem:[%s5541_s30 + $0x68] sm:$0xff]  ;;  %v1332_v7 = vld [vmem:[%s5541_s30 + $0x70] sm:$0xff] }
 0x507   : > { %4094 = vmatmul.msk.bf16.vlgmr.msrb.gmra.mxu3 %vm286_vm1, %v1361_v36  ;;  %v1364_v60 = vpack.c.bf16 %v1331_v56, %v1330_v59  ;;  %v1333_v63 = vld [vmem:[%s5541_s30 + $0x78] sm:$0xff]  ;;  %v1334_v20 = vld [vmem:[%s5541_s30 + $0x80] sm:$0xff]  ;;  %v1335_v1 = vld [vmem:[%s5541_s30 + $0x88] sm:$0xff] }
 0x508   : > { %v1365_v4 = vpack.c.bf16 %v1333_v63, %v1332_v7  ;;  %v1366_v33 = vpack.c.bf16 %v1335_v1, %v1334_v20  ;;  %v1336_v55 = vld [vmem:[%s5541_s30 + $0x90] sm:$0xff]  ;;  %v1337_v37 = vld [vmem:[%s5541_s30 + $0x98] sm:$0xff]  ;;  %v1339_v61 = vld [vmem:[%s5541_s30 + $0xa8] sm:$0xff] }
 0x509   : > { %v1344_v38 = vld [vmem:[%s5541_s30 + $0xd0] sm:$0xff]  ;;  %v1350_v1 = vld [vmem:[%s5541_s30 + $0x100] sm:$0xff] }
 0x50a   : > { %v4304_v29 = vpop.permute.xlu2 %4303 }
 0x50b   : > { %v4306_v0 = vunpack.i.h.bf16 %v4304_v29  ;;  %v4305_v52 = vunpack.i.l.bf16 %v4304_v29 }
 0x517   : > { %4095 = vmatmul.msk.bf16.gmra.mxu3 %vm286_vm1, %v1362_v39  ;;  %v1367_v39 = vpack.c.bf16 %v1337_v37, %v1336_v55 }
 0x51a   : > { %v4309_v41 = vpop.permute.xlu1 %4308 }
 0x51b   : > { %v4311_v46 = vunpack.i.h.bf16 %v4309_v41  ;;  %v4310_v14 = vunpack.i.l.bf16 %v4309_v41  ;;  %v1338_v41 = vld [vmem:[%s5541_s30 + $0xa0] sm:$0xff] }
 0x51c   : > { %v1368_v42 = vpack.c.bf16 %v1339_v61, %v1338_v41 }
 0x51d   : > { %v982_v17 = vsel %vm445_vm15, %v558_v47, %v4310_v14  ;;  %v983_v50 = vsel %vm445_vm15, %v559_v45, %v4311_v46  ;;  %v1340_v46 = vld [vmem:[%s5541_s30 + $0xb0] sm:$0xff]  ;;  %v1341_v14 = vld [vmem:[%s5541_s30 + $0xb8] sm:$0xff] }
 0x51e   : > { %v987_v24 = vsel %vm986_vm2, %v982_v17, %v4305_v52  ;;  %v988_v18 = vsel %vm986_vm2, %v983_v50, %v4306_v0  ;;  %v1369_v45 = vpack.c.bf16 %v1341_v14, %v1340_v46  ;;  %v1342_v17 = vld [vmem:[%s5541_s30 + $0xc0] sm:$0xff]  ;;  %v1343_v50 = vld [vmem:[%s5541_s30 + $0xc8] sm:$0xff] }
 0x523   : > { %516 = vadd.xlane.f32.xlu0 %v515_v51 }
 0x527   : > { %4096 = vmatmul.msk.bf16.gmra.mxu3 %vm286_vm1, %v1363_v25  ;;  %v1345_v25 = vld [vmem:[%s5541_s30 + $0xd8] sm:$0xff] }
 0x528   : > { %v1371_v56 = vpack.c.bf16 %v1345_v25, %v1344_v38 }
 0x537   : > { %4097 = vmatmul.msk.bf16.gmra.mxu3 %vm286_vm1, %v1364_v60 }
 0x545   : > { %v520_v2 = vpop.xlane.xlu1 %519 }
 0x546   : > { %5044 = vrcp.f32 %v520_v2 }
 0x547   : > { %4098 = vmatmul.msk.bf16.gmra.mxu3 %vm286_vm1, %v1365_v4  ;;  %v1347_v4 = vld [vmem:[%s5541_s30 + $0xe8] sm:$0xff] }
 0x54b   : > { %v4319_v62 = vpop.permute.xlu2 %4318 }
 0x54c   : > { %v5045_v6 = vpop.eup %5044  ;;  %v4321_v9 = vunpack.i.h.bf16 %v4319_v62  ;;  %v4320_v12 = vunpack.i.l.bf16 %v4319_v62 }
 0x54d   : > { %v561_v8 = vmul.f32 %v5045_v6, %v5513_v22 }
 0x54f   : > { %v985_v27 = vsel %vm445_vm15, %v561_v8, %v4321_v9 }
 0x555   : > { %v4324_v3 = vpop.permute.xlu2 %4323 }
 0x556   : > { %v4326_v43 = vunpack.i.h.bf16 %v4324_v3  ;;  %v4325_v26 = vunpack.i.l.bf16 %v4324_v3  ;;  %v1346_v3 = vld [vmem:[%s5541_s30 + $0xe0] sm:$0xff] }
 0x557   : > { %4099 = vmatmul.msk.bf16.gmra.mxu3 %vm286_vm1, %v1366_v33 }
 0x558   : > { %v990_v30 = vsel %vm986_vm2, %v985_v27, %v4326_v43  ;;  %v1349_v43 = vld [vmem:[%s5541_s30 + $0xf8] sm:$0xff] }
 0x55d   : > { %v4329_v32 = vpop.permute.xlu2 %4328 }
 0x55e   : > { %v4331_v13 = vunpack.i.h.bf16 %v4329_v32  ;;  %v4330_v51 = vunpack.i.l.bf16 %v4329_v32 }
 0x560   : > { %v995_v35 = vsel %vm991_vm3, %v990_v30, %v4331_v13 }
 0x567   : > { %4100 = vmatmul.msk.bf16.gmra.mxu3 %vm286_vm1, %v1367_v39 }
 0x56b   : > { %v4314_v53 = vpop.permute.xlu0 %4313 }
 0x56c   : > { %v4316_v54 = vunpack.i.h.bf16 %v4314_v53  ;;  %v4315_v40 = vunpack.i.l.bf16 %v4314_v53  ;;  %v1370_v53 = vpack.c.bf16 %v1343_v50, %v1342_v17 }
 0x56e   : > { %v993_v58 = vsel %vm991_vm3, %v988_v18, %v4316_v54  ;;  %v992_v44 = vsel %vm991_vm3, %v987_v24, %v4315_v40  ;;  %v4968_v24 = vld [vmem:[%s6997_s3 + $0x43] ss:$0 sm:$0xff] }
 0x56f   : > { %v1000_v49 = vpack.c.bf16 %v993_v58, %v992_v44 }
 0x571   : > { %4053 = vmatmul.msk.bf16.vlgmr.msra.gmra.mxu0 %vm286_vm1, %v1000_v49 }
 0x577   : > { %4101 = vmatmul.msk.bf16.gmra.mxu3 %vm286_vm1, %v1368_v42 }
 0x587   : > { %4102 = vmatmul.msk.bf16.gmra.mxu3 %vm286_vm1, %v1369_v45 }
 0x58a   : > { %v1466_v47 = vpop.f32.mrf.mxu3 }
 0x58b   : > { %v1547_v29 = vmax.f32 %v1466_v47, 0.0 }
 0x58d   : > { %1589 = vst.msk [vmem:[#allocation2 + $0x43] sm:$0xff] %vm986_vm2, %v1547_v29 }
 0x592   : > { %v1468_v0 = vpop.f32.mrf.mxu3 }
 0x593   : > { %v1548_v52 = vmax.f32 %v1468_v0, 0.0 }
 0x595   : > { %1590 = vst.msk [vmem:[#allocation2 + $0x4b] sm:$0xff] %vm986_vm2, %v1548_v52 }
 0x596   : > { %v517_v5 = vpop.xlane.xlu0 %516 }
 0x597   : > { %5046 = vrcp.f32 %v517_v5  ;;  %4103 = vmatmul.msk.bf16.gmra.mxu3 %vm286_vm1, %v1370_v53  ;;  %v1372_v5 = vpack.c.bf16 %v1347_v4, %v1346_v3 }
 0x59a   : > { %v1471_v54 = vpop.f32.mrf.mxu3 }
 0x59b   : > { %v1549_v40 = vmax.f32 %v1471_v54, 0.0 }
 0x59d   : > { %v5047_v10 = vpop.eup %5046  ;;  %1591 = vst.msk [vmem:[#allocation2 + $0x53] sm:$0xff] %vm986_vm2, %v1549_v40 }
 0x59e   : > { %v560_v16 = vmul.f32 %v5047_v10, %v5509_v21  ;;  %v1348_v10 = vld [vmem:[%s5541_s30 + $0xf0] sm:$0xff] }
 0x59f   : > { %v1373_v13 = vpack.c.bf16 %v1349_v43, %v1348_v10  ;;  %v5147_v43 = vmov 0.0  }
 0x5a0   : > { %v984_v28 = vsel %vm445_vm15, %v560_v16, %v4320_v12  ;;  %1577 = vst.msk [vmem:[#allocation2] sm:$0xff] %vm986_vm2, %v5147_v43 }
 0x5a1   : > { %v989_v22 = vsel %vm986_vm2, %v984_v28, %v4325_v26  ;;  %v1351_v26 = vld [vmem:[%s5541_s30 + $0x108] sm:$0xff]  ;;  %1578 = vst.msk [vmem:[#allocation2 + $0x8] sm:$0xff] %vm986_vm2, %v5147_v43 }
 0x5a2   : > { %v994_v21 = vsel %vm991_vm3, %v989_v22, %v4330_v51  ;;  %v1473_v44 = vpop.f32.mrf.mxu3  ;;  %v1374_v28 = vpack.c.bf16 %v1351_v26, %v1350_v1  ;;  %1579 = vst.msk [vmem:[#allocation2 + $0x10] sm:$0xff] %vm986_vm2, %v5147_v43  ;;  %vm1264_vm3 = vcmask 523264  }
 0x5a3   : > { %v1001_v36 = vpack.c.bf16 %v995_v35, %v994_v21  ;;  %v1550_v48 = vmax.f32 %v1473_v44, 0.0  ;;  %1580 = vst.msk [vmem:[#allocation2 + $0x130] sm:$0xff] %vm986_vm2, %v5147_v43 }
 0x5a4   : > { %1581 = vst.msk [vmem:[#allocation2 + $0x138] sm:$0xff] %vm986_vm2, %v5147_v43 }
 0x5a5   : > { %4054 = vmatmul.msk.bf16.gmra.mxu0 %vm286_vm1, %v1001_v36  ;;  %1592 = vst.msk [vmem:[#allocation2 + $0x5b] sm:$0xff] %vm986_vm2, %v1550_v48 }
 0x5a6   : > { %1582 = vst.msk [vmem:[#allocation2 + $0x140] sm:$0xff] %vm986_vm2, %v5147_v43 }
 0x5a7   : > { %4104 = vmatmul.msk.bf16.gmra.mxu3 %vm286_vm1, %v1371_v56 }
 0x5aa   : > { %v1476_v62 = vpop.f32.mrf.mxu3 }
 0x5ab   : > { %v1551_v6 = vmax.f32 %v1476_v62, 0.0 }
 0x5ad   : > { %1593 = vst.msk [vmem:[#allocation2 + $0x63] sm:$0xff] %vm986_vm2, %v1551_v6 }
 0x5b2   : > { %v1478_v2 = vpop.f32.mrf.mxu3 }
 0x5b7   : > { %4105 = vmatmul.msk.bf16.gmra.mxu3 %vm286_vm1, %v1372_v5 }
 0x5ba   : > { %v1481_v32 = vpop.f32.mrf.mxu3 }
 0x5bb   : > { %v1553_v8 = vmax.f32 %v1481_v32, 0.0 }
 0x5bd   : > { %1595 = vst.msk [vmem:[#allocation2 + $0x73] sm:$0xff] %vm986_vm2, %v1553_v8 }
 0x5c2   : > { %v1483_v9 = vpop.f32.mrf.mxu3 }
 0x5c3   : > { %v1554_v12 = vmax.f32 %v1483_v9, 0.0 }
 0x5c5   : > { %1596 = vst.msk [vmem:[#allocation2 + $0x7b] sm:$0xff] %vm986_vm2, %v1554_v12 }
 0x5c7   : > { %4106 = vmatmul.msk.bf16.gmra.mxu3 %vm286_vm1, %v1373_v13 }
 0x5ca   : > { %v1486_v16 = vpop.f32.mrf.mxu3 }
 0x5cb   : > { %v1555_v20 = vmax.f32 %v1486_v16, 0.0 }
 0x5cd   : > { %1597 = vst.msk [vmem:[#allocation2 + $0x83] sm:$0xff] %vm986_vm2, %v1555_v20 }
 0x5d2   : > { %v1488_v27 = vpop.f32.mrf.mxu3 }
 0x5d3   : > { %v1556_v51 = vmax.f32 %v1488_v27, 0.0 }
 0x5d5   : > { %1598 = vst.msk [vmem:[#allocation2 + $0x8b] sm:$0xff] %vm986_vm2, %v1556_v51 }
 0x5d7   : > { %4107 = vmatmul.msk.bf16.gmra.mxu3 %vm286_vm1, %v1374_v28 }
 0x5da   : > { %v1491_v35 = vpop.f32.mrf.mxu3 }
 0x5db   : > { %v1557_v36 = vmax.f32 %v1491_v35, 0.0 }
 0x5dd   : > { %1599 = vst.msk [vmem:[#allocation2 + $0x93] sm:$0xff] %vm986_vm2, %v1557_v36  ;;  %v1665_v36 = vld [vmem:[#allocation2 + $0x51] sm:$0xff] }
 0x5e2   : > { %v1493_v41 = vpop.f32.mrf.mxu3 }
 0x5e3   : > { %v1558_v61 = vmax.f32 %v1493_v41, 0.0 }
 0x5e5   : > { %1600 = vst.msk [vmem:[#allocation2 + $0x9b] sm:$0xff] %vm986_vm2, %v1558_v61  ;;  %v1671_v61 = vld [vmem:[#allocation2 + $0x81] sm:$0xff] }
 0x5ea   : > { %v1496_v42 = vpop.f32.mrf.mxu3 }
 0x5eb   : > { %v1559_v45 = vmax.f32 %v1496_v42, 0.0  ;;  %v1672_v42 = vld [vmem:[#allocation2 + $0x89] sm:$0xff] }
 0x5ed   : > { %1601 = vst.msk [vmem:[#allocation2 + $0xa3] sm:$0xff] %vm986_vm2, %v1559_v45 }
 0x5ee   : > { %v1029_v18 = vpop.f32.mrf.mxu0 }
 0x5ef   : > { %v1039_v58 = vadd.f32 %v1029_v18, %v5241_v11 }
 0x5f1   : > { %v5606_v49 = vadd.f32 %v4968_v24, %v1039_v58 }
 0x5f2   : > { %v1498_v46 = vpop.f32.mrf.mxu3 }
 0x5f3   : > { %v1051_v59 = vsel %vm286_vm1, %v5606_v49, 0.0 }
 0x5f4   : > { %1052 = vadd.xlane.f32.xlu2 %v1051_v59 }
 0x5f6   : > { %v1031_v60 = vpop.f32.mrf.mxu0 }
 0x5f7   : > { %v1040_v11 = vadd.f32 %v1031_v60, %v5248_v15  ;;  %v1552_v15 = vmax.f32 %v1478_v2, 0.0 }
 0x5f9   : > { %v5615_v7 = vadd.f32 %v4968_v24, %v1040_v11  ;;  %1594 = vst.msk [vmem:[#allocation2 + $0x6b] sm:$0xff] %vm986_vm2, %v1552_v15 }
 0x5fa   : > { %v1501_v14 = vpop.f32.mrf.mxu3 }
 0x5fb   : > { %v1054_v63 = vsel %vm286_vm1, %v5615_v7, 0.0  ;;  %v1561_v29 = vmax.f32 %v1501_v14, 0.0  ;;  %v1667_v14 = vld [vmem:[#allocation2 + $0x61] sm:$0xff] }
 0x5fc   : > { %1055 = vadd.xlane.f32.xlu0 %v1054_v63 }
 0x5fd   : > { %1603 = vst.msk [vmem:[#allocation2 + $0xb3] sm:$0xff] %vm986_vm2, %v1561_v29 }
 0x600   : > { %v1668_v45 = vld [vmem:[#allocation2 + $0x69] sm:$0xff] }
 0x602   : > { %v1503_v47 = vpop.f32.mrf.mxu3 }
 0x603   : > { %v1562_v17 = vmax.f32 %v1503_v47, 0.0  ;;  %v4342_v47 = vpack.i.bf16 %v1668_v45, %v1667_v14 }
 0x605   : > { %1604 = vst.msk [vmem:[#allocation2 + $0xbb] sm:$0xff] %vm986_vm2, %v1562_v17 }
 0x60a   : > { %v1506_v50 = vpop.f32.mrf.mxu3 }
 0x60b   : > { %v1563_v0 = vmax.f32 %v1506_v50, 0.0  ;;  %v1673_v50 = vld [vmem:[#allocation2 + $0x91] sm:$0xff] }
 0x60c   : > { %v1678_v29 = vld [vmem:[#allocation2 + $0xb9] sm:$0xff] }
 0x60d   : > { %1605 = vst.msk [vmem:[#allocation2 + $0xc3] sm:$0xff] %vm986_vm2, %v1563_v0  ;;  %v1674_v0 = vld [vmem:[#allocation2 + $0x99] sm:$0xff] }
 0x612   : > { %v1508_v52 = vpop.f32.mrf.mxu3 }
 0x613   : > { %v1564_v53 = vmax.f32 %v1508_v52, 0.0  ;;  %v4357_v52 = vpack.i.bf16 %v1674_v0, %v1673_v50 }
 0x615   : > { %1606 = vst.msk [vmem:[#allocation2 + $0xcb] sm:$0xff] %vm986_vm2, %v1564_v53 }
 0x622   : > { %v1034_v22 = vpop.f32.mrf.mxu0 }
 0x623   : > { %v1041_v30 = vadd.f32 %v1034_v22, %v5255_v19 }
 0x625   : > { %v5634_v33 = vadd.f32 %v4968_v24, %v1041_v30 }
 0x627   : > { %v1057_v21 = vsel %vm286_vm1, %v5634_v33, 0.0 }
 0x628   : > { %1058 = vadd.xlane.f32.xlu1 %v1057_v21 }
 0x62a   : > { %v1036_v55 = vpop.f32.mrf.mxu0 }
 0x62b   : > { %v1042_v37 = vadd.f32 %v1036_v55, %v5262_v23  ;;  %v1560_v23 = vmax.f32 %v1498_v46, 0.0  ;;  %v1666_v55 = vld [vmem:[#allocation2 + $0x59] sm:$0xff]  ;;  %v4352_v46 = vpack.i.bf16 %v1672_v42, %v1671_v61  ;;  %v1707_v61 = vld [vmem:[#allocation2 + $0x82] sm:$0xff] }
 0x62d   : > { %v5641_v39 = vadd.f32 %v4968_v24, %v1042_v37  ;;  %1602 = vst.msk [vmem:[#allocation2 + $0xab] sm:$0xff] %vm986_vm2, %v1560_v23  ;;  %v1511_v24 = vpop.f32.mrf.mxu3  ;;  %v4337_v37 = vpack.i.bf16 %v1666_v55, %v1665_v36 }
 0x62e   : > { %v1565_v18 = vmax.f32 %v1511_v24, 0.0  ;;  %v1679_v24 = vld [vmem:[#allocation2 + $0xc1] sm:$0xff] }
 0x62f   : > { %v1060_v19 = vsel %vm286_vm1, %v5641_v39, 0.0 }
 0x630   : > { %1061 = vadd.xlane.f32.xlu0 %v1060_v19  ;;  %1607 = vst.msk [vmem:[#allocation2 + $0xd3] sm:$0xff] %vm986_vm2, %v1565_v18  ;;  %v1655_v19 = vld [vmem:[#allocation2 + $0x1] sm:$0xff]  ;;  %v1680_v18 = vld [vmem:[#allocation2 + $0xc9] sm:$0xff] }
 0x634   : > { %v1677_v23 = vld [vmem:[#allocation2 + $0xb1] sm:$0xff] }
 0x635   : > { %v1513_v59 = vpop.f32.mrf.mxu3  ;;  %v4367_v17 = vpack.i.bf16 %v1678_v29, %v1677_v23 }
 0x636   : > { %v1566_v63 = vmax.f32 %v1513_v59, 0.0 }
 0x638   : > { %1608 = vst.msk [vmem:[#allocation2 + $0xdb] sm:$0xff] %vm986_vm2, %v1566_v63 }
 0x63d   : > { %v1516_v62 = vpop.f32.mrf.mxu3 }
 0x63e   : > { %v1567_v3 = vmax.f32 %v1516_v62, 0.0  ;;  %v1670_v62 = vld [vmem:[#allocation2 + $0x79] sm:$0xff] }
 0x640   : > { %1609 = vst.msk [vmem:[#allocation2 + $0xe3] sm:$0xff] %vm986_vm2, %v1567_v3  ;;  %v1701_v3 = vld [vmem:[#allocation2 + $0x52] sm:$0xff] }
 0x645   : > { %v1518_v2 = vpop.f32.mrf.mxu3 }
 0x646   : > { %v1568_v5 = vmax.f32 %v1518_v2, 0.0 }
 0x647   : > { %v1683_v53 = vld [vmem:[#allocation2 + $0xe1] sm:$0xff] }
 0x648   : > { %1610 = vst.msk [vmem:[#allocation2 + $0xeb] sm:$0xff] %vm986_vm2, %v1568_v5 }
 0x64d   : > { %v1521_v4 = vpop.f32.mrf.mxu3 }
 0x64e   : > { %v1569_v6 = vmax.f32 %v1521_v4, 0.0  ;;  %v1702_v4 = vld [vmem:[#allocation2 + $0x5a] sm:$0xff] }
 0x64f   : > { %v5707_v5 = vpack.i.bf16 %v1702_v4, %v1701_v3 }
 0x650   : > { %1611 = vst.msk [vmem:[#allocation2 + $0xf3] sm:$0xff] %vm986_vm2, %v1569_v6  ;;  %v1691_v6 = vld [vmem:[#allocation2 + $0x2] sm:$0xff] }
 0x657   : > { %v1685_v59 = vld [vmem:[#allocation2 + $0xf1] sm:$0xff] }
 0x667   : > { %v1053_v54 = vpop.xlane.xlu2 %1052 }
 0x668   : > { %v1063_v40 = vmul.f32 %v1053_v54, %v5266_v31  ;;  %v1684_v54 = vld [vmem:[#allocation2 + $0xe9] sm:$0xff] }
 0x66a   : > { %v5654_v58 = vsub.f32 %v5606_v49, %v1063_v40  ;;  %v4382_v40 = vpack.i.bf16 %v1684_v54, %v1683_v53  ;;  %v1706_v53 = vld [vmem:[#allocation2 + $0x7a] sm:$0xff] }
 0x66c   : > { %v1071_v44 = vmul.f32 %v5654_v58, %v5654_v58 }
 0x66e   : > { %v1075_v48 = vsel %vm286_vm1, %v1071_v44, 0.0  ;;  %v4372_v44 = vpack.i.bf16 %v1680_v18, %v1679_v24  ;;  %v5736_v24 = vld [vmem:[%s6997_s3 + $0x44] ss:$0 sm:$0xff] }
 0x66f   : > { %v1056_v38 = vpop.xlane.xlu0 %1055  ;;  %1076 = vadd.xlane.f32.xlu1 %v1075_v48 }
 0x670   : > { %v1064_v25 = vmul.f32 %v1056_v38, %v5266_v31 }
 0x672   : > { %v5662_v56 = vsub.f32 %v5615_v7, %v1064_v25  ;;  %v1523_v7 = vpop.f32.mrf.mxu3 }
 0x673   : > { %v1570_v32 = vmax.f32 %v1523_v7, 0.0  ;;  %v1692_v7 = vld [vmem:[#allocation2 + $0xa] sm:$0xff] }
 0x674   : > { %v1072_v60 = vmul.f32 %v5662_v56, %v5662_v56  ;;  %v4402_v43 = vpack.i.bf16 %v1692_v7, %v1691_v6  ;;  %v1711_v6 = vld [vmem:[#allocation2 + $0xa2] sm:$0xff]  ;;  %v1712_v7 = vld [vmem:[#allocation2 + $0xaa] sm:$0xff] }
 0x675   : > { %1612 = vst.msk [vmem:[#allocation2 + $0xfb] sm:$0xff] %vm986_vm2, %v1570_v32  ;;  %v4208_v32 = vld [vmem:[%s6996_s2 + $0x40] sm:$0xff] }
 0x676   : > { %v1078_v11 = vsel %vm286_vm1, %v1072_v60, 0.0  ;;  %1181 = vmatpush.bf16.msra.mxu2 %v4208_v32  ;;  %v1713_v32 = vld [vmem:[#allocation2 + $0xb2] sm:$0xff] }
 0x677   : > { %1079 = vadd.xlane.f32.xlu0 %v1078_v11  ;;  %v1669_v11 = vld [vmem:[#allocation2 + $0x71] sm:$0xff] }
 0x678   : > { %v4347_v2 = vpack.i.bf16 %v1670_v62, %v1669_v11  ;;  %v1710_v11 = vld [vmem:[#allocation2 + $0x9a] sm:$0xff] }
 0x67a   : > { %v1526_v15 = vpop.f32.mrf.mxu3  ;;  %4348 = vrot.lane.b32.xlu2 %v4347_v2, %s5145_s29 }
 0x67b   : > { %v1571_v8 = vmax.f32 %v1526_v15, 0.0 }
 0x67c   : > { %v1686_v60 = vld [vmem:[#allocation2 + $0xf9] sm:$0xff] }
 0x67d   : > { %1613 = vst.msk [vmem:[#allocation2 + $0x103] sm:$0xff] %vm986_vm2, %v1571_v8  ;;  %v4387_v63 = vpack.i.bf16 %v1686_v60, %v1685_v59  ;;  %v1675_v8 = vld [vmem:[#allocation2 + $0xa1] sm:$0xff]  ;;  %v1709_v60 = vld [vmem:[#allocation2 + $0x92] sm:$0xff] }
 0x67e   : > { %v5746_v59 = vld [vmem:[%s6997_s3 + $0x45] ss:$0 sm:$0xff]  ;;  %v4427_v62 = vpack.i.bf16 %v1710_v11, %v1709_v60  ;;  %v1716_v60 = vld [vmem:[#allocation2 + $0xca] sm:$0xff] }
 0x682   : > { %v1528_v16 = vpop.f32.mrf.mxu3 }
 0x683   : > { %v1572_v20 = vmax.f32 %v1528_v16, 0.0 }
 0x685   : > { %1614 = vst.msk [vmem:[#allocation2 + $0x10b] sm:$0xff] %vm986_vm2, %v1572_v20 }
 0x68a   : > { %v1531_v22 = vpop.f32.mrf.mxu3 }
 0x68b   : > { %v1573_v30 = vmax.f32 %v1531_v22, 0.0  ;;  %v1682_v22 = vld [vmem:[#allocation2 + $0xd9] sm:$0xff] }
 0x68d   : > { %1615 = vst.msk [vmem:[#allocation2 + $0x113] sm:$0xff] %vm986_vm2, %v1573_v30 }
 0x692   : > { %v1533_v21 = vpop.f32.mrf.mxu3 }
 0x693   : > { %v1574_v35 = vmax.f32 %v1533_v21, 0.0 }
 0x694   : > { %v1689_v48 = vld [vmem:[#allocation2 + $0x111] sm:$0xff] }
 0x695   : > { %1616 = vst.msk [vmem:[#allocation2 + $0x11b] sm:$0xff] %vm986_vm2, %v1574_v35 }
 0x69b   : > { %v1059_v9 = vpop.xlane.xlu1 %1058 }
 0x69c   : > { %v1065_v10 = vmul.f32 %v1059_v9, %v5266_v31  ;;  %v1690_v38 = vld [vmem:[#allocation2 + $0x119] sm:$0xff]  ;;  %v1676_v9 = vld [vmem:[#allocation2 + $0xa9] sm:$0xff] }
 0x69d   : > { %v4397_v25 = vpack.i.bf16 %v1690_v38, %v1689_v48  ;;  %v4362_v16 = vpack.i.bf16 %v1676_v9, %v1675_v8  ;;  %v5754_v8 = vpack.i.bf16 %v1712_v7, %v1711_v6  ;;  %v1714_v9 = vld [vmem:[#allocation2 + $0xba] sm:$0xff] }
 0x69e   : > { %v5677_v12 = vsub.f32 %v5634_v33, %v1065_v10 }
 0x69f   : > { %4363 = vrot.lane.b32.xlu2 %v4362_v16, %s5145_s29  ;;  %v1717_v16 = vld [vmem:[#allocation2 + $0xd2] sm:$0xff] }
 0x6a0   : > { %v1073_v13 = vmul.f32 %v5677_v12, %v5677_v12 }
 0x6a2   : > { %v1081_v1 = vsel %vm286_vm1, %v1073_v13, 0.0  ;;  %v4207_v13 = vld [vmem:[%s6996_s2 + $0x38] sm:$0xff] }
 0x6a3   : > { %1082 = vadd.xlane.f32.xlu1 %v1081_v1  ;;  %v1062_v26 = vpop.xlane.xlu0 %1061  ;;  %1182 = vmatpush.bf16.msra.mxu2 %v4207_v13  ;;  %v1703_v1 = vld [vmem:[#allocation2 + $0x62] sm:$0xff] }
 0x6a4   : > { %v1066_v27 = vmul.f32 %v1062_v26, %v5266_v31  ;;  %v1704_v26 = vld [vmem:[#allocation2 + $0x6a] sm:$0xff] }
 0x6a6   : > { %v5689_v51 = vsub.f32 %v5641_v39, %v1066_v27  ;;  %v1656_v39 = vld [vmem:[#allocation2 + $0x9] sm:$0xff] }
 0x6a7   : > { %v4332_v41 = vpack.i.bf16 %v1656_v39, %v1655_v19  ;;  %v1687_v39 = vld [vmem:[#allocation2 + $0x101] sm:$0xff] }
 0x6a8   : > { %v1074_v28 = vmul.f32 %v5689_v51, %v5689_v51 }
 0x6aa   : > { %v1084_v33 = vsel %vm286_vm1, %v1074_v28, 0.0  ;;  %v1681_v28 = vld [vmem:[#allocation2 + $0xd1] sm:$0xff] }
 0x6ab   : > { %1085 = vadd.xlane.f32.xlu0 %v1084_v33  ;;  %v5721_v33 = vpack.i.bf16 %v1704_v26, %v1703_v1  ;;  %v4377_v21 = vpack.i.bf16 %v1682_v22, %v1681_v28  ;;  %v1719_v1 = vld [vmem:[#allocation2 + $0xe2] sm:$0xff]  ;;  %v1720_v22 = vld [vmem:[#allocation2 + $0xea] sm:$0xff] }
 0x6ad   : > { %4378 = vrot.lane.b32.xlu2 %v4377_v21, %s5145_s29  ;;  %v5765_v21 = vpack.i.bf16 %v1720_v22, %v1719_v1  ;;  %v1847_v1 = vld [vmem:[#allocation2 + $0x66] sm:$0xff]  ;;  %v1849_v22 = vld [vmem:[#allocation2 + $0x76] sm:$0xff] }
 0x6bc   : > { %4338 = vrot.lane.b32.xlu1 %v4337_v37, %s5145_s29 }
 0x6bf   : > { %4333 = vrot.lane.b32.xlu0 %v4332_v41, %s5145_s29  ;;  %v1688_v41 = vld [vmem:[#allocation2 + $0x109] sm:$0xff] }
 0x6c0   : > { %v4392_v42 = vpack.i.bf16 %v1688_v41, %v1687_v39  ;;  %v1725_v39 = vld [vmem:[#allocation2 + $0x112] sm:$0xff] }
 0x6c2   : > { %4393 = vrot.lane.b32.xlu2 %v4392_v42, %s5145_s29  ;;  %v1726_v42 = vld [vmem:[#allocation2 + $0x11a] sm:$0xff] }
 0x6c4   : > { %4353 = vrot.lane.b32.xlu1 %v4352_v46, %s5145_s29  ;;  %v1708_v46 = vld [vmem:[#allocation2 + $0x8a] sm:$0xff] }
 0x6c5   : > { %v5726_v45 = vpack.i.bf16 %v1708_v46, %v1707_v61 }
 0x6c7   : > { %4343 = vrot.lane.b32.xlu0 %v4342_v47, %s5145_s29 }
 0x6cc   : > { %4368 = vrot.lane.b32.xlu1 %v4367_v17, %s5145_s29 }
 0x6cf   : > { %4358 = vrot.lane.b32.xlu0 %v4357_v52, %s5145_s29  ;;  %v1705_v52 = vld [vmem:[#allocation2 + $0x72] sm:$0xff] }
 0x6d0   : > { %v5731_v54 = vpack.i.bf16 %v1706_v53, %v1705_v52  ;;  %v1772_v52 = vld [vmem:[#allocation2 + $0x4c] sm:$0xff] }
 0x6d1   : > { %v1807_v53 = vld [vmem:[#allocation2 + $0x45] sm:$0xff] }
 0x6d2   : > { %4418 = vrot.lane.b32.xlu2 %v5731_v54, %s5148_s20 }
 0x6d4   : > { %4383 = vrot.lane.b32.xlu1 %v4382_v40, %s5145_s29 }
 0x6d7   : > { %4373 = vrot.lane.b32.xlu0 %v4372_v44, %s5145_s29 }
 0x6da   : > { %4433 = vrot.lane.b32.xlu2 %v5754_v8, %s5148_s20 }
 0x6dc   : > { %4398 = vrot.lane.b32.xlu1 %v4397_v25, %s5145_s29 }
 0x6df   : > { %4388 = vrot.lane.b32.xlu0 %v4387_v63, %s5145_s29 }
 0x6e2   : > { %v1077_v15 = vpop.xlane.xlu1 %1076 }
 0x6e3   : > { %v1087_v10 = vmul.f32 %v1077_v15, %v5266_v31 }
 0x6e4   : > { %4408 = vrot.lane.b32.xlu1 %v5707_v5, %s5148_s20 }
 0x6e5   : > { %v1091_v20 = vadd.f32 1e-06, %v1087_v10  ;;  %v5756_v10 = vpack.i.bf16 %v1714_v9, %v1713_v32  ;;  %v1721_v32 = vld [vmem:[#allocation2 + $0xf2] sm:$0xff]  ;;  %v1774_v9 = vld [vmem:[#allocation2 + $0x5c] sm:$0xff] }
 0x6e7   : > { %5048 = vrsqrt.f32 %v1091_v20  ;;  %4403 = vrot.lane.b32.xlu0 %v4402_v43, %s5148_s20  ;;  %vm1101_vm5 = vweird.f32 %v1091_v20 }
 0x6ea   : > { %v1080_v27 = vpop.xlane.xlu0 %1079 }
 0x6eb   : > { %v1088_v30 = vmul.f32 %v1080_v27, %v5266_v31 }
 0x6ec   : > { %4423 = vrot.lane.b32.xlu1 %v5726_v45, %s5148_s20 }
 0x6ed   : > { %v5049_v35 = vpop.eup %5048  ;;  %v1092_v36 = vadd.f32 1e-06, %v1088_v30 }
 0x6ee   : > { %v1096_v55 = vmul.f32 %v5049_v35, %v1091_v20  ;;  %vm1102_vm4 = vweird.f32 %v5049_v35  ;;  %v1718_v20 = vld [vmem:[#allocation2 + $0xda] sm:$0xff] }
 0x6ef   : > { %5050 = vrsqrt.f32 %v1092_v36  ;;  %4413 = vrot.lane.b32.xlu0 %v5721_v33, %s5148_s20  ;;  %vm1103_vm6 = vmor %vm1101_vm5, %vm1102_vm4  ;;  %vm1111_vm8 = vweird.f32 %v1092_v36  ;;  %v5763_v28 = vpack.i.bf16 %v1718_v20, %v1717_v16  ;;  %v1846_v16 = vld [vmem:[#allocation2 + $0x5e] sm:$0xff]  ;;  %vm1293_vm4 = vcmask 253952  }
 0x6f0   : > { %v1097_v37 = vmul.f32 %v5049_v35, %v1096_v55  ;;  %vm2959_vm5 = vcmask 654336  }
 0x6f1   : > { %4448 = vrot.lane.b32.xlu2 %v5763_v28, %s5148_s20 }
 0x6f2   : > { %v1098_v19 = vmul.f32 0.5, %v1097_v37  ;;  %v1723_v37 = vld [vmem:[#allocation2 + $0x102] sm:$0xff] }
 0x6f4   : > { %v1099_v14 = vsub.f32 1.5, %v1098_v19  ;;  %4438 = vrot.lane.b32.xlu1 %v5756_v10, %s5148_s20  ;;  %v1724_v19 = vld [vmem:[#allocation2 + $0x10a] sm:$0xff] }
 0x6f5   : > { %v5051_v47 = vpop.eup %5050  ;;  %v5771_v61 = vpack.i.bf16 %v1724_v19, %v1723_v37  ;;  %v4212_v19 = vld [vmem:[%s6996_s2 + $0x60] sm:$0xff] }
 0x6f6   : > { %v1100_v23 = vmul.f32 %v5049_v35, %v1099_v14  ;;  %v1106_v29 = vmul.f32 %v5051_v47, %v1092_v36  ;;  %vm1112_vm7 = vweird.f32 %v5051_v47  ;;  %1275 = vmatpush.bf16.msra.mxu1 %v4212_v19  ;;  %v1862_v19 = vld [vmem:[#allocation2 + $0xde] sm:$0xff] }
 0x6f7   : > { %vm1113_vm9 = vmor %vm1111_vm8, %vm1112_vm7  ;;  %4428 = vrot.lane.b32.xlu0 %v4427_v62, %s5148_s20  ;;  %vm3033_vm7 = vcmask 916480  }
 0x6f8   : > { %v1107_v17 = vmul.f32 %v5051_v47, %v1106_v29  ;;  %v1104_v50 = vsel %vm1103_vm6, %v5049_v35, %v1100_v23  ;;  %vm2996_vm6 = vcmask 785408  }
 0x6f9   : > { %v1135_v18 = vmul.f32 %v1104_v50, %v5654_v58  ;;  %4463 = vrot.lane.b32.xlu2 %v5771_v61, %s5148_s20 }
 0x6fa   : > { %v1108_v0 = vmul.f32 0.5, %v1107_v17 }
 0x6fb   : > { %v1140_v38 = vmul.f32 %v5736_v24, %v1135_v18 }
 0x6fc   : > { %v1109_v40 = vsub.f32 1.5, %v1108_v0  ;;  %4453 = vrot.lane.b32.xlu1 %v5765_v21, %s5148_s20  ;;  %v1771_v0 = vld [vmem:[#allocation2 + $0x44] sm:$0xff] }
 0x6fd   : > { %v1145_v63 = vadd.f32 %v5746_v59, %v1140_v38  ;;  %v4472_v18 = vpack.i.bf16 %v1772_v52, %v1771_v0 }
 0x6fe   : > { %v1110_v44 = vmul.f32 %v5051_v47, %v1109_v40 }
 0x700   : > { %v1114_v48 = vsel %vm1113_vm9, %v5051_v47, %v1110_v44  ;;  %v5773_v47 = vpack.i.bf16 %v1726_v42, %v1725_v39  ;;  %v1808_v44 = vld [vmem:[#allocation2 + $0x4d] sm:$0xff]  ;;  %v4211_v39 = vld [vmem:[%s6996_s2 + $0x58] sm:$0xff] }
 0x701   : > { %v1136_v25 = vmul.f32 %v1114_v48, %v5662_v56  ;;  %v4477_v38 = vpack.i.bf16 %v1808_v44, %v1807_v53  ;;  %4473 = vrot.lane.b32.xlu2 %v4472_v18, %s5133_s13  ;;  %1276 = vmatpush.bf16.msra.mxu1 %v4211_v39  ;;  %v1853_v42 = vld [vmem:[#allocation2 + $0x96] sm:$0xff] }
 0x702   : > { %v1353_v44 = vld [vmem:[%s5541_s30 + $0x118] sm:$0xff] }
 0x703   : > { %v1141_v58 = vmul.f32 %v5736_v24, %v1136_v25  ;;  %v1715_v25 = vld [vmem:[#allocation2 + $0xc2] sm:$0xff] }
 0x704   : > { %4468 = vrot.lane.b32.xlu1 %v5773_v47, %s5148_s20  ;;  %v5781_v11 = vpack.i.bf16 %v1716_v60, %v1715_v25  ;;  %v1855_v60 = vld [vmem:[#allocation2 + $0xa6] sm:$0xff] }
 0x705   : > { %v1146_v2 = vadd.f32 %v5746_v59, %v1141_v58 }
 0x706   : > { %4443 = vrot.lane.b32.xlu0 %v5781_v11, %s5148_s20 }
 0x707   : > { %v1153_v3 = vpack.c.bf16 %v1146_v2, %v1145_v63  ;;  %v1735_v2 = vld [vmem:[#allocation2 + $0x43] sm:$0xff] }
 0x709   : > { %4063 = vmatmul.msk.bf16.vlgmr.msra.gmra.mxu2 %vm286_vm1, %v1153_v3  ;;  %v1736_v3 = vld [vmem:[#allocation2 + $0x4b] sm:$0xff] }
 0x70a   : > { %v4482_v6 = vpack.i.bf16 %v1736_v3, %v1735_v2 }
 0x70c   : > { %4478 = vrot.lane.b32.xlu1 %v4477_v38, %s5137_s23  ;;  %4483 = vrot.lane.b32.xlu2 %v4482_v6, %s5138_s27  ;;  %v1857_v6 = vld [vmem:[#allocation2 + $0xb6] sm:$0xff] }
 0x714   : > { %4488 = vrot.lane.b32.xlu1 %v4472_v18, %s5139_s28  ;;  %v1352_v18 = vld [vmem:[%s5541_s30 + $0x110] sm:$0xff] }
 0x715   : > { %v1375_v25 = vpack.c.bf16 %v1353_v44, %v1352_v18  ;;  %v1864_v18 = vld [vmem:[#allocation2 + $0xee] sm:$0xff] }
 0x716   : > { %v1083_v56 = vpop.xlane.xlu1 %1082 }
 0x717   : > { %v1089_v4 = vmul.f32 %v1083_v56, %v5266_v31  ;;  %4108 = vmatmul.msk.bf16.gmra.mxu3 %vm286_vm1, %v1375_v25 }
 0x719   : > { %v1093_v15 = vadd.f32 1e-06, %v1089_v4 }
 0x71b   : > { %5052 = vrsqrt.f32 %v1093_v15  ;;  %vm1121_vm11 = vweird.f32 %v1093_v15 }
 0x71e   : > { %v1086_v43 = vpop.xlane.xlu0 %1085 }
 0x71f   : > { %v1090_v13 = vmul.f32 %v1086_v43, %v5266_v31 }
 0x721   : > { %v5053_v26 = vpop.eup %5052  ;;  %v1094_v27 = vadd.f32 1e-06, %v1090_v13  ;;  %v1845_v13 = vld [vmem:[#allocation2 + $0x56] sm:$0xff] }
 0x722   : > { %v1116_v30 = vmul.f32 %v5053_v26, %v1093_v15  ;;  %vm1122_vm10 = vweird.f32 %v5053_v26  ;;  %v1722_v15 = vld [vmem:[#allocation2 + $0xfa] sm:$0xff]  ;;  %v3095_v20 = vpack.c.bf16 %v1846_v16, %v1845_v13 }
 0x723   : > { %5054 = vrsqrt.f32 %v1094_v27  ;;  %vm1123_vm12 = vmor %vm1121_vm11, %vm1122_vm10  ;;  %vm1131_vm14 = vweird.f32 %v1094_v27 }
 0x724   : > { %v1117_v35 = vmul.f32 %v5053_v26, %v1116_v30  ;;  %v1850_v30 = vld [vmem:[#allocation2 + $0x7e] sm:$0xff] }
 0x726   : > { %v1118_v36 = vmul.f32 0.5, %v1117_v35  ;;  %v3099_v35 = vpack.c.bf16 %v1850_v30, %v1849_v22 }
 0x728   : > { %v1119_v55 = vsub.f32 1.5, %v1118_v36  ;;  %v1851_v36 = vld [vmem:[#allocation2 + $0x86] sm:$0xff] }
 0x729   : > { %v5055_v41 = vpop.eup %5054 }
 0x72a   : > { %v1120_v46 = vmul.f32 %v5053_v26, %v1119_v55  ;;  %v1126_v14 = vmul.f32 %v5055_v41, %v1094_v27  ;;  %vm1132_vm13 = vweird.f32 %v5055_v41  ;;  %v1852_v55 = vld [vmem:[#allocation2 + $0x8e] sm:$0xff] }
 0x72b   : > { %vm1133_vm15 = vmor %vm1131_vm14, %vm1132_vm13  ;;  %v3101_v37 = vpack.c.bf16 %v1852_v55, %v1851_v36 }
 0x72c   : > { %v1127_v23 = vmul.f32 %v5055_v41, %v1126_v14  ;;  %v1124_v29 = vsel %vm1123_vm12, %v5053_v26, %v1120_v46  ;;  %v1848_v26 = vld [vmem:[#allocation2 + $0x6e] sm:$0xff]  ;;  %v1854_v46 = vld [vmem:[#allocation2 + $0x9e] sm:$0xff] }
 0x72d   : > { %v1137_v40 = vmul.f32 %v1124_v29, %v5677_v12  ;;  %v3097_v27 = vpack.c.bf16 %v1848_v26, %v1847_v1  ;;  %v4209_v14 = vld [vmem:[%s6996_s2 + $0x48] sm:$0xff]  ;;  %v3103_v29 = vpack.c.bf16 %v1854_v46, %v1853_v42 }
 0x72e   : > { %v1128_v17 = vmul.f32 0.5, %v1127_v23  ;;  %v4971_v23 = vld [vmem:[%s6997_s3 + $0x46] ss:$0 sm:$0xff] }
 0x72f   : > { %v1142_v63 = vmul.f32 %v5736_v24, %v1137_v40  ;;  %v1859_v26 = vld [vmem:[#allocation2 + $0xc6] sm:$0xff] }
 0x730   : > { %v1129_v50 = vsub.f32 1.5, %v1128_v17 }
 0x731   : > { %v1147_v56 = vadd.f32 %v5746_v59, %v1142_v63 }
 0x732   : > { %v1130_v48 = vmul.f32 %v5055_v41, %v1129_v50 }
 0x734   : > { %v1134_v58 = vsel %vm1133_vm15, %v5055_v41, %v1130_v48  ;;  %v4210_v41 = vld [vmem:[%s6996_s2 + $0x50] sm:$0xff] }
 0x735   : > { %v1138_v62 = vmul.f32 %v1134_v58, %v5689_v51  ;;  %v5795_v51 = vld [vmem:[%s6996_s2 + $0xf8] sm:$0xff]  ;;  %1277 = vmatpush.bf16.msra.mxu1 %v4210_v41  ;;  %v1856_v58 = vld [vmem:[#allocation2 + $0xae] sm:$0xff] }
 0x736   : > { %4244 = vmatpush.bf16.msrb.mxu2 %v5795_v51 }
 0x737   : > { %v1143_v12 = vmul.f32 %v5736_v24, %v1138_v62  ;;  %v5799_v24 = vpack.i.bf16 %v1722_v15, %v1721_v32 }
 0x739   : > { %v1148_v4 = vadd.f32 %v5746_v59, %v1143_v12  ;;  %4458 = vrot.lane.b32.xlu0 %v5799_v24, %s5148_s20  ;;  %v1773_v59 = vld [vmem:[#allocation2 + $0x54] sm:$0xff]  ;;  %1278 = vmatpush.bf16.msra.mxu1 %v4209_v14  ;;  %v3105_v12 = vpack.c.bf16 %v1856_v58, %v1855_v60 }
 0x73a   : > { %v5804_v43 = vpack.i.bf16 %v1774_v9, %v1773_v59 }
 0x73b   : > { %v1154_v7 = vpack.c.bf16 %v1148_v4, %v1147_v56 }
 0x73d   : > { %4064 = vmatmul.msk.bf16.gmra.mxu2 %vm286_vm1, %v1154_v7  ;;  %1448 = vmatpush.bf16.msrb.mxu1 %v5535_v34  ;;  %v1858_v7 = vld [vmem:[#allocation2 + $0xbe] sm:$0xff] }
 0x73e   : > { %v3107_v13 = vpack.c.bf16 %v1858_v7, %v1857_v6  ;;  %v1867_v6 = vld [vmem:[#allocation2 + $0x106] sm:$0xff]  ;;  %v1868_v7 = vld [vmem:[#allocation2 + $0x10e] sm:$0xff] }
 0x741   : > { %4493 = vrot.lane.b32.xlu0 %v5804_v43, %s5133_s13  ;;  %1449 = vmatpush.bf16.msrb.mxu1 %v5546_v57 }
 0x74d   : > { %4148 = vmatmul.msk.bf16.vlgmr.msrb.gmra.mxu2 %vm986_vm2, %v3095_v20 }
 0x75d   : > { %4149 = vmatmul.msk.bf16.gmra.mxu2 %vm986_vm2, %v3097_v27  ;;  %v1860_v27 = vld [vmem:[#allocation2 + $0xce] sm:$0xff] }
 0x75e   : > { %v3109_v22 = vpack.c.bf16 %v1860_v27, %v1859_v26  ;;  %v1323_v26 = vld [vmem:[%s5541_s30 + $0x28] sm:$0xff] }
 0x76d   : > { %4150 = vmatmul.msk.bf16.gmra.mxu2 %vm986_vm2, %v3099_v35 }
 0x77d   : > { %4151 = vmatmul.msk.bf16.gmra.mxu2 %vm986_vm2, %v3101_v37  ;;  %v1861_v37 = vld [vmem:[#allocation2 + $0xd6] sm:$0xff] }
 0x77e   : > { %v3111_v14 = vpack.c.bf16 %v1862_v19, %v1861_v37 }
 0x78c   : > { %v1184_v17 = vpop.f32.mrf.mxu2 }
 0x78d   : > { %v1185_v50 = vadd.f32 %v4971_v23, %v1184_v17  ;;  %4152 = vmatmul.msk.bf16.gmra.mxu2 %vm986_vm2, %v3103_v29 }
 0x78f   : > { %v1198_v0 = vmul.f32 0.044715, %v1185_v50  ;;  %v1194_v15 = vmul.f32 0.5, %v1185_v50 }
 0x791   : > { %v1202_v52 = vmul.f32 %v1198_v0, %v1185_v50 }
 0x793   : > { %v1206_v53 = vmul.f32 %v1202_v52, %v1185_v50 }
 0x794   : > { %v1186_v40 = vpop.f32.mrf.mxu2 }
 0x795   : > { %v1210_v48 = vadd.f32 %v1206_v53, %v1185_v50  ;;  %v1187_v38 = vadd.f32 %v4971_v23, %v1186_v40  ;;  %v1863_v40 = vld [vmem:[#allocation2 + $0xe6] sm:$0xff] }
 0x797   : > { %v1199_v62 = vmul.f32 0.044715, %v1187_v38  ;;  %v1214_v34 = vmul.f32 0.7978846, %v1210_v48  ;;  %v1195_v59 = vmul.f32 0.5, %v1187_v38  ;;  %v3113_v48 = vpack.c.bf16 %v1864_v18, %v1863_v40  ;;  %v5869_v18 = vpop.permute.xlu2 %4348 }
 0x799   : > { %v1203_v63 = vmul.f32 %v1199_v62, %v1187_v38  ;;  %5056 = vtanh.f32 %v1214_v34 }
 0x79b   : > { %v1207_v2 = vmul.f32 %v1203_v63, %v1187_v38 }
 0x79d   : > { %v1211_v3 = vadd.f32 %v1207_v2, %v1187_v38  ;;  %4153 = vmatmul.msk.bf16.gmra.mxu2 %vm986_vm2, %v3105_v12  ;;  %v1865_v12 = vld [vmem:[#allocation2 + $0xf6] sm:$0xff]  ;;  %v1866_v2 = vld [vmem:[#allocation2 + $0xfe] sm:$0xff] }
 0x79f   : > { %v1215_v57 = vmul.f32 0.7978846, %v1211_v3  ;;  %v5057_v56 = vpop.eup %5056  ;;  %v3115_v3 = vpack.c.bf16 %v1866_v2, %v1865_v12 }
 0x7a0   : > { %v1222_v4 = vadd.f32 1.0, %v5057_v56  ;;  %v1319_v56 = vld [vmem:[%s5541_s30 + $0x8] sm:$0xff] }
 0x7a1   : > { %5058 = vtanh.f32 %v1215_v57  ;;  %v1318_v57 = vld [vmem:[%s5541_s30] sm:$0xff] }
 0x7a2   : > { %v1226_v16 = vmul.f32 %v1222_v4, %v1194_v15  ;;  %v1358_v4 = vpack.c.bf16 %v1319_v56, %v1318_v57  ;;  %v1795_v15 = vld [vmem:[#allocation2 + $0x104] sm:$0xff] }
 0x7a7   : > { %v5059_v32 = vpop.eup %5058 }
 0x7a8   : > { %v1223_v9 = vadd.f32 1.0, %v5059_v32  ;;  %v3117_v32 = vpack.c.bf16 %v1868_v7, %v1867_v6 }
 0x7aa   : > { %v1227_v20 = vmul.f32 %v1223_v9, %v1195_v59  ;;  %v1320_v59 = vld [vmem:[%s5541_s30 + $0x10] sm:$0xff]  ;;  %v1321_v9 = vld [vmem:[%s5541_s30 + $0x18] sm:$0xff] }
 0x7ac   : > { %v1238_v1 = vpack.c.bf16 %v1227_v20, %v1226_v16  ;;  %v1359_v20 = vpack.c.bf16 %v1321_v9, %v1320_v59 }
 0x7ad   : > { %4154 = vmatmul.msk.bf16.gmra.mxu2 %vm986_vm2, %v3107_v13  ;;  %v1796_v13 = vld [vmem:[#allocation2 + $0x10c] sm:$0xff] }
 0x7ae   : > { %4081 = vmatmul.msk.bf16.vlgmr.msra.gmra.mxu1 %vm1264_vm3, %v1238_v1  ;;  %v5846_v16 = vpack.i.bf16 %v1796_v13, %v1795_v15  ;;  %v1322_v1 = vld [vmem:[%s5541_s30 + $0x20] sm:$0xff] }
 0x7af   : > { %v1360_v27 = vpack.c.bf16 %v1323_v26, %v1322_v1  ;;  %v5883_v1 = vpop.permute.xlu1 %4338 }
 0x7bd   : > { %4155 = vmatmul.msk.bf16.gmra.mxu2 %vm986_vm2, %v3109_v22  ;;  %v1536_v22 = vpop.f32.mrf.mxu3 }
 0x7c0   : > { %v1189_v30 = vpop.f32.mrf.mxu2 }
 0x7c1   : > { %v1190_v35 = vadd.f32 %v4971_v23, %v1189_v30  ;;  %v1575_v30 = vmax.f32 %v1536_v22, 0.0 }
 0x7c3   : > { %v1200_v36 = vmul.f32 0.044715, %v1190_v35  ;;  %v1196_v25 = vmul.f32 0.5, %v1190_v35  ;;  %1617 = vst.msk [vmem:[#allocation2 + $0x123] sm:$0xff] %vm986_vm2, %v1575_v30 }
 0x7c5   : > { %v1204_v55 = vmul.f32 %v1200_v36, %v1190_v35  ;;  %v1538_v36 = vpop.f32.mrf.mxu3 }
 0x7c6   : > { %v1576_v37 = vmax.f32 %v1538_v36, 0.0 }
 0x7c7   : > { %v1208_v39 = vmul.f32 %v1204_v55, %v1190_v35  ;;  %v1869_v55 = vld [vmem:[#allocation2 + $0x116] sm:$0xff] }
 0x7c8   : > { %v1191_v41 = vpop.f32.mrf.mxu2  ;;  %1618 = vst.msk [vmem:[#allocation2 + $0x12b] sm:$0xff] %vm986_vm2, %v1576_v37 }
 0x7c9   : > { %v1192_v42 = vadd.f32 %v4971_v23, %v1191_v41  ;;  %v1212_v46 = vadd.f32 %v1208_v39, %v1190_v35 }
 0x7ca   : > { %v1870_v19 = vld [vmem:[#allocation2 + $0x11e] sm:$0xff] }
 0x7cb   : > { %v1201_v29 = vmul.f32 0.044715, %v1192_v42  ;;  %v1216_v50 = vmul.f32 0.7978846, %v1212_v46  ;;  %v1197_v60 = vmul.f32 0.5, %v1192_v42  ;;  %v3119_v39 = vpack.c.bf16 %v1870_v19, %v1869_v55 }
 0x7cd   : > { %v1205_v17 = vmul.f32 %v1201_v29, %v1192_v42  ;;  %4156 = vmatmul.msk.bf16.gmra.mxu2 %vm986_vm2, %v3111_v14  ;;  %5060 = vtanh.f32 %v1216_v50 }
 0x7cf   : > { %v1209_v0 = vmul.f32 %v1205_v17, %v1192_v42  ;;  %v1799_v31 = vld [vmem:[#allocation2 + $0x124] sm:$0xff] }
 0x7d0   : > { %v5853_v35 = vpop.f32.mrf.mxu2 }
 0x7d1   : > { %v1213_v52 = vadd.f32 %v1209_v0, %v1192_v42  ;;  %7017 = vst [vmem:[#allocation7_spill] sm:$0xff] %v5853_v35  ;;  %v4972_v42 = vld [vmem:[%s6997_s3 + $0x47] ss:$0 sm:$0xff] }
 0x7d3   : > { %v1217_v53 = vmul.f32 0.7978846, %v1213_v52  ;;  %v5061_v44 = vpop.eup %5060 }
 0x7d4   : > { %v1224_v38 = vadd.f32 1.0, %v5061_v44 }
 0x7d5   : > { %5062 = vtanh.f32 %v1217_v53 }
 0x7d6   : > { %v1228_v62 = vmul.f32 %v1224_v38, %v1196_v25  ;;  %v5872_v38 = vpop.permute.xlu2 %4363 }
 0x7d7   : > { %7020 = vst [vmem:[#allocation10_spill] sm:$0xff] %v5872_v38 }
 0x7d8   : > { %v5857_v41 = vpop.f32.mrf.mxu2 }
 0x7d9   : > { %7018 = vst [vmem:[#allocation8_spill] sm:$0xff] %v5857_v41  ;;  %v1782_v41 = vld [vmem:[#allocation2 + $0x9c] sm:$0xff] }
 0x7db   : > { %v5063_v23 = vpop.eup %5062 }
 0x7dc   : > { %v1225_v58 = vadd.f32 1.0, %v5063_v23 }
 0x7dd   : > { %4157 = vmatmul.msk.bf16.gmra.mxu2 %vm986_vm2, %v3113_v48 }
 0x7de   : > { %v1229_v34 = vmul.f32 %v1225_v58, %v1197_v60  ;;  %v5877_v56 = vpop.permute.xlu2 %4378 }
 0x7df   : > { %7021 = vst [vmem:[#allocation11_spill] sm:$0xff] %v5877_v56 }
 0x7e0   : > { %v1239_v63 = vpack.c.bf16 %v1229_v34, %v1228_v62 }
 0x7e2   : > { %4082 = vmatmul.msk.bf16.gmra.mxu1 %vm1264_vm3, %v1239_v63 }
 0x7e6   : > { %v5885_v26 = vpop.permute.xlu2 %4393 }
 0x7ed   : > { %4158 = vmatmul.msk.bf16.gmra.mxu2 %vm986_vm2, %v3115_v3 }
 0x7f2   : > { %4091 = vmatmul.msk.bf16.vlgmr.msrb.gmra.mxu1 %vm286_vm1, %v1358_v4 }
 0x7fd   : > { %4159 = vmatmul.msk.bf16.gmra.mxu2 %vm986_vm2, %v3117_v32 }
 0x802   : > { %4092 = vmatmul.msk.bf16.gmra.mxu1 %vm286_vm1, %v1359_v20 }
 0x80d   : > { %4160 = vmatmul.msk.bf16.gmra.mxu2 %vm986_vm2, %v3119_v39 }
 0x812   : > { %4093 = vmatmul.msk.bf16.gmra.mxu1 %vm286_vm1, %v1360_v27  ;;  %v5889_v27 = vpop.permute.xlu0 %4333 }
 0x82b   : > { %v1280_v46 = vpop.f32.mrf.mxu1 }
 0x82c   : > { %v1287_v14 = vadd.f32 %v1280_v46, %v5606_v49  ;;  %v5895_v46 = vpop.permute.xlu1 %4353 }
 0x82e   : > { %v5864_v29 = vadd.f32 %v4972_v42, %v1287_v14  ;;  %v5897_v14 = vpop.permute.xlu2 %4418 }
 0x830   : > { %7019 = vst [vmem:[#allocation9_spill] sm:$0xff] %v5864_v29  ;;  %v1294_v17 = vsel %vm1293_vm4, %v5864_v29, 0.0 }
 0x831   : > { %1295 = vadd.xlane.f32.xlu2 %v1294_v17 }
 0x833   : > { %v1282_v50 = vpop.f32.mrf.mxu1 }
 0x85f   : > { %v1284_v0 = vpop.f32.mrf.mxu1 }
 0x867   : > { %v1285_v52 = vpop.f32.mrf.mxu1 }
 0x868   : > { %v5899_v52 = vpop.permute.xlu0 %4343 }
 0x86f   : > { %v1451_v53 = vpop.f32.mrf.mxu1 }
 0x870   : > { %v1541_v40 = vmax.f32 %v1451_v53, 0.0 }
 0x872   : > { %1583 = vst.msk [vmem:[#allocation2 + $0x13] sm:$0xff] %vm986_vm2, %v1541_v40 }
 0x877   : > { %v1453_v44 = vpop.f32.mrf.mxu1 }
 0x878   : > { %v1542_v48 = vmax.f32 %v1453_v44, 0.0 }
 0x879   : > { %v1693_v25 = vld [vmem:[#allocation2 + $0x12] sm:$0xff] }
 0x87a   : > { %1584 = vst.msk [vmem:[#allocation2 + $0x1b] sm:$0xff] %vm986_vm2, %v1542_v48  ;;  %v1657_v58 = vld [vmem:[#allocation2 + $0x11] sm:$0xff] }
 0x87b   : > { %v1729_v57 = vld [vmem:[#allocation2 + $0x13] sm:$0xff] }
 0x87f   : > { %v1456_v49 = vpop.f32.mrf.mxu1 }
 0x880   : > { %v1543_v23 = vmax.f32 %v1456_v49, 0.0 }
 0x881   : > { %v1694_v60 = vld [vmem:[#allocation2 + $0x1a] sm:$0xff] }
 0x882   : > { %v1658_v62 = vld [vmem:[#allocation2 + $0x19] sm:$0xff]  ;;  %1585 = vst.msk [vmem:[#allocation2 + $0x23] sm:$0xff] %vm986_vm2, %v1543_v23  ;;  %v4507_v34 = vpack.i.bf16 %v1694_v60, %v1693_v25  ;;  %v5904_v25 = vpop.permute.xlu2 %4433 }
 0x883   : > { %v4497_v63 = vpack.i.bf16 %v1658_v62, %v1657_v58  ;;  %v1730_v2 = vld [vmem:[#allocation2 + $0x1b] sm:$0xff]  ;;  %7022 = vst [vmem:[#allocation12_spill] sm:$0xff] %v5904_v25  ;;  %v5906_v58 = vpop.permute.xlu1 %4368 }
 0x884   : > { %4508 = vrot.lane.b32.xlu0 %v4507_v34, %s5142_s14  ;;  %v4512_v4 = vpack.i.bf16 %v1730_v2, %v1729_v57  ;;  %v1765_v15 = vld [vmem:[#allocation2 + $0x14] sm:$0xff]  ;;  %7023 = vst [vmem:[#allocation13_spill] sm:$0xff] %v5906_v58  ;;  %v5908_v2 = vpop.permute.xlu0 %4358 }
 0x885   : > { %4498 = vrot.lane.b32.xlu2 %v4497_v63, %s5145_s29 }
 0x887   : > { %v1458_v12 = vpop.f32.mrf.mxu1 }
 0x888   : > { %v1544_v3 = vmax.f32 %v1458_v12, 0.0 }
 0x889   : > { %v1766_v7 = vld [vmem:[#allocation2 + $0x1c] sm:$0xff] }
 0x88a   : > { %1586 = vst.msk [vmem:[#allocation2 + $0x2b] sm:$0xff] %vm986_vm2, %v1544_v3  ;;  %v1659_v59 = vld [vmem:[#allocation2 + $0x21] sm:$0xff]  ;;  %v4517_v13 = vpack.i.bf16 %v1766_v7, %v1765_v15 }
 0x88b   : > { %v1695_v55 = vld [vmem:[#allocation2 + $0x22] sm:$0xff]  ;;  %v5915_v15 = vpop.permute.xlu1 %4383 }
 0x88c   : > { %4513 = vrot.lane.b32.xlu0 %v4512_v4, %s5138_s27  ;;  %v1731_v0 = vld [vmem:[#allocation2 + $0x23] sm:$0xff]  ;;  %v5913_v4 = vpop.permute.xlu2 %4448  ;;  %7025 = vst [vmem:[#allocation15_spill] sm:$0xff] %v5915_v15  ;;  %v1800_v15 = vld [vmem:[#allocation2 + $0x12c] sm:$0xff] }
 0x88d   : > { %4503 = vrot.lane.b32.xlu2 %v4507_v34, %s5148_s20  ;;  %v1664_v34 = vld [vmem:[#allocation2 + $0x49] sm:$0xff]  ;;  %7024 = vst [vmem:[#allocation14_spill] sm:$0xff] %v5913_v4  ;;  %v4752_v38 = vpack.i.bf16 %v1800_v15, %v1799_v31 }
 0x88f   : > { %v1461_v6 = vpop.f32.mrf.mxu1 }
 0x890   : > { %v1545_v32 = vmax.f32 %v1461_v6, 0.0 }
 0x891   : > { %v1660_v9 = vld [vmem:[#allocation2 + $0x29] sm:$0xff] }
 0x892   : > { %1587 = vst.msk [vmem:[#allocation2 + $0x33] sm:$0xff] %vm986_vm2, %v1545_v32  ;;  %v4522_v20 = vpack.i.bf16 %v1660_v9, %v1659_v59  ;;  %v1696_v30 = vld [vmem:[#allocation2 + $0x2a] sm:$0xff] }
 0x893   : > { %v1803_v37 = vld [vmem:[#allocation2 + $0x25] sm:$0xff]  ;;  %v4532_v39 = vpack.i.bf16 %v1696_v30, %v1695_v55  ;;  %v1737_v30 = vld [vmem:[#allocation2 + $0x53] sm:$0xff] }
 0x894   : > { %4523 = vrot.lane.b32.xlu1 %v4522_v20, %s5145_s29  ;;  %v1732_v17 = vld [vmem:[#allocation2 + $0x2b] sm:$0xff]  ;;  %v5922_v55 = vpop.permute.xlu2 %4463 }
 0x895   : > { %4518 = vrot.lane.b32.xlu2 %v4517_v13, %s5139_s28  ;;  %v1767_v53 = vld [vmem:[#allocation2 + $0x24] sm:$0xff]  ;;  %v4537_v48 = vpack.i.bf16 %v1732_v17, %v1731_v0  ;;  %v5919_v13 = vpop.permute.xlu0 %4373 }
 0x896   : > { %v1700_v32 = vld [vmem:[#allocation2 + $0x4a] sm:$0xff]  ;;  %7026 = vst [vmem:[#allocation16_spill] sm:$0xff] %v5919_v13  ;;  %v1810_v0 = vld [vmem:[#allocation2 + $0x5d] sm:$0xff] }
 0x897   : > { %v1463_v22 = vpop.f32.mrf.mxu1  ;;  %v5067_v13 = vld [vmem:[#allocation2 + $0x9a] sm:$0xff] }
 0x898   : > { %v1546_v36 = vmax.f32 %v1463_v22, 0.0 }
 0x899   : > { %v1804_v19 = vld [vmem:[#allocation2 + $0x2d] sm:$0xff] }
 0x89a   : > { %1588 = vst.msk [vmem:[#allocation2 + $0x3b] sm:$0xff] %vm986_vm2, %v1546_v36  ;;  %v4547_v42 = vpack.i.bf16 %v1804_v19, %v1803_v37  ;;  %v1768_v50 = vld [vmem:[#allocation2 + $0x2c] sm:$0xff]  ;;  %v1738_v36 = vld [vmem:[#allocation2 + $0x5b] sm:$0xff] }
 0x89b   : > { %v1661_v40 = vld [vmem:[#allocation2 + $0x31] sm:$0xff]  ;;  %v4542_v49 = vpack.i.bf16 %v1768_v50, %v1767_v53  ;;  %v4602_v19 = vpack.i.bf16 %v1738_v36, %v1737_v30 }
 0x89c   : > { %4528 = vrot.lane.b32.xlu1 %v4532_v39, %s5148_s20  ;;  %4548 = vrot.lane.b32.xlu0 %v4547_v42, %s5137_s23  ;;  %v1697_v12 = vld [vmem:[#allocation2 + $0x32] sm:$0xff] }
 0x89d   : > { %4533 = vrot.lane.b32.xlu2 %v4532_v39, %s5142_s14  ;;  %v5924_v39 = vpop.permute.xlu1 %4398  ;;  %v5930_v42 = vpop.permute.xlu0 %4388  ;;  %v1809_v50 = vld [vmem:[#allocation2 + $0x55] sm:$0xff] }
 0x89e   : > { %v1733_v53 = vld [vmem:[#allocation2 + $0x33] sm:$0xff] }
 0x8a1   : > { %v1662_v44 = vld [vmem:[#allocation2 + $0x39] sm:$0xff]  ;;  %v1663_v60 = vld [vmem:[#allocation2 + $0x41] sm:$0xff] }
 0x8a2   : > { %v4557_v23 = vpack.i.bf16 %v1662_v44, %v1661_v40  ;;  %v1698_v62 = vld [vmem:[#allocation2 + $0x3a] sm:$0xff]  ;;  %v4562_v63 = vpack.i.bf16 %v1664_v34, %v1663_v60  ;;  %v1699_v57 = vld [vmem:[#allocation2 + $0x42] sm:$0xff]  ;;  %v4592_v44 = vpack.i.bf16 %v1810_v0, %v1809_v50  ;;  %v1776_v60 = vld [vmem:[#allocation2 + $0x6c] sm:$0xff] }
 0x8a3   : > { %v4567_v3 = vpack.i.bf16 %v1698_v62, %v1697_v12  ;;  %v1769_v6 = vld [vmem:[#allocation2 + $0x34] sm:$0xff]  ;;  %v1770_v7 = vld [vmem:[#allocation2 + $0x3c] sm:$0xff]  ;;  %v4572_v59 = vpack.i.bf16 %v1700_v32, %v1699_v57  ;;  %v1811_v62 = vld [vmem:[#allocation2 + $0x65] sm:$0xff] }
 0x8a4   : > { %4543 = vrot.lane.b32.xlu1 %v4542_v49, %s5133_s13  ;;  %4558 = vrot.lane.b32.xlu0 %v4557_v23, %s5145_s29  ;;  %v4582_v9 = vpack.i.bf16 %v1770_v7, %v1769_v6  ;;  %v1805_v20 = vld [vmem:[#allocation2 + $0x35] sm:$0xff]  ;;  %v1806_v22 = vld [vmem:[#allocation2 + $0x3d] sm:$0xff]  ;;  %v1812_v34 = vld [vmem:[#allocation2 + $0x6d] sm:$0xff] }
 0x8a5   : > { %4538 = vrot.lane.b32.xlu2 %v4537_v48, %s5138_s27  ;;  %v4587_v37 = vpack.i.bf16 %v1806_v22, %v1805_v20  ;;  %v1734_v17 = vld [vmem:[#allocation2 + $0x3b] sm:$0xff]  ;;  %v5932_v48 = vpop.permute.xlu2 %4473  ;;  %v1775_v23 = vld [vmem:[#allocation2 + $0x64] sm:$0xff]  ;;  %v1872_v32 = vld [vmem:[#allocation2 + $0x12e] sm:$0xff] }
 0x8a6   : > { %v4612_v40 = vpack.i.bf16 %v1734_v17, %v1733_v53  ;;  %v4617_v12 = vpack.i.bf16 %v1776_v60, %v1775_v23  ;;  %v1871_v7 = vld [vmem:[#allocation2 + $0x126] sm:$0xff]  ;;  %v1813_v17 = vld [vmem:[#allocation2 + $0x75] sm:$0xff]  ;;  %v1814_v50 = vld [vmem:[#allocation2 + $0x7d] sm:$0xff] }
 0x8a7   : > { %v1740_v20 = vld [vmem:[#allocation2 + $0x6b] sm:$0xff]  ;;  %v3121_v22 = vpack.c.bf16 %v1872_v32, %v1871_v7  ;;  %v1777_v0 = vld [vmem:[#allocation2 + $0x74] sm:$0xff]  ;;  %v1778_v53 = vld [vmem:[#allocation2 + $0x7c] sm:$0xff] }
 0x8a8   : > { %v1741_v60 = vld [vmem:[#allocation2 + $0x73] sm:$0xff] }
 0x8ac   : > { %4553 = vrot.lane.b32.xlu1 %v4542_v49, %s5139_s28  ;;  %4568 = vrot.lane.b32.xlu0 %v4567_v3, %s5148_s20  ;;  %v5939_v49 = vpop.f32.mrf.mxu2 }
 0x8ad   : > { %4563 = vrot.lane.b32.xlu2 %v4562_v63, %s5145_s29  ;;  %7027 = vst [vmem:[#allocation17_spill] sm:$0xff] %v5939_v49  ;;  %v5941_v63 = vpop.permute.xlu0 %4403  ;;  %v5949_v6 = vpop.permute.xlu2 %4483 }
 0x8b4   : > { %4578 = vrot.lane.b32.xlu1 %v4567_v3, %s5142_s14  ;;  %4583 = vrot.lane.b32.xlu0 %v4582_v9, %s5133_s13  ;;  %v4627_v3 = vpack.i.bf16 %v1812_v34, %v1811_v62  ;;  %v5951_v30 = vpop.f32.mrf.mxu2  ;;  %v1742_v62 = vld [vmem:[#allocation2 + $0x7b] sm:$0xff] }
 0x8b5   : > { %4573 = vrot.lane.b32.xlu2 %v4572_v59, %s5148_s20  ;;  %7028 = vst [vmem:[#allocation18_spill] sm:$0xff] %v5951_v30  ;;  %4161 = vmatmul.msk.bf16.gmra.mxu2 %vm986_vm2, %v3121_v22  ;;  %v4667_v7 = vpack.i.bf16 %v1742_v62, %v1741_v60  ;;  %v1780_v22 = vld [vmem:[#allocation2 + $0x8c] sm:$0xff]  ;;  %v1797_v62 = vld [vmem:[#allocation2 + $0x114] sm:$0xff]  ;;  %s206_s20 = scalar_lea.vmem [#allocation3], %s205_s8 }
 0x8b6   : > { %v1815_v60 = vld [vmem:[#allocation2 + $0x85] sm:$0xff]  ;;  %s3929_s22 = sshll.u32 %s206_s20, 4  ;;  %s3930_s22 = int_to_ptr.vmem [resolvable:$true] %s3929_s22 }
 0x8bc   : > { %4598 = vrot.lane.b32.xlu1 %v5707_v5, %s5142_s14  ;;  %4603 = vrot.lane.b32.xlu0 %v4602_v19, %s5138_s27  ;;  %v5937_v5 = vpop.permute.xlu1 %4408  ;;  %v5962_v19 = vpop.xlane.xlu2 %1295 }
 0x8bd   : > { %4588 = vrot.lane.b32.xlu2 %v4587_v37, %s5137_s23  ;;  %v5954_v37 = vpop.permute.xlu0 %4413  ;;  %7030 = vst [vmem:[#allocation20_spill] sm:$0xff] %v5962_v19 }
 0x8c4   : > { %4613 = vrot.lane.b32.xlu1 %v4612_v40, %s5138_s27  ;;  %4623 = vrot.lane.b32.xlu0 %v4582_v9, %s5139_s28  ;;  %v5947_v57 = vpop.permute.xlu1 %4423  ;;  %v1739_v9 = vld [vmem:[#allocation2 + $0x63] sm:$0xff]  ;;  %v4657_v40 = vpack.i.bf16 %v1814_v50, %v1813_v17  ;;  %v1760_v17 = vld [vmem:[#allocation2 + $0x10b] sm:$0xff] }
 0x8c5   : > { %4593 = vrot.lane.b32.xlu2 %v4592_v44, %s5137_s23  ;;  %v4637_v36 = vpack.i.bf16 %v1740_v20, %v1739_v9  ;;  %v4652_v44 = vpack.i.bf16 %v1778_v53, %v1777_v0  ;;  %v5964_v23 = vpop.permute.xlu0 %4428  ;;  %v1779_v20 = vld [vmem:[#allocation2 + $0x84] sm:$0xff] }
 0x8c6   : > { %7031 = vst [vmem:[#allocation21_spill] sm:$0xff] %v5964_v23  ;;  %v4687_v0 = vpack.i.bf16 %v1780_v22, %v1779_v20 }
 0x8cc   : > { %4618 = vrot.lane.b32.xlu1 %v4617_v12, %s5133_s13  ;;  %4628 = vrot.lane.b32.xlu0 %v4627_v3, %s5137_s23  ;;  %v4221_v3 = vld [vmem:[%s6996_s2 + $0xe8] sm:$0xff] }
 0x8cd   : > { %4608 = vrot.lane.b32.xlu2 %v5804_v43, %s5139_s28  ;;  %v5960_v43 = vpop.permute.xlu1 %4438  ;;  %v5979_v32 = vpop.permute.xlu0 %4443 }
 0x8ce   : > { %7029 = vst [vmem:[#allocation19_spill] sm:$0xff] %v5960_v43 }
 0x8cf   : > { %7033 = vst [vmem:[#allocation23_spill] sm:$0xff] %v5979_v32  ;;  %v5066_v32 = vld [vmem:[#allocation2 + $0x92] sm:$0xff] }
 0x8d0   : > { %v4762_v43 = vpack.i.bf16 %v5067_v13, %v5066_v32  ;;  %v1728_v32 = vld [vmem:[#allocation2 + $0x12a] sm:$0xff] }
 0x8d4   : > { %4638 = vrot.lane.b32.xlu1 %v4637_v36, %s5138_s27  ;;  %4643 = vrot.lane.b32.xlu0 %v4572_v59, %s5142_s14  ;;  %v1759_v36 = vld [vmem:[#allocation2 + $0x103] sm:$0xff] }
 0x8d5   : > { %4633 = vrot.lane.b32.xlu2 %v5721_v33, %s5142_s14  ;;  %v4222_v33 = vld [vmem:[%s6996_s2 + $0xf0] sm:$0xff]  ;;  %v5974_v34 = vpop.permute.xlu1 %4453  ;;  %v5996_v53 = vpop.permute.xlu0 %4458 }
 0x8d6   : > { %3234 = vmatpush.bf16.msrb.mxu0 %v4222_v33  ;;  %4236 = vmatpush.bf16.msra.mxu1 %v4222_v33  ;;  %7032 = vst [vmem:[#allocation22_spill] sm:$0xff] %v5974_v34  ;;  %v4406_v34 = vunpack.i.h.bf16 %v5941_v63 }
 0x8da   : > { %3235 = vmatpush.bf16.msrb.mxu0 %v4221_v3  ;;  %4237 = vmatpush.bf16.msra.mxu1 %v4221_v3  ;;  %v1798_v3 = vld [vmem:[#allocation2 + $0x11c] sm:$0xff] }
 0x8db   : > { %v4702_v20 = vpack.i.bf16 %v1798_v3, %v1797_v62  ;;  %v1834_v62 = vld [vmem:[#allocation2 + $0x11d] sm:$0xff] }
 0x8dc   : > { %4658 = vrot.lane.b32.xlu1 %v4657_v40, %s5137_s23  ;;  %4648 = vrot.lane.b32.xlu0 %v4617_v12, %s5139_s28  ;;  %v4220_v12 = vld [vmem:[%s6996_s2 + $0xe0] sm:$0xff]  ;;  %v4218_v40 = vld [vmem:[%s6996_s2 + $0xd0] sm:$0xff] }
 0x8dd   : > { %4653 = vrot.lane.b32.xlu2 %v4652_v44, %s5133_s13  ;;  %v5994_v50 = vpop.permute.xlu1 %4468 }
 0x8de   : > { %3236 = vmatpush.bf16.msrb.mxu0 %v4220_v12  ;;  %4238 = vmatpush.bf16.msra.mxu1 %v4220_v12  ;;  %v4217_v12 = vld [vmem:[%s6996_s2 + $0xc8] sm:$0xff] }
 0x8df   : > { %v5972_v59 = vpop.permute.xlu2 %4498 }
 0x8e4   : > { %4673 = vrot.lane.b32.xlu1 %v5771_v61, %s5142_s14  ;;  %4663 = vrot.lane.b32.xlu0 %v5731_v54, %s5142_s14  ;;  %v4219_v61 = vld [vmem:[%s6996_s2 + $0xd8] sm:$0xff]  ;;  %v4682_v54 = vpack.i.bf16 %v1760_v17, %v1759_v36  ;;  %v6013_v36 = vpop.permute.xlu0 %4493  ;;  %v4216_v17 = vld [vmem:[%s6996_s2 + $0xc0] sm:$0xff] }
 0x8e5   : > { %4668 = vrot.lane.b32.xlu2 %v4667_v7, %s5138_s27  ;;  %3237 = vmatpush.bf16.msrb.mxu0 %v4219_v61  ;;  %v1816_v7 = vld [vmem:[#allocation2 + $0x8d] sm:$0xff] }
 0x8e6   : > { %4239 = vmatpush.bf16.msra.mxu1 %v4219_v61  ;;  %v4697_v22 = vpack.i.bf16 %v1816_v7, %v1815_v60  ;;  %v1833_v60 = vld [vmem:[#allocation2 + $0x115] sm:$0xff] }
 0x8e7   : > { %v5989_v9 = vpop.permute.xlu2 %4503  ;;  %v4215_v7 = vld [vmem:[%s6996_s2 + $0xb8] sm:$0xff] }
 0x8e9   : > { %3238 = vmatpush.bf16.msrb.mxu0 %v4218_v40 }
 0x8ea   : > { %4240 = vmatpush.bf16.msra.mxu1 %v4218_v40  ;;  %v1744_v40 = vld [vmem:[#allocation2 + $0x8b] sm:$0xff] }
 0x8ec   : > { %4688 = vrot.lane.b32.xlu1 %v4687_v0, %s5133_s13  ;;  %4678 = vrot.lane.b32.xlu0 %v4652_v44, %s5139_s28  ;;  %v6009_v44 = vpop.permute.xlu1 %4478 }
 0x8ed   : > { %4683 = vrot.lane.b32.xlu2 %v4682_v54, %s5138_s27  ;;  %3239 = vmatpush.bf16.msrb.mxu0 %v4217_v12  ;;  %v1743_v54 = vld [vmem:[#allocation2 + $0x83] sm:$0xff] }
 0x8ee   : > { %4241 = vmatpush.bf16.msra.mxu1 %v4217_v12  ;;  %v4717_v3 = vpack.i.bf16 %v1744_v40, %v1743_v54  ;;  %v4707_v12 = vpack.i.bf16 %v1834_v62, %v1833_v60  ;;  %v1761_v54 = vld [vmem:[#allocation2 + $0x113] sm:$0xff]  ;;  %v1762_v40 = vld [vmem:[#allocation2 + $0x11b] sm:$0xff] }
 0x8ef   : > { %v6004_v33 = vpop.permute.xlu2 %4518  ;;  %v4732_v49 = vpack.i.bf16 %v1762_v40, %v1761_v54 }
 0x8f0   : > { %v4521_v13 = vunpack.i.h.bf16 %v6004_v33 }
 0x8f1   : > { %3240 = vmatpush.bf16.msrb.mxu0 %v4216_v17 }
 0x8f2   : > { %4242 = vmatpush.bf16.msra.mxu1 %v4216_v17 }
 0x8f4   : > { %4703 = vrot.lane.b32.xlu1 %v4702_v20, %s5133_s13  ;;  %4693 = vrot.lane.b32.xlu0 %v5846_v16, %s5139_s28  ;;  %v6029_v30 = vpop.permute.xlu1 %4488 }
 0x8f5   : > { %4698 = vrot.lane.b32.xlu2 %v4697_v22, %s5137_s23  ;;  %3241 = vmatpush.bf16.msrb.mxu0 %v4215_v7 }
 0x8f6   : > { %v4509_v22 = vpop.permute.xlu0 %4508  ;;  %4243 = vmatpush.bf16.msra.mxu1 %v4215_v7  ;;  %v1781_v7 = vld [vmem:[#allocation2 + $0x94] sm:$0xff] }
 0x8f7   : > { %v6020_v61 = vpop.permute.xlu2 %4533  ;;  %v4737_v29 = vpack.i.bf16 %v1782_v41, %v1781_v7  ;;  %v4405_v41 = vunpack.i.l.bf16 %v5941_v63  ;;  %v1836_v7 = vld [vmem:[#allocation2 + $0x12d] sm:$0xff]  ;;  %v4510_v19 = vunpack.i.l.bf16 %v4509_v22 }
 0x8fa   : > { %3340 = vmatpush.bf16.msrb.mxu1 %v5795_v51  ;;  %v4336_v51 = vunpack.i.h.bf16 %v5889_v27 }
 0x8fc   : > { %4718 = vrot.lane.b32.xlu1 %v4717_v3, %s5138_s27  ;;  %4708 = vrot.lane.b32.xlu0 %v4707_v12, %s5137_s23  ;;  %v1817_v3 = vld [vmem:[#allocation2 + $0x95] sm:$0xff]  ;;  %v1818_v12 = vld [vmem:[#allocation2 + $0x9d] sm:$0xff] }
 0x8fd   : > { %4713 = vrot.lane.b32.xlu2 %v5726_v45, %s5142_s14  ;;  %v4747_v35 = vpack.i.bf16 %v1818_v12, %v1817_v3  ;;  %v1835_v12 = vld [vmem:[#allocation2 + $0x125] sm:$0xff] }
 0x8fe   : > { %v4514_v62 = vpop.permute.xlu0 %4513  ;;  %v4757_v58 = vpack.i.bf16 %v1836_v7, %v1835_v12 }
 0x8ff   : > { %v6031_v17 = vpop.permute.xlu2 %4538  ;;  %v4516_v4 = vunpack.i.h.bf16 %v4514_v62  ;;  %v4515_v56 = vunpack.i.l.bf16 %v4514_v62 }
 0x904   : > { %4733 = vrot.lane.b32.xlu1 %v4732_v49, %s5138_s27  ;;  %4723 = vrot.lane.b32.xlu0 %v5773_v47, %s5142_s14  ;;  %v4335_v49 = vunpack.i.l.bf16 %v5889_v27  ;;  %v1619_v47 = vld [vmem:[#allocation2] sm:$0xff] }
 0x905   : > { %4728 = vrot.lane.b32.xlu2 %v4687_v0, %s5139_s28  ;;  %v1620_v0 = vld [vmem:[#allocation2 + $0x8] sm:$0xff] }
 0x906   : > { %v6038_v45 = vpop.permute.xlu1 %4523  ;;  %v2816_v27 = vsel %vm986_vm2, %v1620_v0, %v4336_v51  ;;  %v1746_v0 = vld [vmem:[#allocation2 + $0x9b] sm:$0xff] }
 0x907   : > { %v6040_v60 = vpop.permute.xlu2 %4563  ;;  %v2852_v63 = vsel %vm286_vm1, %v2816_v27, %v4406_v34  ;;  %v4520_v34 = vunpack.i.l.bf16 %v6004_v33 }
 0x90c   : > { %4748 = vrot.lane.b32.xlu1 %v4747_v35, %s5137_s23  ;;  %4738 = vrot.lane.b32.xlu0 %v4737_v29, %s5133_s13  ;;  %v2815_v35 = vsel %vm986_vm2, %v1619_v47, %v4335_v49  ;;  %v1745_v47 = vld [vmem:[#allocation2 + $0x93] sm:$0xff] }
 0x90d   : > { %4743 = vrot.lane.b32.xlu2 %v4702_v20, %s5139_s28  ;;  %v4511_v20 = vunpack.i.h.bf16 %v4509_v22  ;;  %v2851_v25 = vsel %vm286_vm1, %v2815_v35, %v4405_v41  ;;  %v4767_v35 = vpack.i.bf16 %v1746_v0, %v1745_v47  ;;  %v4540_v47 = vunpack.i.l.bf16 %v6031_v17 }
 0x90e   : > { %v6047_v54 = vpop.permute.xlu1 %4528  ;;  %v4549_v3 = vpop.permute.xlu0 %4548  ;;  %v2887_v23 = vsel %vm258_vm0, %v2851_v25, %v4510_v19 }
 0x90f   : > { %v6049_v40 = vpop.permute.xlu2 %4573  ;;  %v2888_v51 = vsel %vm258_vm0, %v2852_v63, %v4511_v20  ;;  %v2923_v22 = vsel %vm1264_vm3, %v2887_v23, %v4515_v56  ;;  %v4551_v56 = vunpack.i.h.bf16 %v4549_v3 }
 0x910   : > { %v2924_v62 = vsel %vm1264_vm3, %v2888_v51, %v4516_v4  ;;  %v4550_v4 = vunpack.i.l.bf16 %v4549_v3  ;;  %v2960_v23 = vsel %vm2959_vm5, %v2923_v22, %v4520_v34  ;;  %v1783_v22 = vld [vmem:[#allocation2 + $0xa4] sm:$0xff]  ;;  %v4500_v34 = vunpack.i.l.bf16 %v5972_v59 }
 0x911   : > { %v2961_v49 = vsel %vm2959_vm5, %v2924_v62, %v4521_v13  ;;  %v1784_v62 = vld [vmem:[#allocation2 + $0xac] sm:$0xff]  ;;  %v4501_v13 = vunpack.i.h.bf16 %v5972_v59 }
 0x914   : > { %4763 = vrot.lane.b32.xlu1 %v4762_v43, %s5142_s14  ;;  %4753 = vrot.lane.b32.xlu0 %v4752_v38, %s5133_s13 }
 0x915   : > { %4758 = vrot.lane.b32.xlu2 %v4757_v58, %s5137_s23  ;;  %v1727_v58 = vld [vmem:[#allocation2 + $0x122] sm:$0xff] }
 0x916   : > { %v4544_v31 = vpop.permute.xlu1 %4543  ;;  %v6068_v43 = vpop.permute.xlu0 %4558  ;;  %v4772_v12 = vpack.i.bf16 %v1728_v32, %v1727_v58  ;;  %v4536_v58 = vunpack.i.h.bf16 %v6020_v61  ;;  %v4535_v32 = vunpack.i.l.bf16 %v6020_v61 }
 0x917   : > { %v6066_v25 = vpop.permute.xlu2 %4588  ;;  %v4546_v15 = vunpack.i.h.bf16 %v4544_v31  ;;  %v4545_v19 = vunpack.i.l.bf16 %v4544_v31  ;;  %v1763_v31 = vld [vmem:[#allocation2 + $0x123] sm:$0xff] }
 0x919   : > { %v2997_v33 = vsel %vm2996_vm6, %v2960_v23, %v4545_v19  ;;  %v2998_v41 = vsel %vm2996_vm6, %v2961_v49, %v4546_v15  ;;  %v1764_v15 = vld [vmem:[#allocation2 + $0x12b] sm:$0xff]  ;;  %v4505_v19 = vunpack.i.l.bf16 %v5989_v9  ;;  %v1622_v23 = vld [vmem:[#allocation2 + $0x18] sm:$0xff]  ;;  %v4541_v49 = vunpack.i.h.bf16 %v6031_v17 }
 0x91a   : > { %v3034_v7 = vsel %vm3033_vm7, %v2997_v33, %v4550_v4  ;;  %v3035_v27 = vsel %vm3033_vm7, %v2998_v41, %v4551_v56  ;;  %v4787_v56 = vpack.i.bf16 %v1784_v62, %v1783_v22  ;;  %v1621_v4 = vld [vmem:[#allocation2 + $0x10] sm:$0xff]  ;;  %v4782_v0 = vpack.i.bf16 %v1764_v15, %v1763_v31 }
 0x91b   : > { %v3088_v20 = vpack.c.bf16 %v3035_v27, %v3034_v7  ;;  %v2817_v59 = vsel %vm986_vm2, %v1621_v4, %v4500_v34  ;;  %v2818_v33 = vsel %vm986_vm2, %v1622_v23, %v4501_v13  ;;  %v1838_v27 = vld [vmem:[#allocation2 + $0x13d] sm:$0xff]  ;;  %v1801_v17 = vld [vmem:[#allocation2 + $0x134] sm:$0xff]  ;;  %v1819_v4 = vld [vmem:[#allocation2 + $0xa5] sm:$0xff] }
 0x91c   : > { %4778 = vrot.lane.b32.xlu1 %v4737_v29, %s5139_s28  ;;  %4768 = vrot.lane.b32.xlu0 %v4767_v35, %s5138_s27  ;;  %v4506_v29 = vunpack.i.h.bf16 %v5989_v9  ;;  %v1837_v9 = vld [vmem:[#allocation2 + $0x135] sm:$0xff]  ;;  %v2853_v41 = vsel %vm286_vm1, %v2817_v59, %v4505_v19  ;;  %v1820_v23 = vld [vmem:[#allocation2 + $0xad] sm:$0xff] }
 0x91d   : > { %4773 = vrot.lane.b32.xlu2 %v4772_v12, %s5142_s14  ;;  %3242 = vmatmul.bf16.vlgmr.msrb.gmra.mxu0 %v3088_v20  ;;  %v1802_v35 = vld [vmem:[#allocation2 + $0x13c] sm:$0xff]  ;;  %v2889_v22 = vsel %vm258_vm0, %v2853_v41, %v4535_v32 }
 0x91e   : > { %v4554_v3 = vpop.permute.xlu1 %4553  ;;  %v6081_v51 = vpop.permute.xlu0 %4568  ;;  %v2854_v61 = vsel %vm286_vm1, %v2818_v33, %v4506_v29  ;;  %v2925_v13 = vsel %vm1264_vm3, %v2889_v22, %v4540_v47  ;;  %v4802_v19 = vpack.i.bf16 %v1802_v35, %v1801_v17  ;;  %v1748_v17 = vld [vmem:[#allocation2 + $0xab] sm:$0xff]  ;;  %v4526_v35 = vunpack.i.h.bf16 %v6038_v45 }
 0x91f   : > { %v6079_v63 = vpop.permute.xlu2 %4593  ;;  %v4556_v12 = vunpack.i.h.bf16 %v4554_v3  ;;  %v4555_v7 = vunpack.i.l.bf16 %v4554_v3  ;;  %v2890_v20 = vsel %vm258_vm0, %v2854_v61, %v4536_v58  ;;  %v4807_v3 = vpack.i.bf16 %v1838_v27, %v1837_v9  ;;  %v1747_v27 = vld [vmem:[#allocation2 + $0xa3] sm:$0xff] }
 0x920   : > { %v2926_v34 = vsel %vm1264_vm3, %v2890_v20, %v4541_v49  ;;  %v4590_v58 = vunpack.i.l.bf16 %v6066_v25  ;;  %v4797_v49 = vpack.i.bf16 %v1820_v23, %v1819_v4  ;;  %v4525_v20 = vunpack.i.l.bf16 %v6038_v45 }
 0x921   : > { %v2963_v32 = vsel %vm2959_vm5, %v2926_v34, %v4556_v12  ;;  %v2962_v59 = vsel %vm2959_vm5, %v2925_v13, %v4555_v7  ;;  %v4817_v22 = vpack.i.bf16 %v1748_v17, %v1747_v27  ;;  %v4531_v13 = vunpack.i.h.bf16 %v6047_v54 }
 0x922   : > { %v4530_v34 = vunpack.i.l.bf16 %v6047_v54  ;;  %v1821_v54 = vld [vmem:[#allocation2 + $0xb5] sm:$0xff]  ;;  %v4475_v27 = vunpack.i.l.bf16 %v5932_v48 }
 0x924   : > { %4793 = vrot.lane.b32.xlu1 %v4752_v38, %s5139_s28  ;;  %4783 = vrot.lane.b32.xlu0 %v4782_v0, %s5138_s27  ;;  %v4591_v0 = vunpack.i.h.bf16 %v6066_v25 }
 0x925   : > { %4788 = vrot.lane.b32.xlu2 %v4787_v56, %s5133_s13 }
 0x926   : > { %v4579_v62 = vpop.permute.xlu1 %4578  ;;  %v4584_v31 = vpop.permute.xlu0 %4583 }
 0x927   : > { %v6100_v38 = vpop.permute.xlu2 %4608  ;;  %v4586_v15 = vunpack.i.h.bf16 %v4584_v31  ;;  %v4585_v29 = vunpack.i.l.bf16 %v4584_v31  ;;  %v4581_v31 = vunpack.i.h.bf16 %v4579_v62 }
 0x929   : > { %v2999_v33 = vsel %vm2996_vm6, %v2962_v59, %v4585_v29  ;;  %v3000_v47 = vsel %vm2996_vm6, %v2963_v32, %v4586_v15  ;;  %v4580_v15 = vunpack.i.l.bf16 %v4579_v62  ;;  %v1623_v29 = vld [vmem:[#allocation2 + $0x20] sm:$0xff] }
 0x92a   : > { %v3036_v41 = vsel %vm3033_vm7, %v2999_v33, %v4590_v58  ;;  %v3037_v9 = vsel %vm3033_vm7, %v3000_v47, %v4591_v0  ;;  %v2819_v45 = vsel %vm986_vm2, %v1623_v29, %v4525_v20  ;;  %v1822_v62 = vld [vmem:[#allocation2 + $0xbd] sm:$0xff] }
 0x92b   : > { %v3090_v61 = vpack.c.bf16 %v3037_v9, %v3036_v41  ;;  %v1785_v9 = vld [vmem:[#allocation2 + $0xb4] sm:$0xff]  ;;  %v4832_v20 = vpack.i.bf16 %v1822_v62, %v1821_v54  ;;  %v1788_v62 = vld [vmem:[#allocation2 + $0xcc] sm:$0xff] }
 0x92c   : > { %4808 = vrot.lane.b32.xlu1 %v4807_v3, %s5137_s23  ;;  %4798 = vrot.lane.b32.xlu0 %v4797_v49, %s5137_s23  ;;  %v1624_v3 = vld [vmem:[#allocation2 + $0x28] sm:$0xff] }
 0x92d   : > { %4803 = vrot.lane.b32.xlu2 %v4802_v19, %s5133_s13  ;;  %3247 = vmatmul.bf16.gmra.mxu0 %v3090_v61  ;;  %v4476_v19 = vunpack.i.h.bf16 %v5932_v48  ;;  %v2820_v4 = vsel %vm986_vm2, %v1624_v3, %v4526_v35  ;;  %v1786_v61 = vld [vmem:[#allocation2 + $0xbc] sm:$0xff] }
 0x92e   : > { %v6115_v25 = vpop.permute.xlu1 %4598  ;;  %v6119_v7 = vpop.permute.xlu0 %4603  ;;  %v2856_v58 = vsel %vm286_vm1, %v2820_v4, %v4531_v13  ;;  %v4480_v13 = vunpack.i.l.bf16 %v6009_v44 }
 0x92f   : > { %v6117_v12 = vpop.permute.xlu2 %4633 }
 0x934   : > { %4823 = vrot.lane.b32.xlu1 %v4787_v56, %s5139_s28  ;;  %4813 = vrot.lane.b32.xlu0 %v5754_v8, %s5142_s14  ;;  %v2855_v56 = vsel %vm286_vm1, %v2819_v45, %v4530_v34  ;;  %v2892_v8 = vsel %vm258_vm0, %v2856_v58, %v4581_v31 }
 0x935   : > { %4818 = vrot.lane.b32.xlu2 %v4817_v22, %s5138_s27  ;;  %v2891_v47 = vsel %vm258_vm0, %v2855_v56, %v4580_v15  ;;  %v4481_v22 = vunpack.i.h.bf16 %v6009_v44  ;;  %v4827_v15 = vpack.i.bf16 %v1786_v61, %v1785_v9  ;;  %v1749_v56 = vld [vmem:[#allocation2 + $0xb3] sm:$0xff]  ;;  %v1751_v9 = vld [vmem:[#allocation2 + $0xc3] sm:$0xff]  ;;  %v1752_v61 = vld [vmem:[#allocation2 + $0xcb] sm:$0xff] }
 0x936   : > { %v4614_v23 = vpop.permute.xlu1 %4613  ;;  %v4624_v33 = vpop.permute.xlu0 %4623 }
 0x937   : > { %v6132_v0 = vpop.permute.xlu2 %4653  ;;  %v4616_v32 = vunpack.i.h.bf16 %v4614_v23  ;;  %v4615_v59 = vunpack.i.l.bf16 %v4614_v23  ;;  %v4626_v49 = vunpack.i.h.bf16 %v4624_v33  ;;  %v4625_v41 = vunpack.i.l.bf16 %v4624_v33 }
 0x938   : > { %v4560_v33 = vunpack.i.l.bf16 %v6068_v43 }
 0x939   : > { %v2927_v17 = vsel %vm1264_vm3, %v2891_v47, %v4615_v59  ;;  %v2928_v35 = vsel %vm1264_vm3, %v2892_v8, %v4616_v32  ;;  %v4561_v59 = vunpack.i.h.bf16 %v6068_v43  ;;  %v4571_v8 = vunpack.i.h.bf16 %v6081_v51 }
 0x93a   : > { %v2965_v34 = vsel %vm2959_vm5, %v2928_v35, %v4626_v49  ;;  %v2964_v31 = vsel %vm2959_vm5, %v2927_v17, %v4625_v41  ;;  %v4570_v47 = vunpack.i.l.bf16 %v6081_v51  ;;  %v4486_v43 = vunpack.i.h.bf16 %v5949_v6  ;;  %v1625_v35 = vld [vmem:[#allocation2 + $0x30] sm:$0xff] }
 0x93b   : > { %v3001_v29 = vsel %vm2996_vm6, %v2964_v31, %v4475_v27  ;;  %v3002_v3 = vsel %vm2996_vm6, %v2965_v34, %v4476_v19  ;;  %v1787_v19 = vld [vmem:[#allocation2 + $0xc4] sm:$0xff]  ;;  %v4485_v17 = vunpack.i.l.bf16 %v5949_v6  ;;  %v2821_v51 = vsel %vm986_vm2, %v1625_v35, %v4560_v33 }
 0x93c   : > { %4838 = vrot.lane.b32.xlu1 %v5756_v10, %s5142_s14  ;;  %v3038_v48 = vsel %vm3033_vm7, %v3001_v29, %v4480_v13  ;;  %v3039_v45 = vsel %vm3033_vm7, %v3002_v3, %v4481_v22  ;;  %4828 = vrot.lane.b32.xlu0 %v4827_v15, %s5133_s13  ;;  %v1750_v10 = vld [vmem:[#allocation2 + $0xbb] sm:$0xff]  ;;  %v6159_v58 = vpack.i.bf16 %v1788_v62, %v1787_v19  ;;  %v1823_v27 = vld [vmem:[#allocation2 + $0xc5] sm:$0xff]  ;;  %v1824_v13 = vld [vmem:[#allocation2 + $0xcd] sm:$0xff]  ;;  %v4491_v29 = vunpack.i.h.bf16 %v6029_v30 }
 0x93d   : > { %4833 = vrot.lane.b32.xlu2 %v4832_v20, %s5137_s23  ;;  %v3092_v44 = vpack.c.bf16 %v3039_v45, %v3038_v48  ;;  %v4842_v32 = vpack.i.bf16 %v1750_v10, %v1749_v56  ;;  %v1626_v20 = vld [vmem:[#allocation2 + $0x38] sm:$0xff]  ;;  %v4490_v3 = vunpack.i.l.bf16 %v6029_v30  ;;  %v2857_v48 = vsel %vm286_vm1, %v2821_v51, %v4570_v47 }
 0x93e   : > { %v6153_v4 = vpop.permute.xlu1 %4618  ;;  %v6157_v54 = vpop.permute.xlu0 %4628  ;;  %v2822_v34 = vsel %vm986_vm2, %v1626_v20, %v4561_v59  ;;  %v4867_v19 = vpack.i.bf16 %v1752_v61, %v1751_v9  ;;  %v4857_v62 = vpack.i.bf16 %v1824_v13, %v1823_v27  ;;  %v4496_v56 = vunpack.i.h.bf16 %v6013_v36  ;;  %v1789_v13 = vld [vmem:[#allocation2 + $0xd4] sm:$0xff] }
 0x93f   : > { %v6155_v23 = vpop.permute.xlu2 %4668  ;;  %3252 = vmatmul.bf16.gmra.mxu0 %v3092_v44  ;;  %v2858_v45 = vsel %vm286_vm1, %v2822_v34, %v4571_v8  ;;  %v4495_v10 = vunpack.i.l.bf16 %v6013_v36  ;;  %v4596_v30 = vunpack.i.h.bf16 %v6079_v63  ;;  %v4595_v33 = vunpack.i.l.bf16 %v6079_v63  ;;  %v1825_v63 = vld [vmem:[#allocation2 + $0xd5] sm:$0xff] }
 0x940   : > { %v4566_v9 = vunpack.i.h.bf16 %v6040_v60  ;;  %v4565_v36 = vunpack.i.l.bf16 %v6040_v60  ;;  %v1790_v60 = vld [vmem:[#allocation2 + $0xdc] sm:$0xff]  ;;  %v4601_v34 = vunpack.i.h.bf16 %v6115_v25  ;;  %v4600_v51 = vunpack.i.l.bf16 %v6115_v25 }
 0x941   : > { %v4605_v25 = vunpack.i.l.bf16 %v6119_v7 }
 0x944   : > { %4853 = vrot.lane.b32.xlu1 %v6159_v58, %s5133_s13  ;;  %4843 = vrot.lane.b32.xlu0 %v4842_v32, %s5138_s27 }
 0x945   : > { %4848 = vrot.lane.b32.xlu2 %v4827_v15, %s5139_s28 }
 0x946   : > { %v6169_v49 = vpop.permute.xlu1 %4638  ;;  %v4644_v22 = vpop.permute.xlu0 %4643 }
 0x947   : > { %v6171_v41 = vpop.permute.xlu2 %4683  ;;  %v4646_v31 = vunpack.i.h.bf16 %v4644_v22  ;;  %v4645_v15 = vunpack.i.l.bf16 %v4644_v22  ;;  %v1826_v22 = vld [vmem:[#allocation2 + $0xdd] sm:$0xff] }
 0x949   : > { %v2893_v6 = vsel %vm258_vm0, %v2857_v48, %v4645_v15  ;;  %v2894_v44 = vsel %vm258_vm0, %v2858_v45, %v4646_v31 }
 0x94a   : > { %v2929_v32 = vsel %vm1264_vm3, %v2893_v6, %v4485_v17  ;;  %v2930_v59 = vsel %vm1264_vm3, %v2894_v44, %v4486_v43  ;;  %v4576_v43 = vunpack.i.h.bf16 %v6049_v40  ;;  %v4575_v17 = vunpack.i.l.bf16 %v6049_v40 }
 0x94b   : > { %v2966_v8 = vsel %vm2959_vm5, %v2929_v32, %v4490_v3  ;;  %v2967_v47 = vsel %vm2959_vm5, %v2930_v59, %v4491_v29  ;;  %v1628_v29 = vld [vmem:[#allocation2 + $0x48] sm:$0xff]  ;;  %v1627_v3 = vld [vmem:[#allocation2 + $0x40] sm:$0xff]  ;;  %v4882_v6 = vpack.i.bf16 %v1826_v22, %v1825_v63  ;;  %v4877_v44 = vpack.i.bf16 %v1790_v60, %v1789_v13  ;;  %v1630_v13 = vld [vmem:[#allocation2 + $0x58] sm:$0xff] }
 0x94c   : > { %4868 = vrot.lane.b32.xlu1 %v4867_v19, %s5138_s27  ;;  %4858 = vrot.lane.b32.xlu0 %v4857_v62, %s5137_s23  ;;  %v3003_v61 = vsel %vm2996_vm6, %v2966_v8, %v4495_v10  ;;  %v3004_v27 = vsel %vm2996_vm6, %v2967_v47, %v4496_v56  ;;  %v2824_v48 = vsel %vm986_vm2, %v1628_v29, %v4566_v9  ;;  %v4606_v56 = vunpack.i.h.bf16 %v6119_v7 }
 0x94d   : > { %4863 = vrot.lane.b32.xlu2 %v5781_v11, %s5142_s14  ;;  %v3040_v35 = vsel %vm3033_vm7, %v3003_v61, %v4595_v33  ;;  %v3041_v20 = vsel %vm3033_vm7, %v3004_v27, %v4596_v30  ;;  %v2823_v45 = vsel %vm986_vm2, %v1627_v3, %v4565_v36  ;;  %v2860_v62 = vsel %vm286_vm1, %v2824_v48, %v4576_v43  ;;  %v1753_v61 = vld [vmem:[#allocation2 + $0xd3] sm:$0xff]  ;;  %v1754_v27 = vld [vmem:[#allocation2 + $0xdb] sm:$0xff] }
 0x94e   : > { %v6201_v11 = vpop.permute.xlu1 %4658  ;;  %v6209_v15 = vpop.permute.xlu0 %4648  ;;  %v3094_v40 = vpack.c.bf16 %v3041_v20, %v3040_v35  ;;  %v2859_v19 = vsel %vm286_vm1, %v2823_v45, %v4575_v17  ;;  %v2896_v32 = vsel %vm258_vm0, %v2860_v62, %v4601_v34  ;;  %v4621_v33 = vunpack.i.h.bf16 %v6153_v4  ;;  %v1827_v45 = vld [vmem:[#allocation2 + $0xe5] sm:$0xff] }
 0x94f   : > { %v6207_v31 = vpop.permute.xlu2 %4698  ;;  %v2895_v10 = vsel %vm258_vm0, %v2859_v19, %v4600_v51  ;;  %v2932_v59 = vsel %vm1264_vm3, %v2896_v32, %v4606_v56  ;;  %v4620_v7 = vunpack.i.l.bf16 %v6153_v4  ;;  %v4611_v47 = vunpack.i.h.bf16 %v6100_v38  ;;  %v1791_v56 = vld [vmem:[#allocation2 + $0xe4] sm:$0xff] }
 0x950   : > { %3257 = vmatmul.bf16.gmra.mxu0 %v3094_v40  ;;  %v2931_v30 = vsel %vm1264_vm3, %v2895_v10, %v4605_v25  ;;  %v4610_v9 = vunpack.i.l.bf16 %v6100_v38  ;;  %v4630_v63 = vunpack.i.l.bf16 %v6157_v54  ;;  %v4892_v35 = vpack.i.bf16 %v1754_v27, %v1753_v61  ;;  %v1792_v25 = vld [vmem:[#allocation2 + $0xec] sm:$0xff] }
 0x951   : > { %v2969_v4 = vsel %vm2959_vm5, %v2932_v59, %v4611_v47  ;;  %v4341_v38 = vunpack.i.h.bf16 %v5883_v1  ;;  %v4340_v60 = vunpack.i.l.bf16 %v5883_v1  ;;  %v4411_v40 = vunpack.i.h.bf16 %v5937_v5 }
 0x952   : > { %v2968_v17 = vsel %vm2959_vm5, %v2931_v30, %v4610_v9  ;;  %v3006_v22 = vsel %vm2996_vm6, %v2969_v4, %v4621_v33  ;;  %v4410_v1 = vunpack.i.l.bf16 %v5937_v5  ;;  %v4635_v19 = vunpack.i.l.bf16 %v6117_v12  ;;  %v1649_v30 = vld [vmem:[#allocation2 + $0xf0] sm:$0xff]  ;;  %v1650_v33 = vld [vmem:[#allocation2 + $0xf8] sm:$0xff] }
 0x953   : > { %v3005_v20 = vsel %vm2996_vm6, %v2968_v17, %v4620_v7  ;;  %v2826_v3 = vsel %vm986_vm2, %v1630_v13, %v4341_v38  ;;  %v4391_v10 = vunpack.i.h.bf16 %v5930_v42  ;;  %v4390_v32 = vunpack.i.l.bf16 %v5930_v42  ;;  %v1794_v38 = vld [vmem:[#allocation2 + $0xfc] sm:$0xff] }
 0x954   : > { %4883 = vrot.lane.b32.xlu1 %v4882_v6, %s5137_s23  ;;  %4873 = vrot.lane.b32.xlu0 %v6159_v58, %s5139_s28  ;;  %v4631_v58 = vunpack.i.h.bf16 %v6157_v54  ;;  %v1629_v54 = vld [vmem:[#allocation2 + $0x50] sm:$0xff]  ;;  %v3042_v34 = vsel %vm3033_vm7, %v3005_v20, %v4630_v63  ;;  %v4641_v59 = vunpack.i.h.bf16 %v6169_v49  ;;  %v4640_v5 = vunpack.i.l.bf16 %v6169_v49 }
 0x955   : > { %4878 = vrot.lane.b32.xlu2 %v4877_v44, %s5133_s13  ;;  %v1828_v6 = vld [vmem:[#allocation2 + $0xed] sm:$0xff]  ;;  %v4651_v7 = vunpack.i.h.bf16 %v6209_v15  ;;  %v4650_v47 = vunpack.i.l.bf16 %v6209_v15  ;;  %v2862_v61 = vsel %vm286_vm1, %v2826_v3, %v4411_v40  ;;  %v5149_v42 = vmov 27  }
 0x956   : > { %v6227_v8 = vpop.permute.xlu1 %4673  ;;  %v6231_v36 = vpop.permute.xlu0 %4663  ;;  %v3043_v51 = vsel %vm3033_vm7, %v3006_v22, %v4631_v58  ;;  %v4907_v9 = vpack.i.bf16 %v1828_v6, %v1827_v45  ;;  %v4902_v58 = vpack.i.bf16 %v1792_v25, %v1791_v56  ;;  %4964 = vset.pattern.permute.xlu1 %v5149_v42  ;;  %4963 = vset.pattern.permute.xlu2 %v5149_v42  ;;  %v4461_v49 = vunpack.i.h.bf16 %v5996_v53  ;;  %v1631_v6 = vld [vmem:[#allocation2 + $0x60] sm:$0xff] }
 0x957   : > { %v6235_v43 = vpop.permute.xlu2 %4713  ;;  %v3096_v62 = vpack.c.bf16 %v3043_v51, %v3042_v34  ;;  %v4460_v63 = vunpack.i.l.bf16 %v5996_v53  ;;  %v2846_v4 = vsel %vm986_vm2, %v1650_v33, %v4391_v10  ;;  %v1793_v53 = vld [vmem:[#allocation2 + $0xf4] sm:$0xff]  ;;  %4962 = vset.pattern.permute.xlu0 %v5149_v42  ;;  %v4346_v51 = vunpack.i.h.bf16 %v5899_v52 }
 0x958   : > { %v4345_v3 = vunpack.i.l.bf16 %v5899_v52  ;;  %v4656_v40 = vunpack.i.h.bf16 %v6132_v0  ;;  %v4661_v56 = vunpack.i.h.bf16 %v6201_v11  ;;  %v4660_v25 = vunpack.i.l.bf16 %v6201_v11 }
 0x959   : > { %v4416_v11 = vunpack.i.h.bf16 %v5954_v37 }
 0x95a   : > { %v2827_v33 = vsel %vm986_vm2, %v1631_v6, %v4345_v3 }
 0x95c   : > { %4898 = vrot.lane.b32.xlu1 %v4877_v44, %s5139_s28  ;;  %4888 = vrot.lane.b32.xlu0 %v5763_v28, %s5142_s14  ;;  %v2825_v44 = vsel %vm986_vm2, %v1629_v54, %v4340_v60  ;;  %v4636_v28 = vunpack.i.h.bf16 %v6117_v12  ;;  %v4675_v54 = vunpack.i.l.bf16 %v6227_v8 }
 0x95d   : > { %4893 = vrot.lane.b32.xlu2 %v4892_v35, %s5138_s27  ;;  %v2861_v12 = vsel %vm286_vm1, %v2825_v44, %v4410_v1  ;;  %v2845_v35 = vsel %vm986_vm2, %v1649_v30, %v4390_v32  ;;  %v4655_v1 = vunpack.i.l.bf16 %v6132_v0  ;;  %v1632_v30 = vld [vmem:[#allocation2 + $0x68] sm:$0xff] }
 0x95e   : > { %v6249_v29 = vpop.permute.xlu1 %4688  ;;  %v6254_v48 = vpop.permute.xlu0 %4678  ;;  %v2898_v17 = vsel %vm258_vm0, %v2862_v61, %v4636_v28  ;;  %v2897_v15 = vsel %vm258_vm0, %v2861_v12, %v4635_v19  ;;  %v2881_v44 = vsel %vm286_vm1, %v2845_v35, %v4460_v63  ;;  %v2882_v28 = vsel %vm286_vm1, %v2846_v4, %v4461_v49 }
 0x95f   : > { %v6267_v27 = vpop.permute.xlu2 %4728  ;;  %v2933_v20 = vsel %vm1264_vm3, %v2897_v15, %v4640_v5  ;;  %v2934_v22 = vsel %vm1264_vm3, %v2898_v17, %v4641_v59  ;;  %v6291_v19 = vpack.i.bf16 %v1794_v38, %v1793_v53  ;;  %v2917_v0 = vsel %vm258_vm0, %v2881_v44, %v4675_v54  ;;  %v1758_v53 = vld [vmem:[#allocation2 + $0xfb] sm:$0xff] }
 0x960   : > { %3262 = vmatmul.bf16.gmra.mxu0 %v3096_v62  ;;  %v2971_v13 = vsel %vm2959_vm5, %v2934_v22, %v4651_v7  ;;  %v2970_v60 = vsel %vm2959_vm5, %v2933_v20, %v4650_v47  ;;  %v1755_v62 = vld [vmem:[#allocation2 + $0xe3] sm:$0xff]  ;;  %v4686_v7 = vunpack.i.h.bf16 %v6171_v41  ;;  %v4685_v47 = vunpack.i.l.bf16 %v6171_v41  ;;  %v1757_v22 = vld [vmem:[#allocation2 + $0xf3] sm:$0xff] }
 0x961   : > { %v3007_v52 = vsel %vm2996_vm6, %v2970_v60, %v4655_v1  ;;  %v3008_v10 = vsel %vm2996_vm6, %v2971_v13, %v4656_v40  ;;  %v4415_v12 = vunpack.i.l.bf16 %v5954_v37  ;;  %v2828_v37 = vsel %vm986_vm2, %v1632_v30, %v4346_v51  ;;  %v1829_v60 = vld [vmem:[#allocation2 + $0xf5] sm:$0xff] }
 0x962   : > { %v3044_v61 = vsel %vm3033_vm7, %v3007_v52, %v4660_v25  ;;  %v3045_v42 = vsel %vm3033_vm7, %v3008_v10, %v4661_v56  ;;  %v2953_v41 = vsel %vm1264_vm3, %v2917_v0, %v4685_v47  ;;  %v4665_v4 = vunpack.i.l.bf16 %v6231_v36  ;;  %v1831_v47 = vld [vmem:[#allocation2 + $0x105] sm:$0xff] }
 0x963   : > { %v4666_v38 = vunpack.i.h.bf16 %v6231_v36  ;;  %v2863_v54 = vsel %vm286_vm1, %v2827_v33, %v4415_v12  ;;  %v3098_v51 = vpack.c.bf16 %v3045_v42, %v3044_v61  ;;  %v2864_v40 = vsel %vm286_vm1, %v2828_v37, %v4416_v11  ;;  %v1634_v61 = vld [vmem:[#allocation2 + $0x78] sm:$0xff]  ;;  %v1652_v37 = vld [vmem:[#allocation2 + $0x108] sm:$0xff] }
 0x964   : > { %4913 = vrot.lane.b32.xlu1 %v5765_v21, %s5142_s14  ;;  %4903 = vrot.lane.b32.xlu0 %v4902_v58, %s5133_s13  ;;  %v4676_v21 = vunpack.i.h.bf16 %v6227_v8  ;;  %v1756_v8 = vld [vmem:[#allocation2 + $0xeb] sm:$0xff]  ;;  %v4942_v6 = vpack.i.bf16 %v1758_v53, %v1757_v22  ;;  %v2899_v44 = vsel %vm258_vm0, %v2863_v54, %v4665_v4  ;;  %v4681_v56 = vunpack.i.h.bf16 %v6254_v48 }
 0x965   : > { %4908 = vrot.lane.b32.xlu2 %v4907_v9, %s5137_s23  ;;  %v4917_v9 = vpack.i.bf16 %v1756_v8, %v1755_v62  ;;  %v2900_v8 = vsel %vm258_vm0, %v2864_v40, %v4666_v38  ;;  %v4680_v25 = vunpack.i.l.bf16 %v6254_v48  ;;  %v4671_v10 = vunpack.i.h.bf16 %v6155_v23  ;;  %v1633_v22 = vld [vmem:[#allocation2 + $0x70] sm:$0xff] }
 0x966   : > { %v4704_v34 = vpop.permute.xlu1 %4703  ;;  %v4694_v45 = vpop.permute.xlu0 %4693  ;;  %v2918_v32 = vsel %vm258_vm0, %v2882_v28, %v4676_v21  ;;  %v1830_v21 = vld [vmem:[#allocation2 + $0xfd] sm:$0xff]  ;;  %v4670_v0 = vunpack.i.l.bf16 %v6155_v23  ;;  %v4351_v11 = vunpack.i.h.bf16 %v5869_v18  ;;  %v4396_v12 = vunpack.i.h.bf16 %v5885_v26 }
 0x967   : > { %v4696_v59 = vunpack.i.h.bf16 %v4694_v45  ;;  %v4695_v5 = vunpack.i.l.bf16 %v4694_v45  ;;  %v4706_v49 = vunpack.i.h.bf16 %v4704_v34  ;;  %v4705_v63 = vunpack.i.l.bf16 %v4704_v34  ;;  %v6309_v17 = vpop.permute.xlu2 %4743 }
 0x968   : > { %v2954_v15 = vsel %vm1264_vm3, %v2918_v32, %v4686_v7  ;;  %v4932_v62 = vpack.i.bf16 %v1830_v21, %v1829_v60  ;;  %v4691_v32 = vunpack.i.h.bf16 %v6249_v29  ;;  %v2936_v48 = vsel %vm1264_vm3, %v2900_v8, %v4671_v10  ;;  %v3468_v10 = vld [vmem:[%s5541_s30] sm:$0xff] }
 0x969   : > { %v2991_v35 = vsel %vm2959_vm5, %v2954_v15, %v4696_v59  ;;  %v4690_v59 = vunpack.i.l.bf16 %v6249_v29  ;;  %v2973_v33 = vsel %vm2959_vm5, %v2936_v48, %v4681_v56  ;;  %v6349_v29 = vpop.f32.mrf.mxu2  ;;  %v4395_v42 = vunpack.i.l.bf16 %v5885_v26  ;;  %v1651_v15 = vld [vmem:[#allocation2 + $0x100] sm:$0xff] }
 0x96a   : > { %v3028_v45 = vsel %vm2996_vm6, %v2991_v35, %v4706_v49  ;;  %v4701_v4 = vunpack.i.h.bf16 %v6207_v31  ;;  %v4350_v35 = vunpack.i.l.bf16 %v5869_v18  ;;  %v2830_v26 = vsel %vm986_vm2, %v1634_v61, %v4351_v11 }
 0x96b   : > { %v4466_v18 = vunpack.i.h.bf16 %v5922_v55  ;;  %v4465_v60 = vunpack.i.l.bf16 %v5922_v55  ;;  %v4421_v21 = vunpack.i.h.bf16 %v5897_v14  ;;  %v4716_v40 = vunpack.i.h.bf16 %v6235_v43  ;;  %v1873_v55 = vld [vmem:[#allocation2 + $0x136] sm:$0xff] }
 0x96c   : > { %4928 = vrot.lane.b32.xlu1 %v6291_v19, %s5133_s13  ;;  %4918 = vrot.lane.b32.xlu0 %v4917_v9, %s5138_s27  ;;  %v1832_v9 = vld [vmem:[#allocation2 + $0x10d] sm:$0xff] }
 0x96d   : > { %4923 = vrot.lane.b32.xlu2 %v4902_v58, %s5139_s28  ;;  %v2990_v58 = vsel %vm2959_vm5, %v2953_v41, %v4695_v5  ;;  %v2935_v5 = vsel %vm1264_vm3, %v2899_v44, %v4670_v0  ;;  %v4957_v49 = vpack.i.bf16 %v1832_v9, %v1831_v47  ;;  %v3010_v41 = vsel %vm2996_vm6, %v2973_v33, %v4691_v32 }
 0x96e   : > { %v6318_v20 = vpop.permute.xlu1 %4718  ;;  %v4709_v13 = vpop.permute.xlu0 %4708  ;;  %v3027_v1 = vsel %vm2996_vm6, %v2990_v58, %v4705_v63  ;;  %v2972_v23 = vsel %vm2959_vm5, %v2935_v5, %v4680_v25  ;;  %v4700_v58 = vunpack.i.l.bf16 %v6207_v31  ;;  %v3047_v38 = vsel %vm3033_vm7, %v3010_v41, %v4701_v4 }
 0x96f   : > { %v4711_v34 = vunpack.i.h.bf16 %v4709_v13  ;;  %v4710_v3 = vunpack.i.l.bf16 %v4709_v13  ;;  %v6345_v7 = vpop.permute.xlu2 %4758  ;;  %v3009_v63 = vsel %vm2996_vm6, %v2972_v23, %v4690_v59  ;;  %v2848_v13 = vsel %vm986_vm2, %v1652_v37, %v4396_v12 }
 0x970   : > { %3267 = vmatmul.bf16.gmra.mxu0 %v3098_v51  ;;  %v3046_v53 = vsel %vm3033_vm7, %v3009_v63, %v4700_v58  ;;  %v2847_v31 = vsel %vm986_vm2, %v1651_v15, %v4395_v42  ;;  %v2829_v51 = vsel %vm986_vm2, %v1633_v22, %v4350_v35  ;;  %v4721_v44 = vunpack.i.h.bf16 %v6318_v20 }
 0x971   : > { %v3064_v28 = vsel %vm3033_vm7, %v3027_v1, %v4710_v3  ;;  %v3065_v36 = vsel %vm3033_vm7, %v3028_v45, %v4711_v34  ;;  %v4715_v1 = vunpack.i.l.bf16 %v6235_v43  ;;  %v3100_v45 = vpack.c.bf16 %v3047_v38, %v3046_v53  ;;  %v3472_v38 = vld [vmem:[%s5541_s30 + $0x20] sm:$0xff] }
 0x972   : > { %v3118_v52 = vpack.c.bf16 %v3065_v36, %v3064_v28  ;;  %v4720_v28 = vunpack.i.l.bf16 %v6318_v20  ;;  %v2883_v56 = vsel %vm286_vm1, %v2847_v31, %v4465_v60  ;;  %v2884_v25 = vsel %vm286_vm1, %v2848_v13, %v4466_v18  ;;  %v6389_v20 = vpop.f32.mrf.mxu2  ;;  %v3471_v13 = vld [vmem:[%s5541_s30 + $0x18] sm:$0xff] }
 0x973   : > { %v2866_v32 = vsel %vm286_vm1, %v2830_v26, %v4421_v21  ;;  %v4730_v33 = vunpack.i.l.bf16 %v6267_v27  ;;  %v4745_v63 = vunpack.i.l.bf16 %v6309_v17  ;;  %v4760_v41 = vunpack.i.l.bf16 %v6345_v7  ;;  %v3473_v21 = vld [vmem:[%s5541_s30 + $0x28] sm:$0xff] }
 0x974   : > { %4943 = vrot.lane.b32.xlu1 %v4942_v6, %s5138_s27  ;;  %4933 = vrot.lane.b32.xlu0 %v4932_v62, %s5137_s23  ;;  %v1874_v6 = vld [vmem:[#allocation2 + $0x13e] sm:$0xff]  ;;  %v3469_v62 = vld [vmem:[%s5541_s30 + $0x8] sm:$0xff]  ;;  %v2902_v48 = vsel %vm258_vm0, %v2866_v32, %v4716_v40 }
 0x975   : > { %4938 = vrot.lane.b32.xlu2 %v5799_v24, %s5142_s14  ;;  %3317 = vmatmul.bf16.vlgmr.msra.gmra.mxu1 %v3118_v52  ;;  %v3123_v8 = vpack.c.bf16 %v1874_v6, %v1873_v55  ;;  %v2938_v47 = vsel %vm1264_vm3, %v2902_v48, %v4721_v44  ;;  %v1635_v6 = vld [vmem:[#allocation2 + $0x80] sm:$0xff]  ;;  %v1636_v44 = vld [vmem:[#allocation2 + $0x88] sm:$0xff] }
 0x976   : > { %v6341_v30 = vpop.permute.xlu1 %4733  ;;  %v4724_v24 = vpop.permute.xlu0 %4723 }
 0x977   : > { %v4726_v54 = vunpack.i.h.bf16 %v4724_v24  ;;  %v4725_v34 = vunpack.i.l.bf16 %v4724_v24  ;;  %v6378_v36 = vpop.permute.xlu2 %4773  ;;  %v4736_v52 = vunpack.i.h.bf16 %v6341_v30  ;;  %v4735_v43 = vunpack.i.l.bf16 %v6341_v30  ;;  %4162 = vmatmul.msk.bf16.gmra.mxu2 %vm986_vm2, %v3123_v8 }
 0x978   : > { %v4731_v30 = vunpack.i.h.bf16 %v6267_v27  ;;  %v4761_v27 = vunpack.i.h.bf16 %v6345_v7 }
 0x979   : > { %v2920_v59 = vsel %vm258_vm0, %v2884_v25, %v4726_v54  ;;  %v2919_v5 = vsel %vm258_vm0, %v2883_v56, %v4725_v34  ;;  %v1654_v56 = vld [vmem:[#allocation2 + $0x118] sm:$0xff] }
 0x97a   : > { %v2956_v9 = vsel %vm1264_vm3, %v2920_v59, %v4736_v52  ;;  %v2955_v11 = vsel %vm1264_vm3, %v2919_v5, %v4735_v43  ;;  %v2975_v4 = vsel %vm2959_vm5, %v2938_v47, %v4731_v30  ;;  %v3475_v25 = vld [vmem:[%s5541_s30 + $0x38] sm:$0xff]  ;;  %v3474_v52 = vld [vmem:[%s5541_s30 + $0x30] sm:$0xff]  ;;  %v4426_v43 = vunpack.i.h.bf16 %v5947_v57 }
 0x97b   : > { %v2992_v53 = vsel %vm2959_vm5, %v2955_v11, %v4745_v63  ;;  %v4471_v59 = vunpack.i.h.bf16 %v5994_v50  ;;  %v4470_v5 = vunpack.i.l.bf16 %v5994_v50  ;;  %v4775_v30 = vunpack.i.l.bf16 %v6378_v36 }
 0x97c   : > { %4958 = vrot.lane.b32.xlu1 %v4957_v49, %s5137_s23  ;;  %4948 = vrot.lane.b32.xlu0 %v6291_v19, %s5139_s28  ;;  %v4420_v19 = vunpack.i.l.bf16 %v5897_v14  ;;  %v3470_v14 = vld [vmem:[%s5541_s30 + $0x10] sm:$0xff]  ;;  %v4746_v49 = vunpack.i.h.bf16 %v6309_v17  ;;  %s5088_s28 = scalar_lea.hbm %s6998_s4, 2 }
 0x97d   : > { %4953 = vrot.lane.b32.xlu2 %v5846_v16, %s5133_s13  ;;  %s5082_s13 = sshra.s32 %s3932_s5, 4  ;;  %s5083_s13 = int_to_ptr.hbm [resolvable:$true] %s5082_s13 }
 0x97e   : > { %v6369_v16 = vpop.permute.xlu1 %4748  ;;  %v4739_v3 = vpop.permute.xlu0 %4738  ;;  %v2865_v0 = vsel %vm286_vm1, %v2829_v51, %v4420_v19  ;;  %v2993_v17 = vsel %vm2959_vm5, %v2956_v9, %v4746_v49  ;;  %s5084_s23 = scalar_lea.hbm %s5083_s13, 1  ;;  %p5089_p1 = scmp.lt.s32.totalorder %s5083_s13, %s6998_s4 }
 0x97f   : > { %v2901_v23 = vsel %vm258_vm0, %v2865_v0, %v4715_v1  ;;  %v4741_v12 = vunpack.i.h.bf16 %v4739_v3  ;;  %v4740_v61 = vunpack.i.l.bf16 %v4739_v3  ;;  %v4751_v22 = vunpack.i.h.bf16 %v6369_v16  ;;  %v6421_v19 = vpop.permute.xlu2 %4788  ;;  %v3476_v0 = vld [vmem:[%s5541_s30 + $0x40] sm:$0xff]  ;;  %p5085_p12 = scmp.ne.s32.totalorder %s5083_s13, %s5084_s23  ;;  %p5090_p2 = scmp.lt.s32.totalorder %s5088_s28, %s5084_s23 }
 0x980   : > { %3272 = vmatmul.bf16.gmra.mxu0 %v3100_v45  ;;  %v2937_v24 = vsel %vm1264_vm3, %v2901_v23, %v4720_v28  ;;  %v4750_v26 = vunpack.i.l.bf16 %v6369_v16  ;;  %v4356_v1 = vunpack.i.h.bf16 %v5895_v46  ;;  %v4355_v45 = vunpack.i.l.bf16 %v5895_v46  ;;  %v1653_v28 = vld [vmem:[#allocation2 + $0x110] sm:$0xff] }
 0x981   : > { %v2974_v37 = vsel %vm2959_vm5, %v2937_v24, %v4730_v33  ;;  %v3012_v7 = vsel %vm2996_vm6, %v2975_v4, %v4741_v12  ;;  %v4776_v23 = vunpack.i.h.bf16 %v6378_v36  ;;  %p5086_p13 = pnand %p5085_p12, %p5213_p5  ;;  %p5091_p3 = por %p5090_p2, %p5089_p1 }
 0x982   : > { %v3011_v31 = vsel %vm2996_vm6, %v2974_v37, %v4740_v61  ;;  %v3049_v51 = vsel %vm3033_vm7, %v3012_v7, %v4751_v22  ;;  %v2832_v46 = vsel %vm986_vm2, %v1636_v44, %v4356_v1  ;;  %v2831_v32 = vsel %vm986_vm2, %v1635_v6, %v4355_v45  ;;  %v3477_v22 = vld [vmem:[%s5541_s30 + $0x48] sm:$0xff]  ;;  %v3479_v7 = vld [vmem:[%s5541_s30 + $0x58] sm:$0xff] }
 0x983   : > { %v3048_v3 = vsel %vm3033_vm7, %v3011_v31, %v4750_v26  ;;  %v2868_v50 = vsel %vm286_vm1, %v2832_v46, %v4426_v43  ;;  %v4790_v1 = vunpack.i.l.bf16 %v6421_v19  ;;  %v3482_v46 = vld [vmem:[%s5541_s30 + $0x70] sm:$0xff]  ;;  %p5087_p0 = pneg %p5086_p13 }
 0x984   : > { %3516 = vperm.xlu1 %4964, %v3470_v14   ;;  %3506 = vperm.xlu0 %4962, %v3468_v10   ;;  %v4401_v14 = vunpack.i.h.bf16 %v5924_v39  ;;  %v3102_v8 = vpack.c.bf16 %v3049_v51, %v3048_v3  ;;  %v4425_v10 = vunpack.i.l.bf16 %v5947_v57 }
 0x985   : > { %3511 = vperm.xlu2 %4963, %v3469_v62   ;;  %v4400_v62 = vunpack.i.l.bf16 %v5924_v39  ;;  %p5092_p4 = pnand %p5091_p3, %p5087_p0 }
 0x986   : > { %v6402_v42 = vpop.permute.xlu1 %4763  ;;  %v4754_v15 = vpop.permute.xlu0 %4753  ;;  %v2850_v39 = vsel %vm986_vm2, %v1654_v56, %v4401_v14  ;;  %v2867_v47 = vsel %vm286_vm1, %v2831_v32, %v4425_v10  ;;  %v3481_v56 = vld [vmem:[%s5541_s30 + $0x68] sm:$0xff] }
 0x987   : > { %v4756_v58 = vunpack.i.h.bf16 %v4754_v15  ;;  %v4755_v35 = vunpack.i.l.bf16 %v4754_v15  ;;  %v2849_v48 = vsel %vm986_vm2, %v1653_v28, %v4400_v62  ;;  %v4766_v57 = vunpack.i.h.bf16 %v6402_v42  ;;  %v4804_v24 = vpop.permute.xlu2 %4803 }
 0x988   : > { %v4765_v33 = vunpack.i.l.bf16 %v6402_v42  ;;  %v2885_v11 = vsel %vm286_vm1, %v2849_v48, %v4470_v5  ;;  %v2886_v12 = vsel %vm286_vm1, %v2850_v39, %v4471_v59  ;;  %v4361_v39 = vunpack.i.h.bf16 %v5908_v2 }
 0x989   : > { %v3029_v18 = vsel %vm2996_vm6, %v2992_v53, %v4755_v35  ;;  %v3030_v60 = vsel %vm2996_vm6, %v2993_v17, %v4756_v58  ;;  %v2922_v63 = vsel %vm258_vm0, %v2886_v12, %v4776_v23  ;;  %v2921_v42 = vsel %vm258_vm0, %v2885_v11, %v4775_v30  ;;  %v3478_v35 = vld [vmem:[%s5541_s30 + $0x50] sm:$0xff] }
 0x98a   : > { %v3066_v54 = vsel %vm3033_vm7, %v3029_v18, %v4760_v41  ;;  %v3067_v16 = vsel %vm3033_vm7, %v3030_v60, %v4761_v27  ;;  %v2904_v15 = vsel %vm258_vm0, %v2868_v50, %v4766_v57  ;;  %v2903_v37 = vsel %vm258_vm0, %v2867_v47, %v4765_v33  ;;  %v1637_v30 = vld [vmem:[#allocation2 + $0x90] sm:$0xff]  ;;  %v1638_v57 = vld [vmem:[#allocation2 + $0x98] sm:$0xff]  ;;  %v7034_v33 = vld [vmem:[#allocation21_spill] sm:$0xff] }
 0x98b   : > { %v3120_v34 = vpack.c.bf16 %v3067_v16, %v3066_v54  ;;  %v4806_v60 = vunpack.i.h.bf16 %v4804_v24  ;;  %v4360_v48 = vunpack.i.l.bf16 %v5908_v2  ;;  %v4430_v47 = vunpack.i.l.bf16 %v7034_v33 }
 0x98c   : > { %3526 = vperm.xlu1 %4964, %v3472_v38   ;;  %3531 = vperm.xlu0 %4962, %v3473_v21   ;;  %v4805_v21 = vunpack.i.l.bf16 %v4804_v24  ;;  %v4431_v24 = vunpack.i.h.bf16 %v7034_v33 }
 0x98d   : > { %3521 = vperm.xlu2 %4963, %v3471_v13   ;;  %3322 = vmatmul.bf16.gmra.mxu1 %v3120_v34  ;;  %v2833_v2 = vsel %vm986_vm2, %v1637_v30, %v4360_v48 }
 0x98e   : > { %v6427_v40 = vpop.permute.xlu1 %4778  ;;  %v4769_v55 = vpop.permute.xlu0 %4768 }
 0x98f   : > { %v4771_v36 = vunpack.i.h.bf16 %v4769_v55  ;;  %v4770_v61 = vunpack.i.l.bf16 %v4769_v55  ;;  %v4781_v26 = vunpack.i.h.bf16 %v6427_v40  ;;  %v4780_v53 = vunpack.i.l.bf16 %v6427_v40  ;;  %v4819_v45 = vpop.permute.xlu2 %4818 }
 0x990   : > { %3277 = vmatmul.bf16.gmra.mxu0 %v3102_v8  ;;  %v4791_v40 = vunpack.i.h.bf16 %v6421_v19 }
 0x991   : > { %v2940_v31 = vsel %vm1264_vm3, %v2904_v15, %v4771_v36  ;;  %v2939_v18 = vsel %vm1264_vm3, %v2903_v37, %v4770_v61 }
 0x992   : > { %v2977_v34 = vsel %vm2959_vm5, %v2940_v31, %v4781_v26  ;;  %v2976_v3 = vsel %vm2959_vm5, %v2939_v18, %v4780_v53  ;;  %v6503_v31 = vpop.f32.mrf.mxu2 }
 0x993   : > { %v3014_v43 = vsel %vm2996_vm6, %v2977_v34, %v4791_v40  ;;  %v1840_v40 = vld [vmem:[#allocation2 + $0x2e] sm:$0xff] }
 0x994   : > { %3541 = vperm.xlu1 %4964, %v3475_v25   ;;  %3546 = vperm.xlu0 %4962, %v3476_v0   ;;  %v3480_v25 = vld [vmem:[%s5541_s30 + $0x60] sm:$0xff] }
 0x995   : > { %3536 = vperm.xlu2 %4963, %v3474_v52   ;;  %v3013_v52 = vsel %vm2996_vm6, %v2976_v3, %v4790_v1  ;;  %v3487_v3 = vld [vmem:[%s5541_s30 + $0x98] sm:$0xff]  ;;  %v7035_v1 = vld [vmem:[#allocation10_spill] sm:$0xff] }
 0x996   : > { %v4794_v9 = vpop.permute.xlu1 %4793  ;;  %v4784_v49 = vpop.permute.xlu0 %4783 }
 0x997   : > { %v4786_v27 = vunpack.i.h.bf16 %v4784_v49  ;;  %v4785_v41 = vunpack.i.l.bf16 %v4784_v49  ;;  %v4796_v4 = vunpack.i.h.bf16 %v4794_v9  ;;  %v4795_v58 = vunpack.i.l.bf16 %v4794_v9  ;;  %v4834_v61 = vpop.permute.xlu2 %4833  ;;  %v3484_v49 = vld [vmem:[%s5541_s30 + $0x80] sm:$0xff] }
 0x998   : > { %v2834_v9 = vsel %vm986_vm2, %v1638_v57, %v4361_v39 }
 0x999   : > { %v2958_v17 = vsel %vm1264_vm3, %v2922_v63, %v4786_v27  ;;  %v2957_v38 = vsel %vm1264_vm3, %v2921_v42, %v4785_v41  ;;  %v3483_v63 = vld [vmem:[%s5541_s30 + $0x78] sm:$0xff]  ;;  %v2869_v42 = vsel %vm286_vm1, %v2833_v2, %v4430_v47  ;;  %v2870_v27 = vsel %vm286_vm1, %v2834_v9, %v4431_v24  ;;  %v3485_v41 = vld [vmem:[%s5541_s30 + $0x88] sm:$0xff]  ;;  %v3490_v9 = vld [vmem:[%s5541_s30 + $0xb0] sm:$0xff] }
 0x99a   : > { %v6462_v13 = vpop.f32.mrf.mxu0  ;;  %v2995_v54 = vsel %vm2959_vm5, %v2958_v17, %v4796_v4  ;;  %v2994_v16 = vsel %vm2959_vm5, %v2957_v38, %v4795_v58  ;;  %v4821_v58 = vunpack.i.h.bf16 %v4819_v45  ;;  %v3489_v2 = vld [vmem:[%s5541_s30 + $0xa8] sm:$0xff] }
 0x99b   : > { %v3031_v62 = vsel %vm2996_vm6, %v2994_v16, %v4805_v21  ;;  %v3032_v8 = vsel %vm2996_vm6, %v2995_v54, %v4806_v60  ;;  %v4836_v21 = vunpack.i.h.bf16 %v4834_v61  ;;  %v4835_v54 = vunpack.i.l.bf16 %v4834_v61  ;;  %v3491_v61 = vld [vmem:[%s5541_s30 + $0xb8] sm:$0xff] }
 0x99c   : > { %3556 = vperm.xlu1 %4964, %v3478_v35   ;;  %3561 = vperm.xlu0 %4962, %v3479_v7   ;;  %v4820_v35 = vunpack.i.l.bf16 %v4819_v45  ;;  %v4366_v45 = vunpack.i.h.bf16 %v7035_v1 }
 0x99d   : > { %3551 = vperm.xlu2 %4963, %v3477_v22  }
 0x99e   : > { %v4809_v51 = vpop.permute.xlu1 %4808  ;;  %v4799_v44 = vpop.permute.xlu0 %4798 }
 0x99f   : > { %v4811_v55 = vunpack.i.h.bf16 %v4809_v51  ;;  %v4810_v6 = vunpack.i.l.bf16 %v4809_v51  ;;  %v4801_v28 = vunpack.i.h.bf16 %v4799_v44  ;;  %v4800_v14 = vunpack.i.l.bf16 %v4799_v44  ;;  %v3486_v51 = vld [vmem:[%s5541_s30 + $0x90] sm:$0xff] }
 0x9a1   : > { %v3068_v10 = vsel %vm3033_vm7, %v3031_v62, %v4810_v6  ;;  %v3069_v19 = vsel %vm3033_vm7, %v3032_v8, %v4811_v55  ;;  %v3050_v32 = vsel %vm3033_vm7, %v3013_v52, %v4800_v14  ;;  %v3051_v59 = vsel %vm3033_vm7, %v3014_v43, %v4801_v28  ;;  %v3488_v28 = vld [vmem:[%s5541_s30 + $0xa0] sm:$0xff]  ;;  %v1640_v62 = vld [vmem:[#allocation2 + $0xa8] sm:$0xff]  ;;  %v4849_v8 = vpop.permute.xlu2 %4848 }
 0x9a2   : > { %v6481_v0 = vpop.f32.mrf.mxu0  ;;  %v3122_v5 = vpack.c.bf16 %v3069_v19, %v3068_v10  ;;  %v3104_v23 = vpack.c.bf16 %v3051_v59, %v3050_v32  ;;  %v4365_v55 = vunpack.i.l.bf16 %v7035_v1  ;;  %v1639_v14 = vld [vmem:[#allocation2 + $0xa0] sm:$0xff]  ;;  %v1642_v1 = vld [vmem:[#allocation2 + $0xb8] sm:$0xff] }
 0x9a4   : > { %3571 = vperm.xlu1 %4964, %v3481_v56   ;;  %3576 = vperm.xlu0 %4962, %v3482_v46   ;;  %v1839_v56 = vld [vmem:[#allocation2 + $0x26] sm:$0xff]  ;;  %v7036_v46 = vld [vmem:[#allocation12_spill] sm:$0xff]  ;;  %v2835_v39 = vsel %vm986_vm2, %v1639_v14, %v4365_v55 }
 0x9a5   : > { %3566 = vperm.xlu2 %4963, %v3480_v25   ;;  %3282 = vmatmul.bf16.gmra.mxu0 %v3104_v23  ;;  %v3089_v10 = vpack.c.bf16 %v1840_v40, %v1839_v56  ;;  %v4436_v32 = vunpack.i.h.bf16 %v7036_v46  ;;  %v4435_v59 = vunpack.i.l.bf16 %v7036_v46  ;;  %v1641_v40 = vld [vmem:[#allocation2 + $0xb0] sm:$0xff] }
 0x9a6   : > { %3327 = vmatmul.bf16.gmra.mxu1 %v3122_v5  ;;  %v4824_v50 = vpop.permute.xlu1 %4823  ;;  %v4814_v11 = vpop.permute.xlu0 %4813  ;;  %v2836_v5 = vsel %vm986_vm2, %v1640_v62, %v4366_v45  ;;  %v3494_v45 = vld [vmem:[%s5541_s30 + $0xd0] sm:$0xff] }
 0x9a7   : > { %v4816_v12 = vunpack.i.h.bf16 %v4814_v11  ;;  %v4815_v36 = vunpack.i.l.bf16 %v4814_v11  ;;  %v4826_v17 = vunpack.i.h.bf16 %v4824_v50  ;;  %v4825_v38 = vunpack.i.l.bf16 %v4824_v50  ;;  %v6527_v11 = vpop.f32.mrf.mxu2 }
 0x9a8   : > { %v2871_v47 = vsel %vm286_vm1, %v2835_v39, %v4435_v59  ;;  %v2872_v50 = vsel %vm286_vm1, %v2836_v5, %v4436_v32 }
 0x9a9   : > { %v2905_v15 = vsel %vm258_vm0, %v2869_v42, %v4815_v36  ;;  %v2906_v37 = vsel %vm258_vm0, %v2870_v27, %v4816_v12  ;;  %v4851_v42 = vunpack.i.h.bf16 %v4849_v8  ;;  %v4850_v27 = vunpack.i.l.bf16 %v4849_v8 }
 0x9aa   : > { %v6499_v4 = vpop.f32.mrf.mxu0  ;;  %v2941_v22 = vsel %vm1264_vm3, %v2905_v15, %v4820_v35  ;;  %v2942_v26 = vsel %vm1264_vm3, %v2906_v37, %v4821_v58  ;;  %v4864_v15 = vpop.permute.xlu2 %4863 }
 0x9ab   : > { %v2978_v16 = vsel %vm2959_vm5, %v2941_v22, %v4825_v38  ;;  %v2979_v34 = vsel %vm2959_vm5, %v2942_v26, %v4826_v17 }
 0x9ac   : > { %3586 = vperm.xlu1 %4964, %v3484_v49   ;;  %3591 = vperm.xlu0 %4962, %v3485_v41  }
 0x9ad   : > { %3581 = vperm.xlu2 %4963, %v3483_v63  }
 0x9ae   : > { %v4839_v53 = vpop.permute.xlu1 %4838  ;;  %v4829_v7 = vpop.permute.xlu0 %4828 }
 0x9af   : > { %v4831_v18 = vunpack.i.h.bf16 %v4829_v7  ;;  %v4830_v60 = vunpack.i.l.bf16 %v4829_v7  ;;  %v4841_v48 = vunpack.i.h.bf16 %v4839_v53  ;;  %v4840_v23 = vunpack.i.l.bf16 %v4839_v53  ;;  %v1841_v7 = vld [vmem:[#allocation2 + $0x36] sm:$0xff]  ;;  %v6549_v8 = vpop.f32.mrf.mxu2 }
 0x9b1   : > { %v3015_v6 = vsel %vm2996_vm6, %v2978_v16, %v4830_v60  ;;  %v3016_v44 = vsel %vm2996_vm6, %v2979_v34, %v4831_v18  ;;  %v2908_v12 = vsel %vm258_vm0, %v2872_v50, %v4841_v48  ;;  %v2907_v36 = vsel %vm258_vm0, %v2871_v47, %v4840_v23  ;;  %v7037_v18 = vld [vmem:[#allocation13_spill] sm:$0xff]  ;;  %v3495_v50 = vld [vmem:[%s5541_s30 + $0xd8] sm:$0xff] }
 0x9b2   : > { %v3052_v25 = vsel %vm3033_vm7, %v3015_v6, %v4835_v54  ;;  %v3053_v52 = vsel %vm3033_vm7, %v3016_v44, %v4836_v21  ;;  %v6516_v43 = vpop.f32.mrf.mxu0  ;;  %v4371_v60 = vunpack.i.h.bf16 %v7037_v18  ;;  %v4370_v21 = vunpack.i.l.bf16 %v7037_v18  ;;  %v3493_v54 = vld [vmem:[%s5541_s30 + $0xc8] sm:$0xff]  ;;  %v3492_v16 = vld [vmem:[%s5541_s30 + $0xc0] sm:$0xff]  ;;  %v4879_v5 = vpop.permute.xlu2 %4878 }
 0x9b3   : > { %v3106_v19 = vpack.c.bf16 %v3053_v52, %v3052_v25  ;;  %v1842_v34 = vld [vmem:[#allocation2 + $0x3e] sm:$0xff]  ;;  %v1644_v18 = vld [vmem:[#allocation2 + $0xc8] sm:$0xff] }
 0x9b4   : > { %3601 = vperm.xlu1 %4964, %v3487_v3   ;;  %3606 = vperm.xlu0 %4962, %v3488_v28   ;;  %v7038_v28 = vld [vmem:[#allocation19_spill] sm:$0xff]  ;;  %v3091_v56 = vpack.c.bf16 %v1842_v34, %v1841_v7  ;;  %v2838_v25 = vsel %vm986_vm2, %v1642_v1, %v4371_v60  ;;  %v2837_v52 = vsel %vm986_vm2, %v1641_v40, %v4370_v21  ;;  %v3496_v47 = vld [vmem:[%s5541_s30 + $0xe0] sm:$0xff] }
 0x9b5   : > { %3596 = vperm.xlu2 %4963, %v3486_v51   ;;  %3287 = vmatmul.bf16.gmra.mxu0 %v3106_v19  ;;  %v4441_v14 = vunpack.i.h.bf16 %v7038_v28  ;;  %v4440_v62 = vunpack.i.l.bf16 %v7038_v28  ;;  %v4865_v19 = vunpack.i.l.bf16 %v4864_v15  ;;  %v1643_v7 = vld [vmem:[#allocation2 + $0xc0] sm:$0xff]  ;;  %v1844_v34 = vld [vmem:[#allocation2 + $0x4e] sm:$0xff] }
 0x9b6   : > { %4145 = vmatmul.msk.bf16.vlgmr.msrb.gmra.mxu1 %vm986_vm2, %v3089_v10  ;;  %v4854_v30 = vpop.permute.xlu1 %4853  ;;  %v4844_v57 = vpop.permute.xlu0 %4843  ;;  %v4866_v10 = vunpack.i.h.bf16 %v4864_v15  ;;  %v1843_v60 = vld [vmem:[#allocation2 + $0x46] sm:$0xff]  ;;  %v7040_v40 = vld [vmem:[#allocation23_spill] sm:$0xff] }
 0x9b7   : > { %v4846_v33 = vunpack.i.h.bf16 %v4844_v57  ;;  %v4845_v24 = vunpack.i.l.bf16 %v4844_v57  ;;  %v4856_v35 = vunpack.i.h.bf16 %v4854_v30  ;;  %v4855_v22 = vunpack.i.l.bf16 %v4854_v30 }
 0x9b8   : > { %v2873_v48 = vsel %vm286_vm1, %v2837_v52, %v4440_v62  ;;  %v2874_v23 = vsel %vm286_vm1, %v2838_v25, %v4441_v14  ;;  %v4446_v1 = vunpack.i.h.bf16 %v7040_v40 }
 0x9b9   : > { %v2944_v49 = vsel %vm1264_vm3, %v2908_v12, %v4846_v33  ;;  %v2943_v63 = vsel %vm1264_vm3, %v2907_v36, %v4845_v24  ;;  %v2910_v33 = vsel %vm258_vm0, %v2874_v23, %v4866_v10  ;;  %v2909_v24 = vsel %vm258_vm0, %v2873_v48, %v4865_v19  ;;  %v3497_v36 = vld [vmem:[%s5541_s30 + $0xe8] sm:$0xff] }
 0x9ba   : > { %v2981_v37 = vsel %vm2959_vm5, %v2944_v49, %v4851_v42  ;;  %v2980_v58 = vsel %vm2959_vm5, %v2943_v63, %v4850_v27  ;;  %v4881_v63 = vunpack.i.h.bf16 %v4879_v5  ;;  %v4880_v42 = vunpack.i.l.bf16 %v4879_v5  ;;  %v6567_v27 = vpop.f32.mrf.mxu2  ;;  %v4894_v21 = vpop.permute.xlu2 %4893 }
 0x9bb   : > { %v3017_v3 = vsel %vm2996_vm6, %v2980_v58, %v4855_v22  ;;  %v3018_v51 = vsel %vm2996_vm6, %v2981_v37, %v4856_v35  ;;  %v7039_v58 = vld [vmem:[#allocation16_spill] sm:$0xff]  ;;  %v4895_v48 = vunpack.i.l.bf16 %v4894_v21 }
 0x9bc   : > { %3616 = vperm.xlu1 %4964, %v3490_v9   ;;  %v6534_v41 = vpop.f32.mrf.mxu0  ;;  %3621 = vperm.xlu0 %4962, %v3491_v61   ;;  %v4376_v35 = vunpack.i.h.bf16 %v7039_v58  ;;  %v4375_v22 = vunpack.i.l.bf16 %v7039_v58 }
 0x9bd   : > { %3611 = vperm.xlu2 %4963, %v3489_v2  }
 0x9be   : > { %v4859_v26 = vpop.permute.xlu0 %4858  ;;  %v4869_v53 = vpop.permute.xlu1 %4868 }
 0x9bf   : > { %v4861_v17 = vunpack.i.h.bf16 %v4859_v26  ;;  %v4860_v38 = vunpack.i.l.bf16 %v4859_v26  ;;  %v4871_v32 = vunpack.i.h.bf16 %v4869_v53  ;;  %v4870_v59 = vunpack.i.l.bf16 %v4869_v53 }
 0x9c1   : > { %v3054_v55 = vsel %vm3033_vm7, %v3017_v3, %v4860_v38  ;;  %v3055_v6 = vsel %vm3033_vm7, %v3018_v51, %v4861_v17  ;;  %v2945_v9 = vsel %vm1264_vm3, %v2909_v24, %v4870_v59  ;;  %v2946_v2 = vsel %vm1264_vm3, %v2910_v33, %v4871_v32 }
 0x9c2   : > { %v3108_v44 = vpack.c.bf16 %v3055_v6, %v3054_v55  ;;  %v3500_v55 = vld [vmem:[%s5541_s30 + $0x100] sm:$0xff]  ;;  %v2840_v6 = vsel %vm986_vm2, %v1644_v18, %v4376_v35  ;;  %v6591_v23 = vpop.f32.mrf.mxu2  ;;  %v1645_v18 = vld [vmem:[#allocation2 + $0xd0] sm:$0xff] }
 0x9c3   : > { %v2876_v10 = vsel %vm286_vm1, %v2840_v6, %v4446_v1 }
 0x9c4   : > { %3631 = vperm.xlu1 %4964, %v3493_v54   ;;  %3636 = vperm.xlu0 %4962, %v3494_v45   ;;  %v6553_v46 = vpop.f32.mrf.mxu0  ;;  %v3499_v54 = vld [vmem:[%s5541_s30 + $0xf8] sm:$0xff]  ;;  %v4445_v45 = vunpack.i.l.bf16 %v7040_v40 }
 0x9c5   : > { %3626 = vperm.xlu2 %4963, %v3492_v16   ;;  %3292 = vmatmul.bf16.gmra.mxu0 %v3108_v44  ;;  %v3498_v16 = vld [vmem:[%s5541_s30 + $0xf0] sm:$0xff]  ;;  %v2839_v44 = vsel %vm986_vm2, %v1643_v7, %v4375_v22 }
 0x9c6   : > { %4146 = vmatmul.msk.bf16.gmra.mxu1 %vm986_vm2, %v3091_v56  ;;  %v4874_v39 = vpop.permute.xlu0 %4873  ;;  %v4884_v12 = vpop.permute.xlu1 %4883  ;;  %v3093_v56 = vpack.c.bf16 %v1844_v34, %v1843_v60  ;;  %v2875_v52 = vsel %vm286_vm1, %v2839_v44, %v4445_v45  ;;  %v7041_v22 = vld [vmem:[#allocation11_spill] sm:$0xff] }
 0x9c7   : > { %v4876_v30 = vunpack.i.h.bf16 %v4874_v39  ;;  %v4875_v57 = vunpack.i.l.bf16 %v4874_v39  ;;  %v4886_v26 = vunpack.i.h.bf16 %v4884_v12  ;;  %v4885_v53 = vunpack.i.l.bf16 %v4884_v12  ;;  %v1646_v60 = vld [vmem:[#allocation2 + $0xd8] sm:$0xff] }
 0x9c8   : > { %v4896_v39 = vunpack.i.h.bf16 %v4894_v21 }
 0x9c9   : > { %v2983_v61 = vsel %vm2959_vm5, %v2946_v2, %v4876_v30  ;;  %v2982_v49 = vsel %vm2959_vm5, %v2945_v9, %v4875_v57  ;;  %v3501_v30 = vld [vmem:[%s5541_s30 + $0x108] sm:$0xff]  ;;  %v4909_v9 = vpop.permute.xlu2 %4908 }
 0x9ca   : > { %v3019_v15 = vsel %vm2996_vm6, %v2982_v49, %v4880_v42  ;;  %v3020_v37 = vsel %vm2996_vm6, %v2983_v61, %v4881_v63  ;;  %v6607_v21 = vpop.f32.mrf.mxu2 }
 0x9cb   : > { %v3056_v3 = vsel %vm3033_vm7, %v3019_v15, %v4885_v53  ;;  %v3057_v51 = vsel %vm3033_vm7, %v3020_v37, %v4886_v26  ;;  %v4911_v15 = vunpack.i.h.bf16 %v4909_v9  ;;  %v4910_v37 = vunpack.i.l.bf16 %v4909_v9 }
 0x9cc   : > { %3646 = vperm.xlu1 %4964, %v3496_v47   ;;  %3651 = vperm.xlu0 %4962, %v3497_v36   ;;  %v3110_v25 = vpack.c.bf16 %v3057_v51, %v3056_v3  ;;  %v4381_v26 = vunpack.i.h.bf16 %v7041_v22  ;;  %v4380_v53 = vunpack.i.l.bf16 %v7041_v22 }
 0x9cd   : > { %3641 = vperm.xlu2 %4963, %v3495_v50   ;;  %v6573_v17 = vpop.f32.mrf.mxu0  ;;  %v3503_v50 = vld [vmem:[%s5541_s30 + $0x118] sm:$0xff] }
 0x9ce   : > { %v4889_v38 = vpop.permute.xlu0 %4888  ;;  %v4899_v62 = vpop.permute.xlu1 %4898  ;;  %v2842_v51 = vsel %vm986_vm2, %v1646_v60, %v4381_v26  ;;  %v2841_v40 = vsel %vm986_vm2, %v1645_v18, %v4380_v53  ;;  %v1647_v53 = vld [vmem:[#allocation2 + $0xe0] sm:$0xff]  ;;  %v7046_v18 = vld [vmem:[#allocation22_spill] sm:$0xff] }
 0x9cf   : > { %v4891_v28 = vunpack.i.h.bf16 %v4889_v38  ;;  %v4890_v14 = vunpack.i.l.bf16 %v4889_v38  ;;  %v4901_v2 = vunpack.i.h.bf16 %v4899_v62  ;;  %v4900_v12 = vunpack.i.l.bf16 %v4899_v62 }
 0x9d0   : > { %v4456_v60 = vunpack.i.h.bf16 %v7046_v18 }
 0x9d1   : > { %v2911_v19 = vsel %vm258_vm0, %v2875_v52, %v4890_v14  ;;  %v2912_v32 = vsel %vm258_vm0, %v2876_v10, %v4891_v28  ;;  %v4924_v1 = vpop.permute.xlu2 %4923 }
 0x9d2   : > { %v2947_v57 = vsel %vm1264_vm3, %v2911_v19, %v4895_v48  ;;  %v2948_v33 = vsel %vm1264_vm3, %v2912_v32, %v4896_v39  ;;  %v4925_v39 = vunpack.i.l.bf16 %v4924_v1  ;;  %v6621_v48 = vpop.f32.mrf.mxu2 }
 0x9d3   : > { %v2984_v36 = vsel %vm2959_vm5, %v2947_v57, %v4900_v12  ;;  %v2985_v61 = vsel %vm2959_vm5, %v2948_v33, %v4901_v2  ;;  %v7043_v12 = vld [vmem:[#allocation15_spill] sm:$0xff] }
 0x9d4   : > { %3661 = vperm.xlu1 %4964, %v3499_v54   ;;  %3666 = vperm.xlu0 %4962, %v3500_v55   ;;  %v7042_v54 = vld [vmem:[#allocation14_spill] sm:$0xff] }
 0x9d5   : > { %3656 = vperm.xlu2 %4963, %v3498_v16   ;;  %3297 = vmatmul.bf16.gmra.mxu0 %v3110_v25  ;;  %v6589_v59 = vpop.f32.mrf.mxu0  ;;  %v4451_v16 = vunpack.i.h.bf16 %v7042_v54  ;;  %v4450_v34 = vunpack.i.l.bf16 %v7042_v54  ;;  %v4455_v54 = vunpack.i.l.bf16 %v7046_v18 }
 0x9d6   : > { %4147 = vmatmul.msk.bf16.gmra.mxu1 %vm986_vm2, %v3093_v56  ;;  %v4904_v5 = vpop.permute.xlu0 %4903  ;;  %v4914_v49 = vpop.permute.xlu1 %4913 }
 0x9d7   : > { %v4906_v24 = vunpack.i.h.bf16 %v4904_v5  ;;  %v4905_v47 = vunpack.i.l.bf16 %v4904_v5  ;;  %v4916_v45 = vunpack.i.h.bf16 %v4914_v49  ;;  %v4915_v55 = vunpack.i.l.bf16 %v4914_v49 }
 0x9d8   : > { %v2877_v14 = vsel %vm286_vm1, %v2841_v40, %v4450_v34  ;;  %v2878_v62 = vsel %vm286_vm1, %v2842_v51, %v4451_v16  ;;  %v4926_v5 = vunpack.i.h.bf16 %v4924_v1  ;;  %v7047_v51 = vld [vmem:[#allocation9_spill] sm:$0xff] }
 0x9d9   : > { %v3021_v63 = vsel %vm2996_vm6, %v2984_v36, %v4905_v47  ;;  %v3022_v42 = vsel %vm2996_vm6, %v2985_v61, %v4906_v24  ;;  %v2914_v25 = vsel %vm258_vm0, %v2878_v62, %v4916_v45  ;;  %v2913_v52 = vsel %vm258_vm0, %v2877_v14, %v4915_v55  ;;  %v4939_v9 = vpop.permute.xlu2 %4938 }
 0x9da   : > { %v3058_v38 = vsel %vm3033_vm7, %v3021_v63, %v4910_v37  ;;  %v3059_v7 = vsel %vm3033_vm7, %v3022_v42, %v4911_v15  ;;  %v4386_v36 = vunpack.i.h.bf16 %v7043_v12  ;;  %v1648_v63 = vld [vmem:[#allocation2 + $0xe8] sm:$0xff]  ;;  %v4385_v42 = vunpack.i.l.bf16 %v7043_v12  ;;  %v7045_v37 = vld [vmem:[#allocation20_spill] sm:$0xff] }
 0x9db   : > { %v3112_v3 = vpack.c.bf16 %v3059_v7, %v3058_v38  ;;  %v7044_v15 = vld [vmem:[#allocation6_spill] sm:$0xff]  ;;  %v4941_v1 = vunpack.i.h.bf16 %v4939_v9  ;;  %v4940_v45 = vunpack.i.l.bf16 %v4939_v9 }
 0x9dc   : > { %3681 = vperm.xlu0 %4962, %v3503_v50   ;;  %v2844_v7 = vsel %vm986_vm2, %v1648_v63, %v4386_v36 }
 0x9dd   : > { %3671 = vperm.xlu2 %4963, %v3501_v30   ;;  %v6601_v58 = vpop.f32.mrf.mxu0 }
 0x9de   : > { %v4919_v35 = vpop.permute.xlu0 %4918  ;;  %v4929_v56 = vpop.permute.xlu1 %4928 }
 0x9df   : > { %v4921_v6 = vunpack.i.h.bf16 %v4919_v35  ;;  %v4920_v44 = vunpack.i.l.bf16 %v4919_v35  ;;  %v4931_v47 = vunpack.i.h.bf16 %v4929_v56  ;;  %v4930_v50 = vunpack.i.l.bf16 %v4929_v56 }
 0x9e0   : > { %v1297_v35 = vmul.f32 %v7045_v37, %v7044_v15 }
 0x9e1   : > { %v2950_v10 = vsel %vm1264_vm3, %v2914_v25, %v4921_v6  ;;  %v2949_v19 = vsel %vm1264_vm3, %v2913_v52, %v4920_v44  ;;  %v6642_v44 = vpop.f32.mrf.mxu2  ;;  %v2880_v52 = vsel %vm286_vm1, %v2844_v7, %v4456_v60 }
 0x9e2   : > { %v2987_v30 = vsel %vm2959_vm5, %v2950_v10, %v4926_v5  ;;  %v2986_v57 = vsel %vm2959_vm5, %v2949_v19, %v4925_v39  ;;  %v6640_v40 = vsub.f32 %v7047_v51, %v1297_v35  ;;  %v2916_v10 = vsel %vm258_vm0, %v2880_v52, %v4941_v1 }
 0x9e3   : > { %v3023_v61 = vsel %vm2996_vm6, %v2986_v57, %v4930_v50  ;;  %v3024_v49 = vsel %vm2996_vm6, %v2987_v30, %v4931_v47 }
 0x9e4   : > { %7048 = vst [vmem:[#allocation21_spill] sm:$0xff] %v6640_v40  ;;  %v1299_v5 = vmul.f32 %v6640_v40, %v6640_v40 }
 0x9e5   : > { %3302 = vmatmul.bf16.gmra.mxu0 %v3112_v3  ;;  %v6613_v28 = vpop.f32.mrf.mxu0  ;;  %v2843_v3 = vsel %vm986_vm2, %v1647_v53, %v4385_v42 }
 0x9e6   : > { %v4934_v32 = vpop.permute.xlu0 %4933  ;;  %v4944_v38 = vpop.permute.xlu1 %4943  ;;  %v2879_v25 = vsel %vm286_vm1, %v2843_v3, %v4455_v54  ;;  %v1300_v9 = vsel %vm1293_vm4, %v1299_v5, 0.0  ;;  %v3502_v54 = vld [vmem:[%s5541_s30 + $0x110] sm:$0xff] }
 0x9e7   : > { %v4936_v33 = vunpack.i.h.bf16 %v4934_v32  ;;  %v4935_v24 = vunpack.i.l.bf16 %v4934_v32  ;;  %v4946_v55 = vunpack.i.h.bf16 %v4944_v38  ;;  %v4945_v6 = vunpack.i.l.bf16 %v4944_v38  ;;  %v4954_v32 = vpop.permute.xlu2 %4953 }
 0x9e8   : > { %v2915_v19 = vsel %vm258_vm0, %v2879_v25, %v4940_v45  ;;  %v4955_v47 = vunpack.i.l.bf16 %v4954_v32 }
 0x9e9   : > { %v3060_v22 = vsel %vm3033_vm7, %v3023_v61, %v4935_v24  ;;  %v3061_v26 = vsel %vm3033_vm7, %v3024_v49, %v4936_v33  ;;  %v2951_v39 = vsel %vm1264_vm3, %v2915_v19, %v4945_v6  ;;  %v2952_v30 = vsel %vm1264_vm3, %v2916_v10, %v4946_v55  ;;  %v6663_v37 = vpop.f32.mrf.mxu2 }
 0x9ea   : > { %v3114_v34 = vpack.c.bf16 %v3061_v26, %v3060_v22  ;;  %v4956_v24 = vunpack.i.h.bf16 %v4954_v32 }
 0x9ed   : > { %v6625_v2 = vpop.f32.mrf.mxu0 }
 0x9ee   : > { %v4949_v16 = vpop.permute.xlu0 %4948  ;;  %v4959_v50 = vpop.permute.xlu1 %4958 }
 0x9ef   : > { %v4951_v14 = vunpack.i.h.bf16 %v4949_v16  ;;  %v4950_v62 = vunpack.i.l.bf16 %v4949_v16  ;;  %v4961_v61 = vunpack.i.h.bf16 %v4959_v50  ;;  %v4960_v49 = vunpack.i.l.bf16 %v4959_v50  ;;  %v3512_v6 = vpop.permute.xlu2 %3511 }
 0x9f1   : > { %v2989_v57 = vsel %vm2959_vm5, %v2952_v30, %v4951_v14  ;;  %v2988_v33 = vsel %vm2959_vm5, %v2951_v39, %v4950_v62  ;;  %v6671_v7 = vpop.f32.mrf.mxu2 }
 0x9f2   : > { %v3025_v12 = vsel %vm2996_vm6, %v2988_v33, %v4955_v47  ;;  %v3026_v36 = vsel %vm2996_vm6, %v2989_v57, %v4956_v24  ;;  %v6659_v63 = vpop.f32.mrf.mxu1  ;;  %v6707_v33 = vld [vmem:[%s6997_s3 + $0x4a] ss:$0 sm:$0xff] }
 0x9f3   : > { %7049 = vst [vmem:[#allocation10_spill] sm:$0xff] %v6659_v63  ;;  %v3062_v35 = vsel %vm3033_vm7, %v3025_v12, %v4960_v49  ;;  %v3063_v22 = vsel %vm3033_vm7, %v3026_v36, %v4961_v61  ;;  %v3244_v24 = vadd.f32 %v6707_v33, %v6462_v13  ;;  %v3246_v47 = vadd.f32 %v6707_v33, %v6481_v0 }
 0x9f4   : > { %v3116_v26 = vpack.c.bf16 %v3063_v22, %v3062_v35  ;;  %v3249_v13 = vadd.f32 %v6707_v33, %v6499_v4 }
 0x9f5   : > { %3307 = vmatmul.bf16.gmra.mxu0 %v3114_v34  ;;  %v6644_v56 = vpop.f32.mrf.mxu0 }
 0x9f6   : > { %v3517_v51 = vpop.permute.xlu1 %3516  ;;  %v3507_v25 = vpop.permute.xlu0 %3506 }
 0x9f7   : > { %v3522_v19 = vpop.permute.xlu2 %3521 }
 0x9f9   : > { %v6678_v16 = vpop.f32.mrf.mxu2 }
 0x9fa   : > { %v6669_v38 = vpop.f32.mrf.mxu1 }
 0x9fb   : > { %7050 = vst [vmem:[#allocation12_spill] sm:$0xff] %v6669_v38 }
 0x9fd   : > { %v6661_v42 = vpop.f32.mrf.mxu0 }
 0x9fe   : > { %1301 = vadd.xlane.f32.xlu1 %v1300_v9  ;;  %v3527_v14 = vpop.permute.xlu1 %3526  ;;  %v6702_v57 = vpop.permute.xlu0 %3531 }
 0x9ff   : > { %v6713_v50 = vpop.permute.xlu2 %3536 }
 0xa01   : > { %v6684_v1 = vpop.f32.mrf.mxu2 }
 0xa05   : > { %3312 = vmatmul.bf16.gmra.mxu0 %v3116_v26  ;;  %v6667_v53 = vpop.f32.mrf.mxu0 }
 0xa06   : > { %v6696_v32 = vpop.permute.xlu1 %3541  ;;  %v6721_v22 = vpop.permute.xlu0 %3546 }
 0xa09   : > { %v6690_v62 = vpop.f32.mrf.mxu2 }
 0xa0a   : > { %v6675_v60 = vpop.f32.mrf.mxu1 }
 0xa0b   : > { %7051 = vst [vmem:[#allocation13_spill] sm:$0xff] %v6675_v60 }
 0xa0d   : > { %v6673_v18 = vpop.f32.mrf.mxu0 }
 0xa0e   : > { %v6717_v36 = vpop.permute.xlu1 %3556 }
 0xa11   : > { %v6700_v30 = vpop.f32.mrf.mxu2 }
 0xa12   : > { %v6682_v3 = vpop.f32.mrf.mxu1 }
 0xa13   : > { %7052 = vst [vmem:[#allocation19_spill] sm:$0xff] %v6682_v3  ;;  %v6727_v3 = vpop.permute.xlu2 %3551 }
 0xa15   : > { %v6680_v34 = vpop.f32.mrf.mxu0 }
 0xa16   : > { %v6729_v60 = vpop.permute.xlu1 %3571 }
 0xa17   : > { %3676 = vperm.xlu1 %4964, %v3502_v54  }
 0xa19   : > { %v6719_v35 = vpop.f32.mrf.mxu2 }
 0xa1a   : > { %7055 = vst [vmem:[#allocation11_spill] sm:$0xff] %v6719_v35 }
 0xa1e   : > { %v6744_v38 = vpop.permute.xlu1 %3586 }
 0xa22   : > { %v6686_v45 = vpop.f32.mrf.mxu0 }
 0xa23   : > { %v6688_v55 = vpop.f32.mrf.mxu1 }
 0xa24   : > { %7053 = vst [vmem:[#allocation16_spill] sm:$0xff] %v6688_v55 }
 0xa2a   : > { %v6692_v52 = vpop.f32.mrf.mxu0 }
 0xa2b   : > { %v6694_v10 = vpop.f32.mrf.mxu1 }
 0xa2c   : > { %7054 = vst [vmem:[#allocation23_spill] sm:$0xff] %v6694_v10 }
 0xa32   : > { %v6698_v39 = vpop.f32.mrf.mxu0 }
 0xa33   : > { %v3342_v5 = vpop.f32.mrf.mxu1 }
 0xa34   : > { %v3343_v61 = vadd.f32 %v3342_v5, %v3244_v24 }
 0xa36   : > { %v3432_v54 = vmax.f32 %v3343_v61, 0.0 }
 0xa38   : > { %v3684_v55 = vmul.f32 %v3507_v25, %v3432_v54 }
 0xa3a   : > { %v6715_v12 = vpop.f32.mrf.mxu0  ;;  %v3720_v61 = vsel %vm286_vm1, %v3684_v55, 0.0 }
 0xa3b   : > { %v3344_v9 = vpop.f32.mrf.mxu1 }
 0xa3c   : > { %v3345_v49 = vadd.f32 %v3344_v9, %v3246_v47  ;;  %v6732_v47 = vpop.f32.mrf.mxu2  ;;  %v6734_v9 = vpop.permute.xlu0 %3561 }
 0xa3d   : > { %7056 = vst [vmem:[#allocation14_spill] sm:$0xff] %v6732_v47 }
 0xa3e   : > { %v3433_v26 = vmax.f32 %v3345_v49, 0.0  ;;  %v3251_v49 = vadd.f32 %v6707_v33, %v6516_v43 }
 0xa40   : > { %v3685_v40 = vmul.f32 %v3512_v6, %v3433_v26 }
 0xa42   : > { %v6725_v10 = vpop.f32.mrf.mxu0  ;;  %v3721_v5 = vsel %vm286_vm1, %v3685_v40, 0.0 }
 0xa43   : > { %v3347_v0 = vpop.f32.mrf.mxu1  ;;  %v3722_v6 = vadd.f32 %v3721_v5, %v3720_v61 }
 0xa44   : > { %v3348_v15 = vadd.f32 %v3347_v0, %v3249_v13  ;;  %v6746_v63 = vpop.f32.mrf.mxu2  ;;  %v6750_v55 = vpop.permute.xlu0 %3576 }
 0xa45   : > { %7057 = vst [vmem:[#allocation15_spill] sm:$0xff] %v6746_v63 }
 0xa46   : > { %v3434_v24 = vmax.f32 %v3348_v15, 0.0  ;;  %v6742_v15 = vpop.permute.xlu2 %3566 }
 0xa48   : > { %v3686_v4 = vmul.f32 %v3517_v51, %v3434_v24  ;;  %v3254_v51 = vadd.f32 %v6707_v33, %v6534_v41 }
 0xa4a   : > { %v3723_v25 = vsel %vm286_vm1, %v3686_v4, 0.0  ;;  %v6740_v13 = vpop.f32.mrf.mxu0  ;;  %v3259_v4 = vadd.f32 %v6707_v33, %v6573_v17 }
 0xa4b   : > { %v3724_v26 = vadd.f32 %v3723_v25, %v3722_v6  ;;  %v3349_v54 = vpop.f32.mrf.mxu1  ;;  %v3261_v25 = vadd.f32 %v6707_v33, %v6589_v59  ;;  %v7059_v59 = vld [vmem:[#allocation8_spill] sm:$0xff] }
 0xa4c   : > { %v3350_v0 = vadd.f32 %v3349_v54, %v3251_v49 }
 0xa4e   : > { %v3435_v40 = vmax.f32 %v3350_v0, 0.0  ;;  %v6759_v0 = vpop.permute.xlu2 %3581 }
 0xa50   : > { %v3687_v43 = vmul.f32 %v3522_v19, %v3435_v40  ;;  %v3256_v19 = vadd.f32 %v6707_v33, %v6553_v46  ;;  %v7058_v40 = vld [vmem:[#allocation7_spill] sm:$0xff]  ;;  %v6774_v46 = vpop.f32.mrf.mxu2 }
 0xa51   : > { %v3358_v63 = vadd.f32 %v7058_v40, %v3259_v4  ;;  %7060 = vst [vmem:[#allocation20_spill] sm:$0xff] %v6774_v46  ;;  %v3269_v4 = vadd.f32 %v6707_v33, %v6625_v2 }
 0xa52   : > { %v6752_v24 = vpop.f32.mrf.mxu0  ;;  %v3725_v6 = vsel %vm286_vm1, %v3687_v43, 0.0 }
 0xa53   : > { %v3352_v5 = vpop.f32.mrf.mxu1  ;;  %v3726_v41 = vadd.f32 %v3725_v6, %v3724_v26  ;;  %v3266_v26 = vadd.f32 %v6707_v33, %v6613_v28  ;;  %v3368_v2 = vadd.f32 %v6349_v29, %v3269_v4  ;;  %v3276_v29 = vadd.f32 %v6707_v33, %v6667_v53 }
 0xa54   : > { %v3353_v61 = vadd.f32 %v3352_v5, %v3254_v51  ;;  %v3264_v51 = vadd.f32 %v6707_v33, %v6601_v58  ;;  %v6766_v5 = vpop.permute.xlu1 %3601  ;;  %v6778_v58 = vpop.permute.xlu0 %3591 }
 0xa56   : > { %v3436_v49 = vmax.f32 %v3353_v61, 0.0 }
 0xa58   : > { %v3688_v54 = vmul.f32 %v3527_v14, %v3436_v49  ;;  %v3360_v14 = vadd.f32 %v7059_v59, %v3261_v25  ;;  %v7061_v49 = vld [vmem:[#allocation17_spill] sm:$0xff]  ;;  %v3274_v25 = vadd.f32 %v6707_v33, %v6661_v42  ;;  %v7062_v59 = vld [vmem:[#allocation18_spill] sm:$0xff] }
 0xa59   : > { %v3363_v40 = vadd.f32 %v7061_v49, %v3264_v51  ;;  %v3365_v28 = vadd.f32 %v7062_v59, %v3266_v26  ;;  %v6793_v49 = vpop.permute.xlu2 %3596 }
 0xa5a   : > { %v3727_v17 = vsel %vm286_vm1, %v3688_v54, 0.0  ;;  %v6769_v47 = vpop.f32.mrf.mxu0  ;;  %v3438_v54 = vmax.f32 %v3358_v63, 0.0 }
 0xa5b   : > { %v3728_v43 = vadd.f32 %v3727_v17, %v3726_v41  ;;  %v3354_v61 = vpop.f32.mrf.mxu1  ;;  %v3271_v17 = vadd.f32 %v6707_v33, %v6644_v56  ;;  %v3440_v51 = vmax.f32 %v3363_v40, 0.0  ;;  %v3373_v56 = vadd.f32 %v6503_v31, %v3274_v25 }
 0xa5c   : > { %v3355_v6 = vadd.f32 %v3354_v61, %v3256_v19  ;;  %v3690_v19 = vmul.f32 %v6713_v50, %v3438_v54  ;;  %v3439_v61 = vmax.f32 %v3360_v14, 0.0  ;;  %v3441_v14 = vmax.f32 %v3365_v28, 0.0 }
 0xa5d   : > { %v3279_v40 = vadd.f32 %v6707_v33, %v6673_v18  ;;  %v3281_v54 = vadd.f32 %v6707_v33, %v6680_v34  ;;  %v3375_v25 = vadd.f32 %v6527_v11, %v3276_v29  ;;  %v3289_v11 = vadd.f32 %v6707_v33, %v6698_v39 }
 0xa5e   : > { %v3437_v41 = vmax.f32 %v3355_v6, 0.0  ;;  %v3691_v35 = vmul.f32 %v6696_v32, %v3439_v61  ;;  %v3370_v6 = vadd.f32 %v6389_v20, %v3271_v17  ;;  %v3731_v50 = vsel %vm286_vm1, %v3690_v19, 0.0  ;;  %v6811_v17 = vpop.permute.xlu0 %3606 }
 0xa5f   : > { %v3692_v32 = vmul.f32 %v6721_v22, %v3440_v51  ;;  %v3442_v20 = vmax.f32 %v3368_v2, 0.0  ;;  %v3693_v31 = vmul.f32 %v6727_v3, %v3441_v14  ;;  %v3284_v3 = vadd.f32 %v6707_v33, %v6686_v45 }
 0xa60   : > { %v3689_v46 = vmul.f32 %v6702_v57, %v3437_v41  ;;  %v6801_v57 = vpop.permute.xlu1 %3616  ;;  %v3444_v41 = vmax.f32 %v3373_v56, 0.0  ;;  %v3443_v53 = vmax.f32 %v3370_v6, 0.0  ;;  %v3378_v34 = vadd.f32 %v6549_v8, %v3279_v40 }
 0xa61   : > { %v3735_v59 = vsel %vm286_vm1, %v3692_v32, 0.0  ;;  %v3694_v28 = vmul.f32 %v6717_v36, %v3442_v20  ;;  %v3737_v19 = vsel %vm286_vm1, %v3693_v31, 0.0  ;;  %v3380_v61 = vadd.f32 %v6567_v27, %v3281_v54  ;;  %v3612_v8 = vpop.permute.xlu2 %3611 }
 0xa62   : > { %v3729_v63 = vsel %vm286_vm1, %v3689_v46, 0.0  ;;  %v6795_v26 = vpop.f32.mrf.mxu0  ;;  %v6803_v46 = vpop.f32.mrf.mxu2  ;;  %v3286_v2 = vadd.f32 %v6707_v33, %v6692_v52  ;;  %v3383_v6 = vadd.f32 %v6591_v23, %v3284_v3  ;;  %v3291_v27 = vadd.f32 %v6707_v33, %v6715_v12 }
 0xa63   : > { %v3730_v42 = vadd.f32 %v3729_v63, %v3728_v43  ;;  %v3733_v43 = vsel %vm286_vm1, %v3691_v35, 0.0  ;;  %v3695_v35 = vmul.f32 %v6734_v9, %v3443_v53  ;;  %v3696_v63 = vmul.f32 %v6742_v15, %v3444_v41 }
 0xa64   : > { %v3739_v45 = vsel %vm286_vm1, %v3694_v28, 0.0  ;;  %v3445_v9 = vmax.f32 %v3375_v25, 0.0  ;;  %v3447_v52 = vmax.f32 %v3380_v61, 0.0  ;;  %v3446_v39 = vmax.f32 %v3378_v34, 0.0 }
 0xa65   : > { %v3732_v4 = vadd.f32 %v3731_v50, %v3730_v42  ;;  %v3741_v56 = vsel %vm286_vm1, %v3695_v35, 0.0  ;;  %v3385_v14 = vadd.f32 %v6607_v21, %v3286_v2  ;;  %v3388_v32 = vadd.f32 %v6621_v48, %v3289_v11 }
 0xa66   : > { %v3697_v50 = vmul.f32 %v6729_v60, %v3445_v9  ;;  %v3743_v20 = vsel %vm286_vm1, %v3696_v63, 0.0  ;;  %v3448_v31 = vmax.f32 %v3383_v6, 0.0  ;;  %v3294_v12 = vadd.f32 %v6707_v33, %v6725_v10 }
 0xa67   : > { %v3734_v22 = vadd.f32 %v3733_v43, %v3732_v4  ;;  %v3698_v4 = vmul.f32 %v6750_v55, %v3446_v39  ;;  %v3622_v43 = vpop.permute.xlu0 %3621  ;;  %v3390_v60 = vadd.f32 %v6642_v44, %v3291_v27  ;;  %v3699_v21 = vmul.f32 %v6759_v0, %v3447_v52 }
 0xa68   : > { %v6834_v29 = vpop.permute.xlu1 %3631  ;;  %v3745_v54 = vsel %vm286_vm1, %v3697_v50, 0.0  ;;  %v3449_v41 = vmax.f32 %v3385_v14, 0.0  ;;  %v3296_v48 = vadd.f32 %v6707_v33, %v6740_v13  ;;  %v3450_v53 = vmax.f32 %v3388_v32, 0.0 }
 0xa69   : > { %v3736_v18 = vadd.f32 %v3735_v59, %v3734_v22  ;;  %v3747_v55 = vsel %vm286_vm1, %v3698_v4, 0.0  ;;  %v3700_v59 = vmul.f32 %v6744_v38, %v3448_v31  ;;  %v3393_v10 = vadd.f32 %v6663_v37, %v3294_v12  ;;  %v3627_v34 = vpop.permute.xlu2 %3626  ;;  %v7063_v4 = vld [vmem:[#allocation11_spill] sm:$0xff] }
 0xa6a   : > { %v3305_v36 = vpop.f32.mrf.mxu0  ;;  %v6836_v15 = vpop.f32.mrf.mxu2  ;;  %v3299_v44 = vadd.f32 %v6707_v33, %v6752_v24  ;;  %v3451_v28 = vmax.f32 %v3390_v60, 0.0  ;;  %v3749_v3 = vsel %vm286_vm1, %v3699_v21, 0.0  ;;  %v3701_v35 = vmul.f32 %v6778_v58, %v3449_v41 }
 0xa6b   : > { %v3738_v51 = vadd.f32 %v3737_v19, %v3736_v18  ;;  %v3395_v13 = vadd.f32 %v6671_v7, %v3296_v48  ;;  %v3301_v18 = vadd.f32 %v6707_v33, %v6769_v47  ;;  %v3702_v38 = vmul.f32 %v6793_v49, %v3450_v53 }
 0xa6c   : > { %v3751_v61 = vsel %vm286_vm1, %v3700_v59, 0.0  ;;  %v3452_v2 = vmax.f32 %v3393_v10, 0.0  ;;  %v3398_v11 = vadd.f32 %v6678_v16, %v3299_v44  ;;  %v3304_v58 = vadd.f32 %v6707_v33, %v6795_v26  ;;  %v4227_v44 = vld [vmem:[%s6996_s2 + $0x80] sm:$0xff] }
 0xa6d   : > { %v3740_v42 = vadd.f32 %v3739_v45, %v3738_v51  ;;  %v3703_v7 = vmul.f32 %v6766_v5, %v3451_v28  ;;  %v3753_v47 = vsel %vm286_vm1, %v3701_v35, 0.0  ;;  %v3453_v63 = vmax.f32 %v3395_v13, 0.0  ;;  %3829 = vmatpush.bf16.msra.mxu1 %v4227_v44 }
 0xa6e   : > { %v3400_v45 = vadd.f32 %v6684_v1, %v3301_v18  ;;  %v3306_v49 = vadd.f32 %v6707_v33, %v3305_v36  ;;  %v3755_v9 = vsel %vm286_vm1, %v3702_v38, 0.0  ;;  %v3704_v16 = vmul.f32 %v6811_v17, %v3452_v2  ;;  %v4226_v18 = vld [vmem:[%s6996_s2 + $0x78] sm:$0xff] }
 0xa6f   : > { %v3742_v23 = vadd.f32 %v3741_v56, %v3740_v42  ;;  %v3637_v6 = vpop.permute.xlu0 %3636  ;;  %v3454_v42 = vmax.f32 %v3398_v11, 0.0  ;;  %v3403_v26 = vadd.f32 %v6690_v62, %v3304_v58  ;;  %v3757_v52 = vsel %vm286_vm1, %v3703_v7, 0.0  ;;  %v7067_v2 = vld [vmem:[#allocation12_spill] sm:$0xff] }
 0xa70   : > { %v6862_v24 = vpop.permute.xlu1 %3646  ;;  %v3705_v39 = vmul.f32 %v3612_v8, %v3453_v63  ;;  %v3455_v14 = vmax.f32 %v3400_v45, 0.0  ;;  %v3405_v1 = vadd.f32 %v6700_v30, %v3306_v49  ;;  %v7064_v30 = vld [vmem:[#allocation14_spill] sm:$0xff]  ;;  %v3321_v11 = vadd.f32 %v6707_v33, %v7067_v2 }
 0xa71   : > { %v3744_v40 = vadd.f32 %v3743_v20, %v3742_v23  ;;  %v3759_v23 = vsel %vm286_vm1, %v3704_v16, 0.0  ;;  %v3706_v20 = vmul.f32 %v6801_v57, %v3454_v42  ;;  %v3456_v17 = vmax.f32 %v3403_v26, 0.0  ;;  %v3642_v12 = vpop.permute.xlu2 %3641  ;;  %3830 = vmatpush.bf16.msra.mxu1 %v4226_v18 }
 0xa72   : > { %v3308_v25 = vpop.f32.mrf.mxu0  ;;  %v6858_v19 = vpop.f32.mrf.mxu2  ;;  %v3761_v8 = vsel %vm286_vm1, %v3705_v39, 0.0  ;;  %v3707_v21 = vmul.f32 %v3622_v43, %v3455_v14  ;;  %v3420_v26 = vadd.f32 %v6836_v15, %v3321_v11 }
 0xa73   : > { %v3746_v22 = vadd.f32 %v3745_v54, %v3744_v40  ;;  %v3309_v5 = vadd.f32 %v6707_v33, %v3308_v25  ;;  %v3457_v54 = vmax.f32 %v3405_v1, 0.0  ;;  %v3708_v25 = vmul.f32 %v3627_v34, %v3456_v17  ;;  %v7066_v34 = vld [vmem:[#allocation10_spill] sm:$0xff] }
 0xa74   : > { %v3765_v28 = vsel %vm286_vm1, %v3707_v21, 0.0  ;;  %v3319_v38 = vadd.f32 %v6707_v33, %v7066_v34 }
 0xa75   : > { %v3748_v0 = vadd.f32 %v3747_v55, %v3746_v22  ;;  %v3408_v31 = vadd.f32 %v7063_v4, %v3309_v5  ;;  %v3763_v22 = vsel %vm286_vm1, %v3706_v20, 0.0  ;;  %v3709_v43 = vmul.f32 %v6834_v29, %v3457_v54  ;;  %v7069_v5 = vld [vmem:[#allocation19_spill] sm:$0xff]  ;;  %v7072_v4 = vld [vmem:[#allocation16_spill] sm:$0xff] }
 0xa76   : > { %v7073_v54 = vld [vmem:[#allocation23_spill] sm:$0xff] }
 0xa77   : > { %v3750_v37 = vadd.f32 %v3749_v3, %v3748_v0  ;;  %v3458_v57 = vmax.f32 %v3408_v31, 0.0  ;;  %v3652_v59 = vpop.permute.xlu0 %3651  ;;  %v7065_v3 = vld [vmem:[#allocation15_spill] sm:$0xff]  ;;  %v3769_v7 = vsel %vm286_vm1, %v3709_v43, 0.0  ;;  %v3329_v31 = vadd.f32 %v6707_v33, %v7072_v4 }
 0xa78   : > { %v6881_v40 = vpop.permute.xlu1 %3661 }
 0xa79   : > { %v3752_v51 = vadd.f32 %v3751_v61, %v3750_v37  ;;  %v3767_v37 = vsel %vm286_vm1, %v3708_v25, 0.0  ;;  %v3710_v61 = vmul.f32 %v3637_v6, %v3458_v57  ;;  %v3657_v45 = vpop.permute.xlu2 %3656 }
 0xa7a   : > { %v3310_v27 = vpop.f32.mrf.mxu0  ;;  %v3424_v62 = vpop.f32.mrf.mxu2 }
 0xa7b   : > { %v3754_v56 = vadd.f32 %v3753_v47, %v3752_v51  ;;  %v3311_v36 = vadd.f32 %v6707_v33, %v3310_v27  ;;  %v7068_v27 = vld [vmem:[#allocation13_spill] sm:$0xff]  ;;  %v3771_v6 = vsel %vm286_vm1, %v3710_v61, 0.0 }
 0xa7c   : > { %v3324_v16 = vadd.f32 %v6707_v33, %v7068_v27 }
 0xa7d   : > { %v3756_v50 = vadd.f32 %v3755_v9, %v3754_v56  ;;  %v3410_v41 = vadd.f32 %v7064_v30, %v3311_v36  ;;  %v3418_v56 = vadd.f32 %v6803_v46, %v3319_v38  ;;  %v7071_v46 = vld [vmem:[#allocation20_spill] sm:$0xff]  ;;  %v3331_v30 = vadd.f32 %v6707_v33, %v7073_v54 }
 0xa7e   : > { %v3423_v17 = vadd.f32 %v6858_v19, %v3324_v16  ;;  %v4225_v19 = vld [vmem:[%s6996_s2 + $0x70] sm:$0xff] }
 0xa7f   : > { %v3758_v32 = vadd.f32 %v3757_v52, %v3756_v50  ;;  %v3459_v0 = vmax.f32 %v3410_v41, 0.0  ;;  %v3326_v52 = vadd.f32 %v6707_v33, %v7069_v5  ;;  %v7070_v50 = vld [vmem:[#allocation6_spill] sm:$0xff]  ;;  %v3462_v15 = vmax.f32 %v3418_v56, 0.0  ;;  %3857 = vmatpush.bf16.msrb.mxu1 %v4225_v19 }
 0xa80   : > { %v1302_v51 = vpop.xlane.xlu1 %1301 }
 0xa81   : > { %v3760_v60 = vadd.f32 %v3759_v23, %v3758_v32  ;;  %v3711_v47 = vmul.f32 %v3642_v12, %v3459_v0  ;;  %v1303_v39 = vmul.f32 %v1302_v51, %v7070_v50  ;;  %v3667_v23 = vpop.permute.xlu0 %3666  ;;  %v3714_v41 = vmul.f32 %v3657_v45, %v3462_v15  ;;  %v4231_v15 = vld [vmem:[%s6996_s2 + $0xa0] sm:$0xff] }
 0xa82   : > { %v3313_v53 = vpop.f32.mrf.mxu0  ;;  %v3427_v58 = vpop.f32.mrf.mxu2 }
 0xa83   : > { %v3762_v48 = vadd.f32 %v3761_v8, %v3760_v60  ;;  %v3314_v55 = vadd.f32 %v6707_v33, %v3313_v53  ;;  %v3773_v1 = vsel %vm286_vm1, %v3711_v47, 0.0  ;;  %v3425_v60 = vadd.f32 %v3424_v62, %v3326_v52 }
 0xa84   : > { %v3463_v8 = vmax.f32 %v3420_v26, 0.0  ;;  %v1304_v21 = vadd.f32 1e-06, %v1303_v39  ;;  %v3428_v25 = vadd.f32 %v3427_v58, %v3329_v31 }
 0xa85   : > { %v3764_v10 = vadd.f32 %v3763_v22, %v3762_v48  ;;  %v3413_v35 = vadd.f32 %v7065_v3, %v3314_v55  ;;  %v3464_v55 = vmax.f32 %v3423_v17, 0.0  ;;  %v3465_v43 = vmax.f32 %v3425_v60, 0.0  ;;  %v1292_v17 = vld [vmem:[%s6997_s3 + $0x49] sm:$0x1]  ;;  %v4229_v60 = vld [vmem:[%s6996_s2 + $0x90] sm:$0xff] }
 0xa86   : > { %v3715_v57 = vmul.f32 %v6881_v40, %v3463_v8  ;;  %5064 = vrsqrt.f32 %v1304_v21  ;;  %vm1311_vm2 = vweird.f32 %v1304_v21  ;;  %v4228_v8 = vld [vmem:[%s6996_s2 + $0x88] sm:$0xff] }
 0xa87   : > { %v3766_v13 = vadd.f32 %v3765_v28, %v3764_v10  ;;  %v3460_v63 = vmax.f32 %v3413_v35, 0.0  ;;  %v3672_v10 = vpop.permute.xlu2 %3671  ;;  %v3779_v28 = vsel %vm286_vm1, %v3714_v41, 0.0  ;;  %v3716_v0 = vmul.f32 %v3667_v23, %v3464_v55  ;;  %v1291_v23 = vld [vmem:[%s6997_s3 + $0x48] sm:$0x1]  ;;  %v3864_v41 = vld [vmem:[%s6997_s3 + $0x4b] sm:$0x1] }
 0xa88   : > { %v3717_v40 = vmul.f32 %v3672_v10, %v3465_v43  ;;  %v3781_v18 = vsel %vm286_vm1, %v3715_v57, 0.0 }
 0xa89   : > { %v3768_v29 = vadd.f32 %v3767_v37, %v3766_v13  ;;  %v3712_v36 = vmul.f32 %v6862_v24, %v3460_v63  ;;  %v3677_v3 = vpop.permute.xlu1 %3676  ;;  %v3466_v13 = vmax.f32 %v3428_v25, 0.0  ;;  %v3682_v34 = vpop.permute.xlu0 %3681  ;;  %v3783_v61 = vsel %vm286_vm1, %v3716_v0, 0.0  ;;  %v3876_v25 = vld [vmem:[%s6997_s3 + $0x4c] sm:$0x1] }
 0xa8a   : > { %v3315_v9 = vpop.f32.mrf.mxu0  ;;  %v3429_v53 = vpop.f32.mrf.mxu2 }
 0xa8b   : > { %v3770_v49 = vadd.f32 %v3769_v7, %v3768_v29  ;;  %v3316_v42 = vadd.f32 %v6707_v33, %v3315_v9  ;;  %v3775_v24 = vsel %vm286_vm1, %v3712_v36, 0.0  ;;  %v4224_v33 = vld [vmem:[%s6996_s2 + $0x68] sm:$0xff]  ;;  %v3718_v2 = vmul.f32 %v3677_v3, %v3466_v13 }
 0xa8c   : > { %3858 = vmatpush.bf16.msrb.mxu1 %v4224_v33  ;;  %v5065_v11 = vpop.eup %5064  ;;  %v3785_v29 = vsel %vm286_vm1, %v3717_v40, 0.0 }
 0xa8d   : > { %v3772_v14 = vadd.f32 %v3771_v6, %v3770_v49  ;;  %v3415_v32 = vadd.f32 %v7071_v46, %v3316_v42  ;;  %v1306_v47 = vmul.f32 %v5065_v11, %v1304_v21  ;;  %v3787_v63 = vsel %vm286_vm1, %v3718_v2, 0.0  ;;  %v7074_v46 = vld [vmem:[#allocation21_spill] sm:$0xff] }
 0xa8e   : > { %vm1312_vm0 = vweird.f32 %v5065_v11 }
 0xa8f   : > { %v3774_v20 = vadd.f32 %v3773_v1, %v3772_v14  ;;  %v3461_v12 = vmax.f32 %v3415_v32, 0.0  ;;  %v1307_v56 = vmul.f32 %v5065_v11, %v1306_v47  ;;  %vm1313_vm8 = vmor %vm1311_vm2, %vm1312_vm0 }
 0xa91   : > { %v3713_v48 = vmul.f32 %v3652_v59, %v3461_v12  ;;  %v3776_v22 = vadd.f32 %v3775_v24, %v3774_v20  ;;  %v3430_v59 = vadd.f32 %v3429_v53, %v3331_v30  ;;  %v1308_v6 = vmul.f32 0.5, %v1307_v56  ;;  %v4230_v12 = vld [vmem:[%s6996_s2 + $0x98] sm:$0xff] }
 0xa93   : > { %v3777_v62 = vsel %vm286_vm1, %v3713_v48, 0.0  ;;  %v3467_v37 = vmax.f32 %v3430_v59, 0.0  ;;  %v1309_v5 = vsub.f32 1.5, %v1308_v6 }
 0xa94   : > { %v3778_v44 = vadd.f32 %v3777_v62, %v3776_v22 }
 0xa95   : > { %v3719_v7 = vmul.f32 %v3682_v34, %v3467_v37  ;;  %v1310_v39 = vmul.f32 %v5065_v11, %v1309_v5 }
 0xa96   : > { %v3780_v35 = vadd.f32 %v3779_v28, %v3778_v44 }
 0xa97   : > { %v3789_v49 = vsel %vm286_vm1, %v3719_v7, 0.0  ;;  %v1314_v36 = vsel %vm1313_vm8, %v5065_v11, %v1310_v39 }
 0xa98   : > { %v3782_v38 = vadd.f32 %v3781_v18, %v3780_v35  ;;  %v1315_v32 = vmul.f32 %v1314_v36, %v7074_v46 }
 0xa9a   : > { %v3784_v58 = vadd.f32 %v3783_v61, %v3782_v38  ;;  %v1316_v20 = vmul.f32 %v1315_v32, %v1291_v23 }
 0xa9c   : > { %v3786_v51 = vadd.f32 %v3785_v29, %v3784_v58  ;;  %v1317_v4 = vadd.f32 %v1316_v20, %v1292_v17 }
 0xa9e   : > { %v3788_v45 = vadd.f32 %v3787_v63, %v3786_v51  ;;  %v3802_v31 = vpack.c.bf16 %v1317_v4, %v1317_v4 }
 0xaa0   : > { %v3790_v9 = vadd.f32 %v3789_v49, %v3788_v45 }
 0xaa2   : > { %v3791_v27 = vrot.slane %v3790_v9, 4 }
 0xaa4   : > { %v3792_v16 = vadd.f32 %v3791_v27, %v3790_v9 }
 0xaa6   : > { %v3793_v42 = vrot.slane %v3792_v16, 2 }
 0xaa8   : > { %v3794_v26 = vadd.f32 %v3793_v42, %v3792_v16 }
 0xaaa   : > { %v3795_v52 = vrot.slane %v3794_v26, 1 }
 0xaac   : > { %v3796_v50 = vadd.f32 %v3795_v52, %v3794_v26 }
 0xaae   : > { %v3797_v14 = vmul.f32 0.00390625, %v3796_v50 }
 0xab0   : > { %v3807_v1 = vpack.c.bf16 %v3797_v14, %v3797_v14 }
 0xab2   : > { %4171 = vmatmul.msk.bf16.vlgmr.msra.gmra.mxu1 %vm286_vm1, %v3807_v1 }
 0xab3   : > { %3908 = vmatpush.bf16.msra.mxu1 %v4231_v15 }
 0xab7   : > { %3909 = vmatpush.bf16.msra.mxu1 %v4230_v12 }
 0xabb   : > { %3910 = vmatpush.bf16.msra.mxu1 %v4229_v60 }
 0xabf   : > { %3911 = vmatpush.bf16.msra.mxu1 %v4228_v8 }
 0xac2   : > { %4180 = vmatmul.msk.bf16.vlgmr.msrb.gmra.mxu1 %vm286_vm1, %v3802_v31 }
 0xb2f   : > { %v3832_v21 = vpop.f32.mrf.mxu1 }
 0xb37   : > { %v3834_v54 = vpop.f32.mrf.mxu1 }
 0xb3f   : > { %v3860_v30 = vpop.f32.mrf.mxu1 }
 0xb40   : > { %v3861_v24 = vadd.f32 %v3860_v30, %v3832_v21 }
 0xb42   : > { %v3865_v48 = vadd.f32 %v3864_v41, %v3861_v24 }
 0xb44   : > { %v3866_v53 = vmax.f32 %v3865_v48, 0.0 }
 0xb46   : > { %v3875_v22 = vpack.c.bf16 %v3866_v53, %v3866_v53 }
 0xb47   : > { %v3862_v19 = vpop.f32.mrf.mxu1 }
 0xb48   : > { %4197 = vmatmul.msk.bf16.vlgmr.msra.gmra.mxu1 %vm1264_vm3, %v3875_v22 }
 0xbc5   : > { %v3913_v57 = vpop.f32.mrf.mxu1 }
 0xbc6   : > { %v3914_v55 = vadd.f32 %v3913_v57, %v3876_v25 }
 0xbc8   : > { %3917 = vst [vmem:[%s206_s20] sm:$0x1] %v3914_v55 }
 0xbc9   : > { %5095 = shalt.err (!%p5092_p4)
}
 0xbca   : > { %4245 = dma.vmem_to_hbm [thread:$0]  (%p5213_p5), %s3930_s22, 16, %s3932_s5, %s3919_s6  }
 0xbcd   : > { %v3915_v62 = vpop.f32.mrf.mxu1 }
 0xbce PF: > { %p4251_p7 = scmp.ge.s32.totalorder %s5130_s18, 2  ;;  %s3943_s7 = sand.u32 1, %s5118_s15  }
 0xbcf   : > { %s3944_s8 = scalar_lea.sflag [#allocation4], %s3943_s7 }
 0xbd0   : > { %p4248_p8 = pnand %p4251_p7, %p5217_p6 }
 0xbd2   : > { %p4249_p9 = pneg %p4248_p8 }
 0xbd4   : > { %5113 = dma.done.wait (%p4249_p9), %s3944_s8, 16  }
 0xbd5   : > { %5115 = vsyncadd (%p4249_p9), %s3944_s8, 4294967280  ;;  %p14_p10 = scmp.ge.s32.totalorder %s5200_s21, 4   ;;  %s7075_s15 = smov %s5122_s16 }
 0xbd6   : > { %s7076_s16 = smov %s5126_s17  ;;  %s7077_s17 = smov %s5211_s24 }
 0xbd7   : > { %s7078_s18 = smov %s5200_s21  ;;  %16 = sbr.rel (!%p14_p10) target bundleno = 3 (0x3), region = 74 }
 0xbdc   :  { %3949 = vsyncpa [#allocation4], 1 }
 0xbdd   :  { %3951 = vsyncpa [#allocation4 + $0x1], 1 }

</bundles_post_ra>
